<compile_context>
chip_gen: v5e
topology: v5e:2x2
jax: 0.10.0
libtpu: 0.0.40
codegen_flags: <defaults>
</compile_context>

<pallas_src>
import functools

import jax
import jax.numpy as jnp
import numpy as np
from jax.experimental import pallas as pl
from jax.experimental.pallas import tpu as pltpu


def fused_tamper_kernel(mask_ref, p1_ref, w1_ref, b1_ref, w2_ref, b2_ref,
                        w3_ref, b3_ref, o_ref, patch2_ref, patch3_ref,
                        *, H, W):
    # mask_ref   : (16, HW)    per-tap 0/1 validity masks (rows 0..8 used)
    # p1_ref     : (32, HW)    conv1 im2col patches, K padded 27 -> 32
    # w1_ref     : (64, 32)    conv1 weights (Cout, K)
    # w2_ref     : (128, 576)  conv2 weights (Cout, 9*64)  -- true K, no pad
    # w3_ref     : (8, 1152)   conv3 weights (Cout padded 3 -> 8, 9*128)
    # b*_ref     : (Cout, 1)   biases as column vectors
    # o_ref      : (8, HW)     lane-dense NCHW-flat output (rows 0..2 real)
    # patch2_ref : (576, HW)   conv2 im2col scratch
    # patch3_ref : (1152, HW)  conv3 im2col scratch
    HW = H * W

    def build_patches(act, patch_ref, c):
        # act: (c, HW) channels-first activation, HW on the lane axis.
        # Tap (dy, dx) == act shifted by off = (dy-1)*W + (dx-1) flat pixels
        # (pltpu.roll -> XLU slot), with positions whose 3x3 source pixel
        # falls outside the image zeroed via the precomputed mask (VPU mul).
        # Every store is at a sublane offset that is a multiple of 64.
        for dy in range(3):
            for dx in range(3):
                t = dy * 3 + dx
                off = (dy - 1) * W + (dx - 1)
                if off == 0:
                    tap = act
                else:
                    tap = pltpu.roll(act, shift=(-off) % HW, axis=1)
                    tap = tap * mask_ref[t:t + 1, :]
                patch_ref[t * c:(t + 1) * c, :] = tap

    # conv1 + ReLU: (64, 32) @ (32, HW). Padded K rows/cols are exactly zero.
    h1 = jnp.dot(w1_ref[...], p1_ref[...], preferred_element_type=jnp.float32)
    h1 = jnp.maximum(h1 + b1_ref[...], 0.0)

    # conv2 + ReLU: single K-folded contraction, true K = 576.
    build_patches(h1, patch2_ref, 64)
    h2 = jnp.dot(w2_ref[...], patch2_ref[...],
                 preferred_element_type=jnp.float32)
    h2 = jnp.maximum(h2 + b2_ref[...], 0.0)

    # conv3 + Sigmoid: only 8 output channels are computed, so the epilogue
    # (bias + sigmoid + store) is 2 vregs and already NCHW-flat.
    build_patches(h2, patch3_ref, 128)
    y3 = jnp.dot(w3_ref[...], patch3_ref[...],
                 preferred_element_type=jnp.float32)
    o_ref[...] = jax.nn.sigmoid(y3 + b3_ref[...]).astype(o_ref.dtype)


def tamper_trace_forward(x_nchw, params):
    (w1, b1), (w2, b2), (w3, b3) = params
    N, Cin, H, W = x_nchw.shape
    HW = H * W
    K1 = 9 * Cin            # 27
    K1P = 32                # padded conv1 K (unmasked tiles)
    COUT_P = 8              # padded output channel count (3 real)

    # conv1 im2col in the wrapper (input is tiny, Cin=3), channels-first:
    # p1t[n, t*Cin + c, y*W + x] = x_pad[n, c, y+dy, x+dx]
    xp = jnp.pad(x_nchw, ((0, 0), (0, 0), (1, 1), (1, 1)))
    taps = [xp[:, :, dy:dy + H, dx:dx + W].reshape(N, Cin, HW)
            for dy in range(3) for dx in range(3)]
    p1t = jnp.concatenate(taps, axis=1)                     # (N, 27, HW)
    p1t = jnp.pad(p1t, ((0, 0), (0, K1P - K1), (0, 0)))     # (N, 32, HW)

    # Weights reshaped to channels-first matmul operands (all wrapper-side).
    w1t = jnp.pad(w1.reshape(K1, 64).T, ((0, 0), (0, K1P - K1)))        # (64,32)
    b1c = b1.reshape(64, 1)
    w2t = w2.reshape(9 * 64, 128).T                                      # (128,576)
    b2c = b2.reshape(128, 1)
    w3t = jnp.pad(w3.reshape(9 * 128, 3).T, ((0, COUT_P - 3), (0, 0)))   # (8,1152)
    b3c = jnp.pad(b3, (0, COUT_P - 3)).reshape(COUT_P, 1)

    # Per-tap validity masks (1 where the 3x3 source pixel is in the image),
    # precomputed host-side; padded to 16 rows for sublane alignment.
    yy, xx = np.meshgrid(np.arange(H), np.arange(W), indexing="ij")
    mask_np = np.zeros((16, HW), np.float32)
    for dy in range(3):
        for dx in range(3):
            sy, sx = yy + dy - 1, xx + dx - 1
            valid = (sy >= 0) & (sy < H) & (sx >= 0) & (sx < W)
            mask_np[dy * 3 + dx] = valid.reshape(-1).astype(np.float32)
    masks = jnp.asarray(mask_np)

    kern = functools.partial(fused_tamper_kernel, H=H, W=W)
    # TODO(synk): on v7x use pltpu.CORE_PARALLEL (2 TCs) and add a haloed
    # spatial grid axis before scaling H/W beyond ~64 (im2col scratch growth).
    out = pl.pallas_call(
        kern,
        out_shape=jax.ShapeDtypeStruct((N, COUT_P, HW), jnp.float32),
        grid=(N,),
        in_specs=[
            pl.BlockSpec((16, HW), lambda n: (0, 0)),             # masks
            pl.BlockSpec((None, K1P, HW), lambda n: (n, 0, 0)),   # p1t
            pl.BlockSpec((64, K1P), lambda n: (0, 0)),            # w1
            pl.BlockSpec((64, 1), lambda n: (0, 0)),              # b1
            pl.BlockSpec((128, 9 * 64), lambda n: (0, 0)),        # w2
            pl.BlockSpec((128, 1), lambda n: (0, 0)),             # b2
            pl.BlockSpec((COUT_P, 9 * 128), lambda n: (0, 0)),    # w3
            pl.BlockSpec((COUT_P, 1), lambda n: (0, 0)),          # b3
        ],
        out_specs=pl.BlockSpec((None, COUT_P, HW), lambda n: (n, 0, 0)),
        scratch_shapes=[
            pltpu.VMEM((9 * 64, HW), jnp.float32),    # conv2 im2col (576,HW)
            pltpu.VMEM((9 * 128, HW), jnp.float32),   # conv3 im2col (1152,HW)
        ],
        compiler_params=pltpu.CompilerParams(
            dimension_semantics=("parallel",)),
    )(masks, p1t, w1t, b1c, w2t, b2c, w3t, b3c)

    return out[:, :3, :].reshape(N, 3, H, W)   # already NCHW-flat


def init_params(key):
    """Deterministic synthetic parameters matching the module's shapes (HWIO)."""
    ks = jax.random.split(key, 6)

    def conv_init(kw, kb, cin, cout):
        fan_in = cin * 9
        bound = 1.0 / np.sqrt(fan_in)
        w = jax.random.uniform(kw, (3, 3, cin, cout), jnp.float32,
                               -bound, bound)
        b = jax.random.uniform(kb, (cout,), jnp.float32, -bound, bound)
        return w, b

    w1, b1 = conv_init(ks[0], ks[1], 3, 64)
    w2, b2 = conv_init(ks[2], ks[3], 64, 128)
    w3, b3 = conv_init(ks[4], ks[5], 128, 3)
    return (w1, b1), (w2, b2), (w3, b3)


def tamper_trace_reference(x_nchw, params):
    """Pure-JAX reference (lax.conv, full-f32 precision) for correctness."""
    y = x_nchw
    acts = ["relu", "relu", "sigmoid"]
    for (w, b), act in zip(params, acts):
        w_oihw = jnp.transpose(w, (3, 2, 0, 1))
        y = jax.lax.conv_general_dilated(
            y, w_oihw, window_strides=(1, 1), padding="SAME",
            dimension_numbers=("NCHW", "OIHW", "NCHW"),
            precision=jax.lax.Precision.HIGHEST)
        y = y + b[None, :, None, None]
        y = jnp.maximum(y, 0.0) if act == "relu" else jax.nn.sigmoid(y)
    return y


if __name__ == "__main__":
    key = jax.random.PRNGKey(0)
    k_x, k_p = jax.random.split(key)

    # Small NCHW input consistent with the module: batch=2, C=3, 16x16.
    x = jax.random.normal(k_x, (2, 3, 16, 16), jnp.float32)
    params = init_params(k_p)

    fwd = jax.jit(tamper_trace_forward)
    out = jax.block_until_ready(fwd(x, params))

    ref = jax.block_until_ready(tamper_trace_reference(x, params))
    np.testing.assert_allclose(np.asarray(out), np.asarray(ref),
                               rtol=1e-4, atol=1e-5)

    assert out.shape == (2, 3, 16, 16) and out.dtype == jnp.float32
    print("KERNEL_OK")
</pallas_src>

<mosaic_0001>
module attributes {stable_mosaic.version = 11 : i64} {
  func.func @fused_tamper_kernel(%arg0: i32, %arg1: memref<16x256xf32, #tpu.memory_space<vmem>>, %arg2: memref<1x32x256xf32, #tpu.memory_space<vmem>>, %arg3: memref<64x32xf32, #tpu.memory_space<vmem>>, %arg4: memref<64x1xf32, #tpu.memory_space<vmem>>, %arg5: memref<128x576xf32, #tpu.memory_space<vmem>>, %arg6: memref<128x1xf32, #tpu.memory_space<vmem>>, %arg7: memref<8x1152xf32, #tpu.memory_space<vmem>>, %arg8: memref<8x1xf32, #tpu.memory_space<vmem>>, %arg9: memref<1x8x256xf32, #tpu.memory_space<vmem>>, %arg10: memref<576x256xf32, #tpu.memory_space<vmem>>, %arg11: memref<1152x256xf32, #tpu.memory_space<vmem>>) attributes {dimension_semantics = [#tpu.dimension_semantics<parallel>], iteration_bounds = array<i64: 2>, scalar_prefetch = 0 : i64, scratch_operands = 2 : i64, tpu.core_type = #tpu.core_type<tc>, window_params = [{pipeline_mode = #tpu.pipeline_mode<synchronous>, transform_indices = @transform_0, window_bounds = array<i64: 16, 256>}, {transform_indices = @transform_1, window_bounds = array<i64: 1, 32, 256>}, {pipeline_mode = #tpu.pipeline_mode<synchronous>, transform_indices = @transform_2, window_bounds = array<i64: 64, 32>}, {pipeline_mode = #tpu.pipeline_mode<synchronous>, transform_indices = @transform_3, window_bounds = array<i64: 64, 1>}, {pipeline_mode = #tpu.pipeline_mode<synchronous>, transform_indices = @transform_4, window_bounds = array<i64: 128, 576>}, {pipeline_mode = #tpu.pipeline_mode<synchronous>, transform_indices = @transform_5, window_bounds = array<i64: 128, 1>}, {pipeline_mode = #tpu.pipeline_mode<synchronous>, transform_indices = @transform_6, window_bounds = array<i64: 8, 1152>}, {pipeline_mode = #tpu.pipeline_mode<synchronous>, transform_indices = @transform_7, window_bounds = array<i64: 8, 1>}, {transform_indices = @transform_8, window_bounds = array<i64: 1, 8, 256>}]} {
    %c0 = arith.constant 0 : index
    %c0_0 = arith.constant 0 : index
    %0 = vector.load %arg3[%c0, %c0_0] : memref<64x32xf32, #tpu.memory_space<vmem>>, vector<64x32xf32>
    %c0_1 = arith.constant 0 : index
    %c0_2 = arith.constant 0 : index
    %c0_3 = arith.constant 0 : index
    %1 = vector.load %arg2[%c0_1, %c0_2, %c0_3] : memref<1x32x256xf32, #tpu.memory_space<vmem>>, vector<1x32x256xf32>
    %2 = vector.shape_cast %1 : vector<1x32x256xf32> to vector<32x256xf32>
    %cst = arith.constant dense<0.000000e+00> : vector<64x256xf32>
    %3 = tpu.matmul %0, %2, %cst {dimension_numbers = #tpu.dot_dimension_numbers<[1], [0], [0], [1], [0, 0, 1, 1], [], []>} : vector<64x32xf32>, vector<32x256xf32>, vector<64x256xf32> -> vector<64x256xf32>
    %c0_4 = arith.constant 0 : index
    %c0_5 = arith.constant 0 : index
    %4 = vector.load %arg4[%c0_4, %c0_5] : memref<64x1xf32, #tpu.memory_space<vmem>>, vector<64x1xf32>
    %5 = vector.broadcast %4 : vector<64x1xf32> to vector<64x256xf32>
    %6 = arith.addf %3, %5 : vector<64x256xf32>
    %cst_6 = arith.constant 0.000000e+00 : f32
    %7 = vector.broadcast %cst_6 : f32 to vector<64x256xf32>
    %8 = arith.maximumf %6, %7 : vector<64x256xf32>
    %c17_i32 = arith.constant 17 : i32
    %9 = tpu.dynamic_rotate %8 by %c17_i32 dim 1 : vector<64x256xf32>, i32 -> vector<64x256xf32>
    %c0_7 = arith.constant 0 : index
    %c0_8 = arith.constant 0 : index
    %10 = vector.load %arg1[%c0_7, %c0_8] : memref<16x256xf32, #tpu.memory_space<vmem>>, vector<1x256xf32>
    %11 = vector.broadcast %10 : vector<1x256xf32> to vector<64x256xf32>
    %12 = arith.mulf %9, %11 : vector<64x256xf32>
    %c0_9 = arith.constant 0 : index
    %c0_10 = arith.constant 0 : index
    %13 = vector.load %arg10[%c0_9, %c0_10] : memref<576x256xf32, #tpu.memory_space<vmem>>, vector<64x256xf32>
    tpu.vector_store %arg10[%c0_9, %c0_10], %12 {strides = array<i32>} : memref<576x256xf32, #tpu.memory_space<vmem>>, vector<64x256xf32>,
    %c16_i32 = arith.constant 16 : i32
    %14 = tpu.dynamic_rotate %8 by %c16_i32 dim 1 : vector<64x256xf32>, i32 -> vector<64x256xf32>
    %c1 = arith.constant 1 : index
    %c0_11 = arith.constant 0 : index
    %15 = vector.load %arg1[%c1, %c0_11] : memref<16x256xf32, #tpu.memory_space<vmem>>, vector<1x256xf32>
    %16 = vector.broadcast %15 : vector<1x256xf32> to vector<64x256xf32>
    %17 = arith.mulf %14, %16 : vector<64x256xf32>
    %c64 = arith.constant 64 : index
    %c0_12 = arith.constant 0 : index
    %18 = vector.load %arg10[%c64, %c0_12] : memref<576x256xf32, #tpu.memory_space<vmem>>, vector<64x256xf32>
    tpu.vector_store %arg10[%c64, %c0_12], %17 {strides = array<i32>} : memref<576x256xf32, #tpu.memory_space<vmem>>, vector<64x256xf32>,
    %c15_i32 = arith.constant 15 : i32
    %19 = tpu.dynamic_rotate %8 by %c15_i32 dim 1 : vector<64x256xf32>, i32 -> vector<64x256xf32>
    %c2 = arith.constant 2 : index
    %c0_13 = arith.constant 0 : index
    %20 = vector.load %arg1[%c2, %c0_13] : memref<16x256xf32, #tpu.memory_space<vmem>>, vector<1x256xf32>
    %21 = vector.broadcast %20 : vector<1x256xf32> to vector<64x256xf32>
    %22 = arith.mulf %19, %21 : vector<64x256xf32>
    %c128 = arith.constant 128 : index
    %c0_14 = arith.constant 0 : index
    %23 = vector.load %arg10[%c128, %c0_14] : memref<576x256xf32, #tpu.memory_space<vmem>>, vector<64x256xf32>
    tpu.vector_store %arg10[%c128, %c0_14], %22 {strides = array<i32>} : memref<576x256xf32, #tpu.memory_space<vmem>>, vector<64x256xf32>,
    %c1_i32 = arith.constant 1 : i32
    %24 = tpu.dynamic_rotate %8 by %c1_i32 dim 1 : vector<64x256xf32>, i32 -> vector<64x256xf32>
    %c3 = arith.constant 3 : index
    %c0_15 = arith.constant 0 : index
    %25 = vector.load %arg1[%c3, %c0_15] : memref<16x256xf32, #tpu.memory_space<vmem>>, vector<1x256xf32>
    %26 = vector.broadcast %25 : vector<1x256xf32> to vector<64x256xf32>
    %27 = arith.mulf %24, %26 : vector<64x256xf32>
    %c192 = arith.constant 192 : index
    %c0_16 = arith.constant 0 : index
    %28 = vector.load %arg10[%c192, %c0_16] : memref<576x256xf32, #tpu.memory_space<vmem>>, vector<64x256xf32>
    tpu.vector_store %arg10[%c192, %c0_16], %27 {strides = array<i32>} : memref<576x256xf32, #tpu.memory_space<vmem>>, vector<64x256xf32>,
    %c256 = arith.constant 256 : index
    %c0_17 = arith.constant 0 : index
    %29 = vector.load %arg10[%c256, %c0_17] : memref<576x256xf32, #tpu.memory_space<vmem>>, vector<64x256xf32>
    tpu.vector_store %arg10[%c256, %c0_17], %8 {strides = array<i32>} : memref<576x256xf32, #tpu.memory_space<vmem>>, vector<64x256xf32>,
    %c255_i32 = arith.constant 255 : i32
    %30 = tpu.dynamic_rotate %8 by %c255_i32 dim 1 : vector<64x256xf32>, i32 -> vector<64x256xf32>
    %c5 = arith.constant 5 : index
    %c0_18 = arith.constant 0 : index
    %31 = vector.load %arg1[%c5, %c0_18] : memref<16x256xf32, #tpu.memory_space<vmem>>, vector<1x256xf32>
    %32 = vector.broadcast %31 : vector<1x256xf32> to vector<64x256xf32>
    %33 = arith.mulf %30, %32 : vector<64x256xf32>
    %c320 = arith.constant 320 : index
    %c0_19 = arith.constant 0 : index
    %34 = vector.load %arg10[%c320, %c0_19] : memref<576x256xf32, #tpu.memory_space<vmem>>, vector<64x256xf32>
    tpu.vector_store %arg10[%c320, %c0_19], %33 {strides = array<i32>} : memref<576x256xf32, #tpu.memory_space<vmem>>, vector<64x256xf32>,
    %c241_i32 = arith.constant 241 : i32
    %35 = tpu.dynamic_rotate %8 by %c241_i32 dim 1 : vector<64x256xf32>, i32 -> vector<64x256xf32>
    %c6 = arith.constant 6 : index
    %c0_20 = arith.constant 0 : index
    %36 = vector.load %arg1[%c6, %c0_20] : memref<16x256xf32, #tpu.memory_space<vmem>>, vector<1x256xf32>
    %37 = vector.broadcast %36 : vector<1x256xf32> to vector<64x256xf32>
    %38 = arith.mulf %35, %37 : vector<64x256xf32>
    %c384 = arith.constant 384 : index
    %c0_21 = arith.constant 0 : index
    %39 = vector.load %arg10[%c384, %c0_21] : memref<576x256xf32, #tpu.memory_space<vmem>>, vector<64x256xf32>
    tpu.vector_store %arg10[%c384, %c0_21], %38 {strides = array<i32>} : memref<576x256xf32, #tpu.memory_space<vmem>>, vector<64x256xf32>,
    %c240_i32 = arith.constant 240 : i32
    %40 = tpu.dynamic_rotate %8 by %c240_i32 dim 1 : vector<64x256xf32>, i32 -> vector<64x256xf32>
    %c7 = arith.constant 7 : index
    %c0_22 = arith.constant 0 : index
    %41 = vector.load %arg1[%c7, %c0_22] : memref<16x256xf32, #tpu.memory_space<vmem>>, vector<1x256xf32>
    %42 = vector.broadcast %41 : vector<1x256xf32> to vector<64x256xf32>
    %43 = arith.mulf %40, %42 : vector<64x256xf32>
    %c448 = arith.constant 448 : index
    %c0_23 = arith.constant 0 : index
    %44 = vector.load %arg10[%c448, %c0_23] : memref<576x256xf32, #tpu.memory_space<vmem>>, vector<64x256xf32>
    tpu.vector_store %arg10[%c448, %c0_23], %43 {strides = array<i32>} : memref<576x256xf32, #tpu.memory_space<vmem>>, vector<64x256xf32>,
    %c239_i32 = arith.constant 239 : i32
    %45 = tpu.dynamic_rotate %8 by %c239_i32 dim 1 : vector<64x256xf32>, i32 -> vector<64x256xf32>
    %c8 = arith.constant 8 : index
    %c0_24 = arith.constant 0 : index
    %46 = vector.load %arg1[%c8, %c0_24] : memref<16x256xf32, #tpu.memory_space<vmem>>, vector<1x256xf32>
    %47 = vector.broadcast %46 : vector<1x256xf32> to vector<64x256xf32>
    %48 = arith.mulf %45, %47 : vector<64x256xf32>
    %c512 = arith.constant 512 : index
    %c0_25 = arith.constant 0 : index
    %49 = vector.load %arg10[%c512, %c0_25] : memref<576x256xf32, #tpu.memory_space<vmem>>, vector<64x256xf32>
    tpu.vector_store %arg10[%c512, %c0_25], %48 {strides = array<i32>} : memref<576x256xf32, #tpu.memory_space<vmem>>, vector<64x256xf32>,
    %c0_26 = arith.constant 0 : index
    %c0_27 = arith.constant 0 : index
    %50 = vector.load %arg5[%c0_26, %c0_27] : memref<128x576xf32, #tpu.memory_space<vmem>>, vector<128x576xf32>
    %c0_28 = arith.constant 0 : index
    %c0_29 = arith.constant 0 : index
    %51 = vector.load %arg10[%c0_28, %c0_29] : memref<576x256xf32, #tpu.memory_space<vmem>>, vector<576x256xf32>
    %cst_30 = arith.constant dense<0.000000e+00> : vector<128x256xf32>
    %52 = tpu.matmul %50, %51, %cst_30 {dimension_numbers = #tpu.dot_dimension_numbers<[1], [0], [0], [1], [0, 0, 1, 1], [], []>} : vector<128x576xf32>, vector<576x256xf32>, vector<128x256xf32> -> vector<128x256xf32>
    %c0_31 = arith.constant 0 : index
    %c0_32 = arith.constant 0 : index
    %53 = vector.load %arg6[%c0_31, %c0_32] : memref<128x1xf32, #tpu.memory_space<vmem>>, vector<128x1xf32>
    %54 = vector.broadcast %53 : vector<128x1xf32> to vector<128x256xf32>
    %55 = arith.addf %52, %54 : vector<128x256xf32>
    %cst_33 = arith.constant 0.000000e+00 : f32
    %56 = vector.broadcast %cst_33 : f32 to vector<128x256xf32>
    %57 = arith.maximumf %55, %56 : vector<128x256xf32>
    %c17_i32_34 = arith.constant 17 : i32
    %58 = tpu.dynamic_rotate %57 by %c17_i32_34 dim 1 : vector<128x256xf32>, i32 -> vector<128x256xf32>
    %c0_35 = arith.constant 0 : index
    %c0_36 = arith.constant 0 : index
    %59 = vector.load %arg1[%c0_35, %c0_36] : memref<16x256xf32, #tpu.memory_space<vmem>>, vector<1x256xf32>
    %60 = vector.broadcast %59 : vector<1x256xf32> to vector<128x256xf32>
    %61 = arith.mulf %58, %60 : vector<128x256xf32>
    %c0_37 = arith.constant 0 : index
    %c0_38 = arith.constant 0 : index
    %62 = vector.load %arg11[%c0_37, %c0_38] : memref<1152x256xf32, #tpu.memory_space<vmem>>, vector<128x256xf32>
    tpu.vector_store %arg11[%c0_37, %c0_38], %61 {strides = array<i32>} : memref<1152x256xf32, #tpu.memory_space<vmem>>, vector<128x256xf32>,
    %c16_i32_39 = arith.constant 16 : i32
    %63 = tpu.dynamic_rotate %57 by %c16_i32_39 dim 1 : vector<128x256xf32>, i32 -> vector<128x256xf32>
    %c1_40 = arith.constant 1 : index
    %c0_41 = arith.constant 0 : index
    %64 = vector.load %arg1[%c1_40, %c0_41] : memref<16x256xf32, #tpu.memory_space<vmem>>, vector<1x256xf32>
    %65 = vector.broadcast %64 : vector<1x256xf32> to vector<128x256xf32>
    %66 = arith.mulf %63, %65 : vector<128x256xf32>
    %c128_42 = arith.constant 128 : index
    %c0_43 = arith.constant 0 : index
    %67 = vector.load %arg11[%c128_42, %c0_43] : memref<1152x256xf32, #tpu.memory_space<vmem>>, vector<128x256xf32>
    tpu.vector_store %arg11[%c128_42, %c0_43], %66 {strides = array<i32>} : memref<1152x256xf32, #tpu.memory_space<vmem>>, vector<128x256xf32>,
    %c15_i32_44 = arith.constant 15 : i32
    %68 = tpu.dynamic_rotate %57 by %c15_i32_44 dim 1 : vector<128x256xf32>, i32 -> vector<128x256xf32>
    %c2_45 = arith.constant 2 : index
    %c0_46 = arith.constant 0 : index
    %69 = vector.load %arg1[%c2_45, %c0_46] : memref<16x256xf32, #tpu.memory_space<vmem>>, vector<1x256xf32>
    %70 = vector.broadcast %69 : vector<1x256xf32> to vector<128x256xf32>
    %71 = arith.mulf %68, %70 : vector<128x256xf32>
    %c256_47 = arith.constant 256 : index
    %c0_48 = arith.constant 0 : index
    %72 = vector.load %arg11[%c256_47, %c0_48] : memref<1152x256xf32, #tpu.memory_space<vmem>>, vector<128x256xf32>
    tpu.vector_store %arg11[%c256_47, %c0_48], %71 {strides = array<i32>} : memref<1152x256xf32, #tpu.memory_space<vmem>>, vector<128x256xf32>,
    %c1_i32_49 = arith.constant 1 : i32
    %73 = tpu.dynamic_rotate %57 by %c1_i32_49 dim 1 : vector<128x256xf32>, i32 -> vector<128x256xf32>
    %c3_50 = arith.constant 3 : index
    %c0_51 = arith.constant 0 : index
    %74 = vector.load %arg1[%c3_50, %c0_51] : memref<16x256xf32, #tpu.memory_space<vmem>>, vector<1x256xf32>
    %75 = vector.broadcast %74 : vector<1x256xf32> to vector<128x256xf32>
    %76 = arith.mulf %73, %75 : vector<128x256xf32>
    %c384_52 = arith.constant 384 : index
    %c0_53 = arith.constant 0 : index
    %77 = vector.load %arg11[%c384_52, %c0_53] : memref<1152x256xf32, #tpu.memory_space<vmem>>, vector<128x256xf32>
    tpu.vector_store %arg11[%c384_52, %c0_53], %76 {strides = array<i32>} : memref<1152x256xf32, #tpu.memory_space<vmem>>, vector<128x256xf32>,
    %c512_54 = arith.constant 512 : index
    %c0_55 = arith.constant 0 : index
    %78 = vector.load %arg11[%c512_54, %c0_55] : memref<1152x256xf32, #tpu.memory_space<vmem>>, vector<128x256xf32>
    tpu.vector_store %arg11[%c512_54, %c0_55], %57 {strides = array<i32>} : memref<1152x256xf32, #tpu.memory_space<vmem>>, vector<128x256xf32>,
    %c255_i32_56 = arith.constant 255 : i32
    %79 = tpu.dynamic_rotate %57 by %c255_i32_56 dim 1 : vector<128x256xf32>, i32 -> vector<128x256xf32>
    %c5_57 = arith.constant 5 : index
    %c0_58 = arith.constant 0 : index
    %80 = vector.load %arg1[%c5_57, %c0_58] : memref<16x256xf32, #tpu.memory_space<vmem>>, vector<1x256xf32>
    %81 = vector.broadcast %80 : vector<1x256xf32> to vector<128x256xf32>
    %82 = arith.mulf %79, %81 : vector<128x256xf32>
    %c640 = arith.constant 640 : index
    %c0_59 = arith.constant 0 : index
    %83 = vector.load %arg11[%c640, %c0_59] : memref<1152x256xf32, #tpu.memory_space<vmem>>, vector<128x256xf32>
    tpu.vector_store %arg11[%c640, %c0_59], %82 {strides = array<i32>} : memref<1152x256xf32, #tpu.memory_space<vmem>>, vector<128x256xf32>,
    %c241_i32_60 = arith.constant 241 : i32
    %84 = tpu.dynamic_rotate %57 by %c241_i32_60 dim 1 : vector<128x256xf32>, i32 -> vector<128x256xf32>
    %c6_61 = arith.constant 6 : index
    %c0_62 = arith.constant 0 : index
    %85 = vector.load %arg1[%c6_61, %c0_62] : memref<16x256xf32, #tpu.memory_space<vmem>>, vector<1x256xf32>
    %86 = vector.broadcast %85 : vector<1x256xf32> to vector<128x256xf32>
    %87 = arith.mulf %84, %86 : vector<128x256xf32>
    %c768 = arith.constant 768 : index
    %c0_63 = arith.constant 0 : index
    %88 = vector.load %arg11[%c768, %c0_63] : memref<1152x256xf32, #tpu.memory_space<vmem>>, vector<128x256xf32>
    tpu.vector_store %arg11[%c768, %c0_63], %87 {strides = array<i32>} : memref<1152x256xf32, #tpu.memory_space<vmem>>, vector<128x256xf32>,
    %c240_i32_64 = arith.constant 240 : i32
    %89 = tpu.dynamic_rotate %57 by %c240_i32_64 dim 1 : vector<128x256xf32>, i32 -> vector<128x256xf32>
    %c7_65 = arith.constant 7 : index
    %c0_66 = arith.constant 0 : index
    %90 = vector.load %arg1[%c7_65, %c0_66] : memref<16x256xf32, #tpu.memory_space<vmem>>, vector<1x256xf32>
    %91 = vector.broadcast %90 : vector<1x256xf32> to vector<128x256xf32>
    %92 = arith.mulf %89, %91 : vector<128x256xf32>
    %c896 = arith.constant 896 : index
    %c0_67 = arith.constant 0 : index
    %93 = vector.load %arg11[%c896, %c0_67] : memref<1152x256xf32, #tpu.memory_space<vmem>>, vector<128x256xf32>
    tpu.vector_store %arg11[%c896, %c0_67], %92 {strides = array<i32>} : memref<1152x256xf32, #tpu.memory_space<vmem>>, vector<128x256xf32>,
    %c239_i32_68 = arith.constant 239 : i32
    %94 = tpu.dynamic_rotate %57 by %c239_i32_68 dim 1 : vector<128x256xf32>, i32 -> vector<128x256xf32>
    %c8_69 = arith.constant 8 : index
    %c0_70 = arith.constant 0 : index
    %95 = vector.load %arg1[%c8_69, %c0_70] : memref<16x256xf32, #tpu.memory_space<vmem>>, vector<1x256xf32>
    %96 = vector.broadcast %95 : vector<1x256xf32> to vector<128x256xf32>
    %97 = arith.mulf %94, %96 : vector<128x256xf32>
    %c1024 = arith.constant 1024 : index
    %c0_71 = arith.constant 0 : index
    %98 = vector.load %arg11[%c1024, %c0_71] : memref<1152x256xf32, #tpu.memory_space<vmem>>, vector<128x256xf32>
    tpu.vector_store %arg11[%c1024, %c0_71], %97 {strides = array<i32>} : memref<1152x256xf32, #tpu.memory_space<vmem>>, vector<128x256xf32>,
    %c0_72 = arith.constant 0 : index
    %c0_73 = arith.constant 0 : index
    %99 = vector.load %arg7[%c0_72, %c0_73] : memref<8x1152xf32, #tpu.memory_space<vmem>>, vector<8x1152xf32>
    %c0_74 = arith.constant 0 : index
    %c0_75 = arith.constant 0 : index
    %100 = vector.load %arg11[%c0_74, %c0_75] : memref<1152x256xf32, #tpu.memory_space<vmem>>, vector<1152x256xf32>
    %cst_76 = arith.constant dense<0.000000e+00> : vector<8x256xf32>
    %101 = tpu.matmul %99, %100, %cst_76 {dimension_numbers = #tpu.dot_dimension_numbers<[1], [0], [0], [1], [0, 0, 1, 1], [], []>} : vector<8x1152xf32>, vector<1152x256xf32>, vector<8x256xf32> -> vector<8x256xf32>
    %c0_77 = arith.constant 0 : index
    %c0_78 = arith.constant 0 : index
    %102 = vector.load %arg8[%c0_77, %c0_78] : memref<8x1xf32, #tpu.memory_space<vmem>>, vector<8x1xf32>
    %103 = vector.broadcast %102 : vector<8x1xf32> to vector<8x256xf32>
    %104 = arith.addf %101, %103 : vector<8x256xf32>
    %105 = arith.negf %104 : vector<8x256xf32>
    %106 = math.exp %105 : vector<8x256xf32>
    %cst_79 = arith.constant 1.000000e+00 : f32
    %107 = vector.broadcast %cst_79 : f32 to vector<8x256xf32>
    %108 = arith.addf %107, %106 : vector<8x256xf32>
    %109 = arith.divf %107, %108 : vector<8x256xf32>
    %c0_80 = arith.constant 0 : index
    %c0_81 = arith.constant 0 : index
    %c0_82 = arith.constant 0 : index
    %110 = vector.load %arg9[%c0_80, %c0_81, %c0_82] : memref<1x8x256xf32, #tpu.memory_space<vmem>>, vector<1x8x256xf32>
    %111 = vector.shape_cast %110 : vector<1x8x256xf32> to vector<8x256xf32>
    %112 = vector.shape_cast %109 : vector<8x256xf32> to vector<1x8x256xf32>
    tpu.vector_store %arg9[%c0_80, %c0_81, %c0_82], %112 {strides = array<i32>} : memref<1x8x256xf32, #tpu.memory_space<vmem>>, vector<1x8x256xf32>,
    return
  }
  func.func @transform_0(%arg0: i32) -> (i32, i32) {
    %c0_i32 = arith.constant 0 : i32
    %c0_i32_0 = arith.constant 0 : i32
    %c0_i32_1 = arith.constant 0 : i32
    return %c0_i32, %c0_i32_0 : i32, i32
  }
  func.func @transform_1(%arg0: i32) -> (i32, i32, i32) {
    %c0_i32 = arith.constant 0 : i32
    %c0_i32_0 = arith.constant 0 : i32
    %c0_i32_1 = arith.constant 0 : i32
    return %arg0, %c0_i32, %c0_i32_0 : i32, i32, i32
  }
  func.func @transform_2(%arg0: i32) -> (i32, i32) {
    %c0_i32 = arith.constant 0 : i32
    %c0_i32_0 = arith.constant 0 : i32
    %c0_i32_1 = arith.constant 0 : i32
    return %c0_i32, %c0_i32_0 : i32, i32
  }
  func.func @transform_3(%arg0: i32) -> (i32, i32) {
    %c0_i32 = arith.constant 0 : i32
    %c0_i32_0 = arith.constant 0 : i32
    %c0_i32_1 = arith.constant 0 : i32
    return %c0_i32, %c0_i32_0 : i32, i32
  }
  func.func @transform_4(%arg0: i32) -> (i32, i32) {
    %c0_i32 = arith.constant 0 : i32
    %c0_i32_0 = arith.constant 0 : i32
    %c0_i32_1 = arith.constant 0 : i32
    return %c0_i32, %c0_i32_0 : i32, i32
  }
  func.func @transform_5(%arg0: i32) -> (i32, i32) {
    %c0_i32 = arith.constant 0 : i32
    %c0_i32_0 = arith.constant 0 : i32
    %c0_i32_1 = arith.constant 0 : i32
    return %c0_i32, %c0_i32_0 : i32, i32
  }
  func.func @transform_6(%arg0: i32) -> (i32, i32) {
    %c0_i32 = arith.constant 0 : i32
    %c0_i32_0 = arith.constant 0 : i32
    %c0_i32_1 = arith.constant 0 : i32
    return %c0_i32, %c0_i32_0 : i32, i32
  }
  func.func @transform_7(%arg0: i32) -> (i32, i32) {
    %c0_i32 = arith.constant 0 : i32
    %c0_i32_0 = arith.constant 0 : i32
    %c0_i32_1 = arith.constant 0 : i32
    return %c0_i32, %c0_i32_0 : i32, i32
  }
  func.func @transform_8(%arg0: i32) -> (i32, i32, i32) {
    %c0_i32 = arith.constant 0 : i32
    %c0_i32_0 = arith.constant 0 : i32
    %c0_i32_1 = arith.constant 0 : i32
    return %arg0, %c0_i32, %c0_i32_0 : i32, i32, i32
  }
}

</mosaic_0001>

<bundles_post_ra>
// kernel: tamper_trace_forward.1
= control target key start
LH: loop header
LB: loop body
LE: loop exit
PB: predicated region body
PF: predicated region fallthrough
CT: control target
= control target key end

     0   :  { %s4552_s27 = smov 0   ;;  %s9187_s0 = inlined_call_operand.vmem [shape: f32[16,256], index: 0, kind: input, shape index: {}]   ;;  %s9188_s1 = inlined_call_operand.vmem [shape: f32[2,32,256], index: 1, kind: input, shape index: {}]   ;;  %s9189_s2 = inlined_call_operand.vmem [shape: f32[64,32], index: 2, kind: input, shape index: {}]   ;;  %s9190_s3 = inlined_call_operand.vmem [shape: f32[64,1], index: 3, kind: input, shape index: {}]   ;;  %s9191_s4 = inlined_call_operand.vmem [shape: f32[128,576], index: 4, kind: input, shape index: {}]   ;;  %s9192_s5 = inlined_call_operand.vmem [shape: f32[128,1], index: 5, kind: input, shape index: {}]   ;;  %s9193_s6 = inlined_call_operand.vmem [shape: f32[8,1152], index: 6, kind: input, shape index: {}]   ;;  %s9194_s7 = inlined_call_operand.vmem [shape: f32[8,1], index: 7, kind: input, shape index: {}]   ;;  %s9195_s8 = inlined_call_operand.vmem [shape: f32[2,8,256], index: 8, kind: output, shape index: {}]  }
   0x1 LB: > { %s4383_s28 = sadd.s32 4294967295, %s4496_s27   ;;  %p4387_p0 = scmp.ge.s32.totalorder %s4496_s27, 1  ;;  %s4496_s27 = sphi %s4552_s27, %s18_s27  }
   0x2   : > { %p262_p1 = scmp.lt.s32.totalorder %s4496_s27, 3 }
   0x4   : > { %p263_p2 = pnand %p4387_p0, %p262_p1 }
   0x6   : > { %266 = sbr.rel (%p263_p2) target bundleno = 1783 (0x6f7), region = 52 }
   0xb   : > { %p296_p3 = scmp.lt.s32.totalorder %s4383_s28, 1  ;;  %v322_v0 = vld [vmem:[%s9190_s3] sm:$0xff]  ;;  %v4498_v1 = vmov 0   ;;  %v323_v6 = vld [vmem:[%s9190_s3 + $0x8] sm:$0xff]  ;;  %vm370_vm0 = vcmask 261120   ;;  %v328_v12 = vld [vmem:[%s9190_s3 + $0x30] sm:$0xff] }
   0xc   : > { %4477 = vset.pattern.permute.xlu0 %v4498_v1  ;;  %4478 = vset.pattern.permute.xlu1 %v4498_v1  ;;  %v306_v11 = vld [vmem:[%s9189_s2] sm:$0xff]  ;;  %v307_v13 = vld [vmem:[%s9189_s2 + $0x8] sm:$0xff]  ;;  %v324_v14 = vld [vmem:[%s9190_s3 + $0x10] sm:$0xff]  ;;  %s4499_s23 = smov 17   ;;  %s4500_s24 = smov 16   ;;  %vm1534_vm9 = vcmask 523264  }
   0xd   : > { %s10329_s28 = smov (!%p296_p3, %s4383_s28), 1  ;;  %332 = vperm.xlu0 %4477, %v322_v0   ;;  %4479 = vset.pattern.permute.xlu2 %v4498_v1  ;;  %v308_v15 = vld [vmem:[%s9189_s2 + $0x10] sm:$0xff]  ;;  %v325_v16 = vld [vmem:[%s9190_s3 + $0x18] sm:$0xff]  ;;  %v310_v19 = vld [vmem:[%s9189_s2 + $0x20] sm:$0xff]  ;;  %s4501_s25 = smov 15  }
   0xe   : > { %s4458_s9 = sshll.u32 %s10329_s28, 6  ;;  %342 = vperm.xlu1 %4478, %v324_v14   ;;  %v309_v17 = vld [vmem:[%s9189_s2 + $0x18] sm:$0xff]  ;;  %v311_v20 = vld [vmem:[%s9189_s2 + $0x28] sm:$0xff]  ;;  %v312_v21 = vld [vmem:[%s9189_s2 + $0x30] sm:$0xff]  ;;  %s4502_s26 = smov 1  }
   0xf   : > { %s300_s12 = scalar_lea.vmem %s9188_s1, %s4458_s9  ;;  %v329_v18 = vld [vmem:[%s9190_s3 + $0x38] sm:$0xff]  ;;  %v326_v23 = vld [vmem:[%s9190_s3 + $0x20] sm:$0xff]  ;;  %v327_v24 = vld [vmem:[%s9190_s3 + $0x28] sm:$0xff]  ;;  %s4503_s29 = smov 127  }
  0x10   : > { %v320_v2 = vld [vmem:[%s300_s12 + $0x30] sm:$0xff]  ;;  %v321_v3 = vld [vmem:[%s300_s12 + $0x38] sm:$0xff]  ;;  %v318_v4 = vld [vmem:[%s300_s12 + $0x20] sm:$0xff]  ;;  %352 = vperm.xlu2 %4479, %v326_v23   ;;  %s4504_s30 = smov 113   ;;  %s4505_s9 = smov 112  }
  0x11   : > { %407 = vmatpush.msra.mxu0 %v320_v2  ;;  %448 = vmatpush.msra.mxu1 %v321_v3  ;;  %v319_v5 = vld [vmem:[%s300_s12 + $0x28] sm:$0xff]  ;;  %v316_v7 = vld [vmem:[%s300_s12 + $0x10] sm:$0xff]  ;;  %v317_v8 = vld [vmem:[%s300_s12 + $0x18] sm:$0xff]  ;;  %s4506_s14 = smov 111   ;;  %s4459_s18 = sshll.u32 %s10329_s28, 4 }
  0x12   : > { %v314_v9 = vld [vmem:[%s300_s12] sm:$0xff]  ;;  %v315_v10 = vld [vmem:[%s300_s12 + $0x8] sm:$0xff]  ;;  %v313_v22 = vld [vmem:[%s9189_s2 + $0x38] sm:$0xff]  ;;  %s9180_s21 = scalar_lea.vmem %s9195_s8, %s4459_s18 }
  0x13   : > { %408 = vmatpush.msra.mxu0 %v318_v4  ;;  %449 = vmatpush.msra.mxu1 %v319_v5 }
  0x15   : > { %337 = vperm.xlu0 %4477, %v323_v6   ;;  %409 = vmatpush.msra.mxu0 %v316_v7 }
  0x16   : > { %450 = vmatpush.msra.mxu1 %v317_v8  ;;  %347 = vperm.xlu1 %4478, %v325_v16  }
  0x17   : > { %410 = vmatpush.msra.mxu0 %v314_v9 }
  0x18   : > { %451 = vmatpush.msra.mxu1 %v315_v10  ;;  %4392 = vmatmul.msk.f32.vlgmr.msra.gmra.mxu0 %vm370_vm0, %v306_v11 }
  0x19   : > { %4400 = vmatmul.msk.f32.vlgmr.msra.gmra.mxu1 %vm370_vm0, %v306_v11  ;;  %357 = vperm.xlu2 %4479, %v327_v24  }
  0x1d   : > { %362 = vperm.xlu0 %4477, %v328_v12  }
  0x1e   : > { %367 = vperm.xlu1 %4478, %v329_v18  }
  0x20   : > { %4393 = vmatmul.msk.f32.gmra.mxu0 %vm370_vm0, %v307_v13 }
  0x21   : > { %4401 = vmatmul.msk.f32.gmra.mxu1 %vm370_vm0, %v307_v13 }
  0x28   : > { %4394 = vmatmul.msk.f32.gmra.mxu0 %vm370_vm0, %v308_v15 }
  0x29   : > { %4402 = vmatmul.msk.f32.gmra.mxu1 %vm370_vm0, %v308_v15 }
  0x30   : > { %4395 = vmatmul.msk.f32.gmra.mxu0 %vm370_vm0, %v309_v17 }
  0x31   : > { %4403 = vmatmul.msk.f32.gmra.mxu1 %vm370_vm0, %v309_v17 }
  0x38   : > { %4396 = vmatmul.msk.f32.gmra.mxu0 %vm370_vm0, %v310_v19 }
  0x39   : > { %4404 = vmatmul.msk.f32.gmra.mxu1 %vm370_vm0, %v310_v19 }
  0x40   : > { %4397 = vmatmul.msk.f32.gmra.mxu0 %vm370_vm0, %v311_v20 }
  0x41   : > { %4405 = vmatmul.msk.f32.gmra.mxu1 %vm370_vm0, %v311_v20 }
  0x48   : > { %4398 = vmatmul.msk.f32.gmra.mxu0 %vm370_vm0, %v312_v21 }
  0x49   : > { %4406 = vmatmul.msk.f32.gmra.mxu1 %vm370_vm0, %v312_v21 }
  0x50   : > { %4399 = vmatmul.msk.f32.gmra.mxu0 %vm370_vm0, %v313_v22 }
  0x51   : > { %4407 = vmatmul.msk.f32.gmra.mxu1 %vm370_vm0, %v313_v22 }
  0x6a   : > { %v353_v53 = vpop.permute.xlu2 %352 }
  0x73   : > { %v358_v54 = vpop.permute.xlu2 %357 }
  0x7f   : > { %v333_v25 = vpop.permute.xlu0 %332 }
  0x80   : > { %v343_v39 = vpop.permute.xlu1 %342 }
  0x87   : > { %v338_v34 = vpop.permute.xlu0 %337 }
  0x88   : > { %v348_v46 = vpop.permute.xlu1 %347 }
  0x8f   : > { %v363_v63 = vpop.permute.xlu0 %362 }
  0x90   : > { %v368_v0 = vpop.permute.xlu1 %367 }
  0x95   : > { %v412_v26 = vpop.f32.mrf.mxu0 }
  0x96   : > { %v453_v27 = vpop.f32.mrf.mxu1  ;;  %v413_v28 = vadd.f32 %v412_v26, %v333_v25 }
  0x97   : > { %v454_v29 = vadd.f32 %v453_v27, %v333_v25 }
  0x98   : > { %v4630_v30 = vmax.f32 %v413_v28, 0.0 }
  0x99   : > { %v4632_v31 = vmax.f32 %v454_v29, 0.0 }
  0x9a   : > { %9527 = vst [vmem:[#allocation4_spill] sm:$0xff] %v4630_v30  ;;  %582 = vrot.lane.b32.xlu0 %v4630_v30, %s4500_s24  ;;  %493 = vrot.lane.b32.xlu2 %v4630_v30, %s4499_s23 }
  0x9b   : > { %9528 = vst [vmem:[#allocation5_spill] sm:$0xff] %v4632_v31  ;;  %509 = vrot.lane.b32.xlu1 %v4632_v31, %s4499_s23 }
  0x9d   : > { %v415_v32 = vpop.f32.mrf.mxu0 }
  0x9e   : > { %v456_v33 = vpop.f32.mrf.mxu1  ;;  %v416_v35 = vadd.f32 %v415_v32, %v338_v34 }
  0x9f   : > { %v457_v36 = vadd.f32 %v456_v33, %v338_v34 }
  0xa0   : > { %v4652_v37 = vmax.f32 %v416_v35, 0.0 }
  0xa1   : > { %v4654_v38 = vmax.f32 %v457_v36, 0.0 }
  0xa2   : > { %686 = vrot.lane.b32.xlu0 %v4632_v31, %s4501_s25  ;;  %598 = vrot.lane.b32.xlu2 %v4632_v31, %s4500_s24  ;;  %9529 = vst [vmem:[#allocation6_spill] sm:$0xff] %v4652_v37 }
  0xa3   : > { %670 = vrot.lane.b32.xlu1 %v4630_v30, %s4501_s25  ;;  %9530 = vst [vmem:[#allocation7_spill] sm:$0xff] %v4654_v38 }
  0xa5   : > { %v418_v40 = vpop.f32.mrf.mxu0 }
  0xa6   : > { %v459_v41 = vpop.f32.mrf.mxu1  ;;  %v419_v42 = vadd.f32 %v418_v40, %v343_v39 }
  0xa7   : > { %v460_v43 = vadd.f32 %v459_v41, %v343_v39 }
  0xa8   : > { %v4674_v44 = vmax.f32 %v419_v42, 0.0 }
  0xa9   : > { %v4676_v45 = vmax.f32 %v460_v43, 0.0 }
  0xaa   : > { %862 = vrot.lane.b32.xlu0 %v4630_v30, %s4503_s29  ;;  %758 = vrot.lane.b32.xlu2 %v4630_v30, %s4502_s26 }
  0xab   : > { %774 = vrot.lane.b32.xlu1 %v4632_v31, %s4502_s26  ;;  %9531 = vst [vmem:[#allocation8_spill] sm:$0xff] %v4676_v45 }
  0xad   : > { %v421_v47 = vpop.f32.mrf.mxu0 }
  0xae   : > { %v462_v48 = vpop.f32.mrf.mxu1  ;;  %v422_v49 = vadd.f32 %v421_v47, %v348_v46 }
  0xaf   : > { %v463_v50 = vadd.f32 %v462_v48, %v348_v46 }
  0xb0   : > { %v4696_v51 = vmax.f32 %v422_v49, 0.0 }
  0xb1   : > { %v4698_v52 = vmax.f32 %v463_v50, 0.0 }
  0xb2   : > { %495 = vrot.lane.b32.xlu0 %v4652_v37, %s4499_s23  ;;  %511 = vrot.lane.b32.xlu2 %v4654_v38, %s4499_s23 }
  0xb3   : > { %584 = vrot.lane.b32.xlu1 %v4652_v37, %s4500_s24  ;;  %9532 = vst [vmem:[#allocation9_spill] sm:$0xff] %v4698_v52 }
  0xb5   : > { %v424_v55 = vpop.f32.mrf.mxu0 }
  0xb6   : > { %v465_v56 = vpop.f32.mrf.mxu1  ;;  %v425_v57 = vadd.f32 %v424_v55, %v353_v53 }
  0xb7   : > { %v466_v58 = vadd.f32 %v465_v56, %v353_v53 }
  0xb8   : > { %v4720_v60 = vmax.f32 %v425_v57, 0.0 }
  0xb9   : > { %v4722_v61 = vmax.f32 %v466_v58, 0.0 }
  0xba   : > { %600 = vrot.lane.b32.xlu0 %v4654_v38, %s4500_s24  ;;  %672 = vrot.lane.b32.xlu2 %v4652_v37, %s4501_s25 }
  0xbb   : > { %688 = vrot.lane.b32.xlu1 %v4654_v38, %s4501_s25  ;;  %9534 = vst [vmem:[#allocation11_spill] sm:$0xff] %v4722_v61 }
  0xbd   : > { %v427_v2 = vpop.f32.mrf.mxu0 }
  0xbe   : > { %v468_v3 = vpop.f32.mrf.mxu1  ;;  %v428_v4 = vadd.f32 %v427_v2, %v358_v54 }
  0xbf   : > { %v469_v5 = vadd.f32 %v468_v3, %v358_v54 }
  0xc0   : > { %v4752_v9 = vmax.f32 %v428_v4, 0.0 }
  0xc1   : > { %v4754_v10 = vmax.f32 %v469_v5, 0.0 }
  0xc2   : > { %760 = vrot.lane.b32.xlu0 %v4652_v37, %s4502_s26  ;;  %776 = vrot.lane.b32.xlu2 %v4654_v38, %s4502_s26  ;;  %9538 = vst [vmem:[#allocation15_spill] sm:$0xff] %v4752_v9 }
  0xc3   : > { %864 = vrot.lane.b32.xlu1 %v4652_v37, %s4503_s29  ;;  %9539 = vst [vmem:[#allocation16_spill] sm:$0xff] %v4754_v10 }
  0xc5   : > { %v430_v17 = vpop.f32.mrf.mxu0 }
  0xc6   : > { %v471_v18 = vpop.f32.mrf.mxu1  ;;  %v431_v19 = vadd.f32 %v430_v17, %v363_v63 }
  0xc7   : > { %v472_v20 = vadd.f32 %v471_v18, %v363_v63 }
  0xc8   : > { %v4792_v24 = vmax.f32 %v431_v19, 0.0 }
  0xc9   : > { %v4794_v25 = vmax.f32 %v472_v20, 0.0 }
  0xca   : > { %513 = vrot.lane.b32.xlu0 %v4676_v45, %s4499_s23  ;;  %586 = vrot.lane.b32.xlu2 %v4674_v44, %s4500_s24  ;;  %9546 = vst [vmem:[#allocation23_spill] sm:$0xff] %v4792_v24 }
  0xcb   : > { %497 = vrot.lane.b32.xlu1 %v4674_v44, %s4499_s23  ;;  %9547 = vst [vmem:[#allocation24_spill] sm:$0xff] %v4794_v25 }
  0xcd   : > { %v433_v29 = vpop.f32.mrf.mxu0 }
  0xce   : > { %v434_v32 = vadd.f32 %v433_v29, %v368_v0  ;;  %v474_v39 = vpop.f32.mrf.mxu1 }
  0xcf   : > { %v475_v40 = vadd.f32 %v474_v39, %v368_v0 }
  0xd0   : > { %v4820_v36 = vmax.f32 %v434_v32, 0.0 }
  0xd1   : > { %v4834_v46 = vmax.f32 %v475_v40, 0.0 }
  0xd2   : > { %674 = vrot.lane.b32.xlu0 %v4674_v44, %s4501_s25  ;;  %690 = vrot.lane.b32.xlu2 %v4676_v45, %s4501_s25  ;;  %9553 = vst [vmem:[#allocation30_spill] sm:$0xff] %v4820_v36 }
  0xd3   : > { %602 = vrot.lane.b32.xlu1 %v4676_v45, %s4500_s24 }
  0xda   : > { %778 = vrot.lane.b32.xlu0 %v4676_v45, %s4502_s26  ;;  %866 = vrot.lane.b32.xlu2 %v4674_v44, %s4503_s29 }
  0xdb   : > { %762 = vrot.lane.b32.xlu1 %v4674_v44, %s4502_s26 }
  0xe2   : > { %588 = vrot.lane.b32.xlu0 %v4696_v51, %s4500_s24  ;;  %499 = vrot.lane.b32.xlu2 %v4696_v51, %s4499_s23 }
  0xe3   : > { %515 = vrot.lane.b32.xlu1 %v4698_v52, %s4499_s23 }
  0xea   : > { %692 = vrot.lane.b32.xlu0 %v4698_v52, %s4501_s25  ;;  %604 = vrot.lane.b32.xlu2 %v4698_v52, %s4500_s24 }
  0xeb   : > { %676 = vrot.lane.b32.xlu1 %v4696_v51, %s4501_s25 }
  0xf2   : > { %868 = vrot.lane.b32.xlu0 %v4696_v51, %s4503_s29  ;;  %764 = vrot.lane.b32.xlu2 %v4696_v51, %s4502_s26 }
  0xf3   : > { %780 = vrot.lane.b32.xlu1 %v4698_v52, %s4502_s26 }
  0xf4   : > { %v4718_v59 = vpop.permute.xlu2 %493 }
  0xf5   : > { %9533 = vst [vmem:[#allocation10_spill] sm:$0xff] %v4718_v59 }
  0xfa   : > { %501 = vrot.lane.b32.xlu0 %v4720_v60, %s4499_s23  ;;  %517 = vrot.lane.b32.xlu2 %v4722_v61, %s4499_s23 }
  0xfb   : > { %590 = vrot.lane.b32.xlu1 %v4720_v60, %s4500_s24 }
  0xfc   : > { %v4730_v62 = vpop.permute.xlu2 %598 }
 0x102   : > { %606 = vrot.lane.b32.xlu0 %v4722_v61, %s4500_s24  ;;  %678 = vrot.lane.b32.xlu2 %v4720_v60, %s4501_s25 }
 0x103   : > { %694 = vrot.lane.b32.xlu1 %v4722_v61, %s4501_s25 }
 0x104   : > { %v4738_v1 = vpop.permute.xlu2 %758 }
 0x105   : > { %9535 = vst [vmem:[#allocation12_spill] sm:$0xff] %v4738_v1 }
 0x10a   : > { %766 = vrot.lane.b32.xlu0 %v4720_v60, %s4502_s26  ;;  %782 = vrot.lane.b32.xlu2 %v4722_v61, %s4502_s26 }
 0x10b   : > { %870 = vrot.lane.b32.xlu1 %v4720_v60, %s4503_s29 }
 0x10c   : > { %v4748_v7 = vpop.permute.xlu0 %582  ;;  %v4750_v8 = vpop.permute.xlu2 %511 }
 0x10d   : > { %v4746_v6 = vpop.permute.xlu1 %509  ;;  %9537 = vst [vmem:[#allocation14_spill] sm:$0xff] %v4750_v8 }
 0x10e   : > { %9536 = vst [vmem:[#allocation13_spill] sm:$0xff] %v4746_v6 }
 0x112   : > { %519 = vrot.lane.b32.xlu0 %v4754_v10, %s4499_s23  ;;  %592 = vrot.lane.b32.xlu2 %v4752_v9, %s4500_s24 }
 0x113   : > { %503 = vrot.lane.b32.xlu1 %v4752_v9, %s4499_s23 }
 0x114   : > { %v4764_v12 = vpop.permute.xlu0 %686  ;;  %v4766_v13 = vpop.permute.xlu2 %672 }
 0x115   : > { %v4762_v11 = vpop.permute.xlu1 %670  ;;  %9541 = vst [vmem:[#allocation18_spill] sm:$0xff] %v4764_v12 }
 0x116   : > { %9540 = vst [vmem:[#allocation17_spill] sm:$0xff] %v4762_v11 }
 0x117   : > { %9542 = vst [vmem:[#allocation19_spill] sm:$0xff] %v4766_v13 }
 0x11a   : > { %680 = vrot.lane.b32.xlu0 %v4752_v9, %s4501_s25  ;;  %696 = vrot.lane.b32.xlu2 %v4754_v10, %s4501_s25 }
 0x11b   : > { %608 = vrot.lane.b32.xlu1 %v4754_v10, %s4500_s24 }
 0x11c   : > { %v4776_v15 = vpop.permute.xlu0 %862  ;;  %v4778_v16 = vpop.permute.xlu2 %776 }
 0x11d   : > { %v4774_v14 = vpop.permute.xlu1 %774  ;;  %9544 = vst [vmem:[#allocation21_spill] sm:$0xff] %v4776_v15 }
 0x11e   : > { %9543 = vst [vmem:[#allocation20_spill] sm:$0xff] %v4774_v14 }
 0x11f   : > { %9545 = vst [vmem:[#allocation22_spill] sm:$0xff] %v4778_v16 }
 0x122   : > { %784 = vrot.lane.b32.xlu0 %v4754_v10, %s4502_s26  ;;  %872 = vrot.lane.b32.xlu2 %v4752_v9, %s4503_s29 }
 0x123   : > { %768 = vrot.lane.b32.xlu1 %v4752_v9, %s4502_s26 }
 0x124   : > { %v4788_v22 = vpop.permute.xlu0 %495  ;;  %v4790_v23 = vpop.permute.xlu2 %586 }
 0x125   : > { %v4786_v21 = vpop.permute.xlu1 %584 }
 0x12a   : > { %594 = vrot.lane.b32.xlu0 %v4792_v24, %s4500_s24  ;;  %505 = vrot.lane.b32.xlu2 %v4792_v24, %s4499_s23 }
 0x12b   : > { %521 = vrot.lane.b32.xlu1 %v4794_v25, %s4499_s23 }
 0x12c   : > { %v4804_v27 = vpop.permute.xlu0 %600  ;;  %v4806_v28 = vpop.permute.xlu2 %690 }
 0x12d   : > { %v4802_v26 = vpop.permute.xlu1 %688  ;;  %9549 = vst [vmem:[#allocation26_spill] sm:$0xff] %v4806_v28 }
 0x12e   : > { %9548 = vst [vmem:[#allocation25_spill] sm:$0xff] %v4802_v26 }
 0x132   : > { %698 = vrot.lane.b32.xlu0 %v4794_v25, %s4501_s25  ;;  %610 = vrot.lane.b32.xlu2 %v4794_v25, %s4500_s24 }
 0x133   : > { %682 = vrot.lane.b32.xlu1 %v4792_v24, %s4501_s25 }
 0x134   : > { %v4816_v34 = vpop.permute.xlu0 %760  ;;  %v4818_v35 = vpop.permute.xlu2 %866 }
 0x135   : > { %v4814_v33 = vpop.permute.xlu1 %864  ;;  %9551 = vst [vmem:[#allocation28_spill] sm:$0xff] %v4816_v34 }
 0x136   : > { %9550 = vst [vmem:[#allocation27_spill] sm:$0xff] %v4814_v33 }
 0x137   : > { %9552 = vst [vmem:[#allocation29_spill] sm:$0xff] %v4818_v35 }
 0x13a   : > { %507 = vrot.lane.b32.xlu0 %v4820_v36, %s4499_s23  ;;  %770 = vrot.lane.b32.xlu2 %v4792_v24, %s4502_s26 }
 0x13b   : > { %786 = vrot.lane.b32.xlu1 %v4794_v25, %s4502_s26 }
 0x13c   : > { %v4830_v42 = vpop.permute.xlu0 %513  ;;  %v4832_v43 = vpop.permute.xlu2 %499 }
 0x13d   : > { %v4828_v41 = vpop.permute.xlu1 %497 }
 0x142   : > { %612 = vrot.lane.b32.xlu0 %v4834_v46, %s4500_s24  ;;  %523 = vrot.lane.b32.xlu2 %v4834_v46, %s4499_s23 }
 0x143   : > { %596 = vrot.lane.b32.xlu1 %v4820_v36, %s4500_s24 }
 0x144   : > { %v4844_v48 = vpop.permute.xlu0 %674  ;;  %v4846_v49 = vpop.permute.xlu2 %604 }
 0x145   : > { %v4842_v47 = vpop.permute.xlu1 %602  ;;  %9554 = vst [vmem:[#allocation31_spill] sm:$0xff] %v4844_v48 }
 0x14a   : > { %772 = vrot.lane.b32.xlu0 %v4820_v36, %s4502_s26  ;;  %684 = vrot.lane.b32.xlu2 %v4820_v36, %s4501_s25 }
 0x14b   : > { %700 = vrot.lane.b32.xlu1 %v4834_v46, %s4501_s25 }
 0x14c   : > { %v4856_v53 = vpop.permute.xlu0 %778  ;;  %v4858_v54 = vpop.permute.xlu2 %764 }
 0x14d   : > { %v4854_v50 = vpop.permute.xlu1 %762  ;;  %9556 = vst [vmem:[#allocation33_spill] sm:$0xff] %v4856_v53 }
 0x14e   : > { %9555 = vst [vmem:[#allocation32_spill] sm:$0xff] %v4854_v50 }
 0x14f   : > { %9557 = vst [vmem:[#allocation34_spill] sm:$0xff] %v4858_v54 }
 0x152   : > { %874 = vrot.lane.b32.xlu0 %v4792_v24, %s4503_s29  ;;  %788 = vrot.lane.b32.xlu2 %v4834_v46, %s4502_s26 }
 0x153   : > { %876 = vrot.lane.b32.xlu1 %v4820_v36, %s4503_s29 }
 0x154   : > { %v4868_v56 = vpop.permute.xlu0 %588  ;;  %v4870_v57 = vpop.permute.xlu2 %517 }
 0x155   : > { %v4866_v55 = vpop.permute.xlu1 %515  ;;  %9558 = vst [vmem:[#allocation35_spill] sm:$0xff] %v4868_v56 }
 0x15a   : > { %880 = vrot.lane.b32.xlu0 %v4654_v38, %s4503_s29  ;;  %878 = vrot.lane.b32.xlu2 %v4632_v31, %s4503_s29 }
 0x15b   : > { %882 = vrot.lane.b32.xlu1 %v4676_v45, %s4503_s29 }
 0x15c   : > { %v4880_v63 = vpop.permute.xlu0 %692  ;;  %v4882_v0 = vpop.permute.xlu2 %678 }
 0x15d   : > { %v4878_v58 = vpop.permute.xlu1 %676  ;;  %9560 = vst [vmem:[#allocation37_spill] sm:$0xff] %v4880_v63 }
 0x15e   : > { %9559 = vst [vmem:[#allocation36_spill] sm:$0xff] %v4878_v58 }
 0x15f   : > { %9561 = vst [vmem:[#allocation38_spill] sm:$0xff] %v4882_v0  ;;  %v525_v0 = vlaneseq }
 0x162   : > { %886 = vrot.lane.b32.xlu0 %v4722_v61, %s4503_s29  ;;  %884 = vrot.lane.b32.xlu2 %v4698_v52, %s4503_s29 }
 0x163   : > { %888 = vrot.lane.b32.xlu1 %v4754_v10, %s4503_s29 }
 0x164   : > { %v4892_v3 = vpop.permute.xlu0 %868  ;;  %v4894_v4 = vpop.permute.xlu2 %782 }
 0x165   : > { %v4890_v2 = vpop.permute.xlu1 %780  ;;  %9563 = vst [vmem:[#allocation40_spill] sm:$0xff] %v4892_v3 }
 0x166   : > { %9562 = vst [vmem:[#allocation39_spill] sm:$0xff] %v4890_v2 }
 0x167   : > { %9564 = vst [vmem:[#allocation41_spill] sm:$0xff] %v4894_v4 }
 0x16a   : > { %892 = vrot.lane.b32.xlu0 %v4834_v46, %s4503_s29  ;;  %890 = vrot.lane.b32.xlu2 %v4794_v25, %s4503_s29 }
 0x16b   : > { %950 = vrot.lane.b32.xlu1 %v4630_v30, %s4504_s30 }
 0x16c   : > { %v4904_v17 = vpop.permute.xlu0 %501  ;;  %v4906_v18 = vpop.permute.xlu2 %592 }
 0x16d   : > { %v4902_v5 = vpop.permute.xlu1 %590  ;;  %9566 = vst [vmem:[#allocation43_spill] sm:$0xff] %v4906_v18 }
 0x16e   : > { %9565 = vst [vmem:[#allocation42_spill] sm:$0xff] %v4902_v5 }
 0x172   : > { %954 = vrot.lane.b32.xlu0 %v4674_v44, %s4504_s30  ;;  %952 = vrot.lane.b32.xlu2 %v4652_v37, %s4504_s30 }
 0x173   : > { %956 = vrot.lane.b32.xlu1 %v4696_v51, %s4504_s30 }
 0x174   : > { %v4916_v20 = vpop.permute.xlu0 %606  ;;  %v4918_v29 = vpop.permute.xlu2 %696 }
 0x175   : > { %v4914_v19 = vpop.permute.xlu1 %694  ;;  %9568 = vst [vmem:[#allocation45_spill] sm:$0xff] %v4916_v20 }
 0x176   : > { %9567 = vst [vmem:[#allocation44_spill] sm:$0xff] %v4914_v19 }
 0x177   : > { %9569 = vst [vmem:[#allocation46_spill] sm:$0xff] %v4918_v29  ;;  %v5004_v29 = vand.u32 127, %v525_v0 }
 0x179   : > { %9581 = vst [vmem:[#allocation58_spill] sm:$0xff] %v5004_v29  ;;  %vm614_vm1 = vcmp.lt.s32.totalorder %v5004_v29, 16  ;;  %vm790_vm2 = vcmp.lt.s32.totalorder %v5004_v29, 1  ;;  %vm527_vm3 = vcmp.lt.s32.totalorder %v5004_v29, 17  ;;  %vm702_vm4 = vcmp.lt.s32.totalorder %v5004_v29, 15 }
 0x17a   : > { %960 = vrot.lane.b32.xlu0 %v4752_v9, %s4504_s30  ;;  %958 = vrot.lane.b32.xlu2 %v4720_v60, %s4504_s30  ;;  %vm894_vm5 = vcmp.lt.s32.totalorder %v5004_v29, 127  ;;  %vm1070_vm6 = vcmp.lt.s32.totalorder %v5004_v29, 112  ;;  %vm982_vm7 = vcmp.lt.s32.totalorder %v5004_v29, 113  ;;  %vm1158_vm8 = vcmp.lt.s32.totalorder %v5004_v29, 111  ;;  %v6362_v29 = vld [vmem:[%s9191_s4 + $0x1d8] sm:$0xff] }
 0x17b   : > { %962 = vrot.lane.b32.xlu1 %v4792_v24, %s4504_s30 }
 0x17c   : > { %v4928_v39 = vpop.permute.xlu0 %766  ;;  %v4930_v40 = vpop.permute.xlu2 %872 }
 0x17d   : > { %v4926_v32 = vpop.permute.xlu1 %870  ;;  %9571 = vst [vmem:[#allocation48_spill] sm:$0xff] %v4928_v39 }
 0x17e   : > { %9570 = vst [vmem:[#allocation47_spill] sm:$0xff] %v4926_v32 }
 0x17f   : > { %9572 = vst [vmem:[#allocation49_spill] sm:$0xff] %v4930_v40 }
 0x182   : > { %966 = vrot.lane.b32.xlu0 %v4632_v31, %s4504_s30  ;;  %964 = vrot.lane.b32.xlu2 %v4820_v36, %s4504_s30 }
 0x183   : > { %968 = vrot.lane.b32.xlu1 %v4654_v38, %s4504_s30 }
 0x184   : > { %v4940_v33 = vpop.permute.xlu0 %519  ;;  %v4942_v35 = vpop.permute.xlu2 %505 }
 0x185   : > { %v4938_v15 = vpop.permute.xlu1 %503 }
 0x18a   : > { %972 = vrot.lane.b32.xlu0 %v4698_v52, %s4504_s30  ;;  %970 = vrot.lane.b32.xlu2 %v4676_v45, %s4504_s30 }
 0x18b   : > { %974 = vrot.lane.b32.xlu1 %v4722_v61, %s4504_s30 }
 0x18c   : > { %v4952_v32 = vpop.permute.xlu0 %680  ;;  %v4954_v40 = vpop.permute.xlu2 %610 }
 0x18d   : > { %v4950_v3 = vpop.permute.xlu1 %608  ;;  %9573 = vst [vmem:[#allocation50_spill] sm:$0xff] %v4952_v32  ;;  %v5009_v32 = vld [vmem:[%s9187_s0 + $0x1] ss:$8 sm:$0x3] }
 0x18e   : > { %9582 = vst [vmem:[#allocation59_spill] sm:$0xff] %v5009_v32  ;;  %v634_v0 = vperm.slane %v5009_v32, 0 }
 0x192   : > { %978 = vrot.lane.b32.xlu0 %v4794_v25, %s4504_s30  ;;  %976 = vrot.lane.b32.xlu2 %v4754_v10, %s4504_s30 }
 0x193   : > { %980 = vrot.lane.b32.xlu1 %v4834_v46, %s4504_s30 }
 0x194   : > { %v4964_v11 = vpop.permute.xlu0 %784  ;;  %v4966_v26 = vpop.permute.xlu2 %770 }
 0x195   : > { %v4962_v12 = vpop.permute.xlu1 %768  ;;  %9575 = vst [vmem:[#allocation52_spill] sm:$0xff] %v4964_v11 }
 0x196   : > { %9574 = vst [vmem:[#allocation51_spill] sm:$0xff] %v4962_v12 }
 0x197   : > { %9576 = vst [vmem:[#allocation53_spill] sm:$0xff] %v4966_v26 }
 0x19a   : > { %1040 = vrot.lane.b32.xlu0 %v4652_v37, %s4505_s9  ;;  %1038 = vrot.lane.b32.xlu2 %v4630_v30, %s4505_s9 }
 0x19b   : > { %1042 = vrot.lane.b32.xlu1 %v4674_v44, %s4505_s9 }
 0x19c   : > { %v4976_v28 = vpop.permute.xlu0 %594  ;;  %v4978_v48 = vpop.permute.xlu2 %523 }
 0x19d   : > { %v4974_v13 = vpop.permute.xlu1 %521 }
 0x1a2   : > { %1046 = vrot.lane.b32.xlu0 %v4720_v60, %s4505_s9  ;;  %1044 = vrot.lane.b32.xlu2 %v4696_v51, %s4505_s9 }
 0x1a3   : > { %1048 = vrot.lane.b32.xlu1 %v4752_v9, %s4505_s9 }
 0x1a4   : > { %v4988_v58 = vpop.permute.xlu0 %698  ;;  %v4990_v19 = vpop.permute.xlu2 %684 }
 0x1a5   : > { %v4986_v63 = vpop.permute.xlu1 %682  ;;  %9578 = vst [vmem:[#allocation55_spill] sm:$0xff] %v4988_v58 }
 0x1a6   : > { %9577 = vst [vmem:[#allocation54_spill] sm:$0xff] %v4986_v63 }
 0x1a7   : > { %9579 = vst [vmem:[#allocation56_spill] sm:$0xff] %v4990_v19 }
 0x1aa   : > { %1052 = vrot.lane.b32.xlu0 %v4820_v36, %s4505_s9  ;;  %1050 = vrot.lane.b32.xlu2 %v4792_v24, %s4505_s9 }
 0x1ab   : > { %1054 = vrot.lane.b32.xlu1 %v4632_v31, %s4505_s9 }
 0x1ac   : > { %v5000_v6 = vpop.permute.xlu0 %507  ;;  %v5002_v59 = vpop.permute.xlu2 %788 }
 0x1ad   : > { %v4998_v9 = vpop.permute.xlu1 %786 }
 0x1ae   : > { %9580 = vst [vmem:[#allocation57_spill] sm:$0xff] %v4998_v9 }
 0x1b2   : > { %1058 = vrot.lane.b32.xlu0 %v4676_v45, %s4505_s9  ;;  %1056 = vrot.lane.b32.xlu2 %v4654_v38, %s4505_s9  ;;  %v629_v38 = vsel %vm614_vm1, %v4954_v40, %v4976_v28  ;;  %v628_v45 = vsel %vm614_vm1, %v4950_v3, %v4906_v18 }
 0x1b3   : > { %1060 = vrot.lane.b32.xlu1 %v4698_v52, %s4505_s9  ;;  %v650_v32 = vmul.f32 %v634_v0, %v629_v38  ;;  %v648_v38 = vmul.f32 %v634_v0, %v628_v45 }
 0x1b4   : > { %v5019_v24 = vpop.permute.xlu0 %612  ;;  %v5023_v36 = vpop.permute.xlu2 %878 }
 0x1b5   : > { %v5017_v31 = vpop.permute.xlu1 %596  ;;  %9583 = vst [vmem:[#allocation60_spill] sm:$0xff] %v5023_v36  ;;  %v5040_v36 = vld [vmem:[%s9187_s0 + $0x3] ss:$8 sm:$0x3] }
 0x1b6   : > { %v630_v52 = vsel %vm614_vm1, %v5019_v24, %v5017_v31  ;;  %9584 = vst [vmem:[#allocation61_spill] sm:$0xff] %v5040_v36 }
 0x1b7   : > { %v652_v8 = vmul.f32 %v634_v0, %v630_v52  ;;  %v627_v52 = vsel %vm614_vm1, %v4916_v20, %v4902_v5 }
 0x1b8   : > { %v646_v20 = vmul.f32 %v634_v0, %v627_v52  ;;  %v624_v52 = vsel %vm614_vm1, %v4804_v27, %v4786_v21 }
 0x1b9   : > { %1583 = vmatpush.msra.mxu2 %v652_v8 }
 0x1ba   : > { %1064 = vrot.lane.b32.xlu0 %v4754_v10, %s4505_s9  ;;  %1062 = vrot.lane.b32.xlu2 %v4722_v61, %s4505_s9  ;;  %v5062_v10 = vperm.slane %v5040_v36, 0  ;;  %v625_v61 = vsel %vm614_vm1, %v4842_v47, %v4790_v23  ;;  %v804_v36 = vsel %vm790_vm2, %v4964_v11, %v4962_v12 }
 0x1bb   : > { %1066 = vrot.lane.b32.xlu1 %v4794_v25, %s4505_s9  ;;  %1584 = vmatpush.msra.mxu2 %v650_v32  ;;  %v626_v25 = vsel %vm614_vm1, %v4846_v49, %v4868_v56 }
 0x1bc   : > { %v5055_v18 = vpop.permute.xlu0 %772  ;;  %v5064_v5 = vpop.permute.xlu2 %884  ;;  %v644_v56 = vmul.f32 %v634_v0, %v626_v25  ;;  %v824_v11 = vmul.f32 %v5062_v10, %v804_v36 }
 0x1bd   : > { %v5053_v8 = vpop.permute.xlu1 %700  ;;  %1585 = vmatpush.msra.mxu2 %v648_v38  ;;  %v806_v45 = vsel %vm790_vm2, %v5002_v59, %v5055_v18  ;;  %v805_v38 = vsel %vm790_vm2, %v4998_v9, %v4966_v26  ;;  %v9603_v26 = vld [vmem:[#allocation36_spill] sm:$0xff]  ;;  %v9604_v9 = vld [vmem:[#allocation37_spill] sm:$0xff] }
 0x1be   : > { %9585 = vst [vmem:[#allocation62_spill] sm:$0xff] %v5053_v8  ;;  %v828_v32 = vmul.f32 %v5062_v10, %v806_v45  ;;  %v642_v45 = vmul.f32 %v634_v0, %v625_v61  ;;  %v826_v25 = vmul.f32 %v5062_v10, %v805_v38  ;;  %v5099_v61 = vld [vmem:[%s9187_s0] ss:$8 sm:$0x3] }
 0x1bf   : > { %1586 = vmatpush.msra.mxu2 %v646_v20  ;;  %v640_v20 = vmul.f32 %v634_v0, %v624_v52 }
 0x1c0   : > { %1648 = vmatpush.msra.mxu3 %v828_v32  ;;  %v803_v32 = vsel %vm790_vm2, %v4894_v4, %v4928_v39  ;;  %v546_v39 = vperm.slane %v5099_v61, 0 }
 0x1c1   : > { %1587 = vmatpush.msra.mxu2 %v644_v56  ;;  %v623_v56 = vsel %vm614_vm1, %v4730_v62, %v4748_v7  ;;  %v822_v4 = vmul.f32 %v5062_v10, %v803_v32 }
 0x1c2   : > { %1126 = vrot.lane.b32.xlu0 %v4630_v30, %s4506_s14  ;;  %1068 = vrot.lane.b32.xlu2 %v4834_v46, %s4505_s9  ;;  %v638_v30 = vmul.f32 %v634_v0, %v623_v56  ;;  %v801_v0 = vsel %vm790_vm2, %v4856_v53, %v4854_v50 }
 0x1c3   : > { %1128 = vrot.lane.b32.xlu1 %v4652_v37, %s4506_s14  ;;  %1588 = vmatpush.msra.mxu2 %v642_v45  ;;  %v543_v45 = vsel %vm527_vm3, %v4978_v48, %v5000_v6 }
 0x1c4   : > { %1649 = vmatpush.msra.mxu3 %v826_v25  ;;  %v5110_v12 = vpop.permute.xlu0 %874  ;;  %v5117_v52 = vpop.permute.xlu2 %890  ;;  %v802_v25 = vsel %vm790_vm2, %v4890_v2, %v4858_v54  ;;  %v564_v36 = vmul.f32 %v546_v39, %v543_v45  ;;  %v540_v45 = vsel %vm527_vm3, %v4870_v57, %v4904_v17 }
 0x1c5   : > { %v5108_v38 = vpop.permute.xlu1 %876  ;;  %9587 = vst [vmem:[#allocation64_spill] sm:$0xff] %v5110_v12  ;;  %1589 = vmatpush.msra.mxu2 %v640_v20  ;;  %v542_v20 = vsel %vm527_vm3, %v4974_v13, %v4942_v35  ;;  %v820_v56 = vmul.f32 %v5062_v10, %v802_v25  ;;  %v799_v25 = vsel %vm790_vm2, %v4774_v14, %v4738_v1 }
 0x1c6   : > { %9586 = vst [vmem:[#allocation63_spill] sm:$0xff] %v5108_v38  ;;  %1650 = vmatpush.msra.mxu3 %v824_v11  ;;  %v800_v11 = vsel %vm790_vm2, %v4778_v16, %v4816_v34  ;;  %v562_v32 = vmul.f32 %v546_v39, %v542_v20  ;;  %v539_v1 = vsel %vm527_vm3, %v4866_v55, %v4832_v43 }
 0x1c7   : > { %9588 = vst [vmem:[#allocation65_spill] sm:$0xff] %v5117_v52  ;;  %1590 = vmatpush.msra.mxu2 %v638_v30  ;;  %v541_v30 = vsel %vm527_vm3, %v4940_v33, %v4938_v15  ;;  %v816_v34 = vmul.f32 %v5062_v10, %v800_v11  ;;  %v814_v14 = vmul.f32 %v5062_v10, %v799_v25  ;;  %v9592_v25 = vld [vmem:[#allocation50_spill] sm:$0xff] }
 0x1c8   : > { %1651 = vmatpush.msra.mxu3 %v822_v4  ;;  %v818_v4 = vmul.f32 %v5062_v10, %v801_v0  ;;  %v538_v11 = vsel %vm527_vm3, %v4830_v42, %v4828_v41 }
 0x1c9   : > { %1591 = vmatpush.msra.mxu2 %v564_v36  ;;  %v5160_v36 = vld [vmem:[%s9187_s0 + $0x2] ss:$8 sm:$0x3] }
 0x1ca   : > { %1652 = vmatpush.msra.mxu3 %v820_v56  ;;  %1132 = vrot.lane.b32.xlu0 %v4696_v51, %s4506_s14  ;;  %9589 = vst [vmem:[#allocation66_spill] sm:$0xff] %v5160_v36  ;;  %v560_v56 = vmul.f32 %v546_v39, %v541_v30  ;;  %v722_v30 = vperm.slane %v5160_v36, 0  ;;  %v9593_v36 = vld [vmem:[#allocation46_spill] sm:$0xff] }
 0x1cb   : > { %1134 = vrot.lane.b32.xlu1 %v4720_v60, %s4506_s14  ;;  %1130 = vrot.lane.b32.xlu2 %v4674_v44, %s4506_s14 }
 0x1cc   : > { %1592 = vmatpush.msra.mxu2 %v562_v32  ;;  %1653 = vmatpush.msra.mxu3 %v818_v4  ;;  %v5165_v0 = vpop.permute.xlu0 %880  ;;  %v5168_v16 = vpop.permute.xlu2 %952  ;;  %v718_v32 = vsel %vm702_vm4, %v5053_v8, %v4990_v19  ;;  %v558_v4 = vmul.f32 %v546_v39, %v540_v45  ;;  %v554_v45 = vmul.f32 %v546_v39, %v538_v11  ;;  %v9600_v8 = vld [vmem:[#allocation44_spill] sm:$0xff] }
 0x1cd   : > { %v5163_v20 = vpop.permute.xlu1 %882  ;;  %9590 = vst [vmem:[#allocation67_spill] sm:$0xff] %v5168_v16  ;;  %v556_v16 = vmul.f32 %v546_v39, %v539_v1  ;;  %v740_v50 = vmul.f32 %v722_v30, %v718_v32  ;;  %v9594_v1 = vld [vmem:[#allocation30_spill] sm:$0xff]  ;;  %v9595_v32 = vld [vmem:[#allocation23_spill] sm:$0xff] }
 0x1ce   : > { %1593 = vmatpush.msra.mxu2 %v560_v56  ;;  %1654 = vmatpush.msra.mxu3 %v816_v34  ;;  %v717_v56 = vsel %vm702_vm4, %v4988_v58, %v4986_v63  ;;  %v9591_v34 = vld [vmem:[#allocation14_spill] sm:$0xff]  ;;  %v9597_v58 = vld [vmem:[#allocation13_spill] sm:$0xff] }
 0x1cf   : > { %v537_v10 = vsel %vm527_vm3, %v9591_v34, %v4788_v22  ;;  %v9596_v63 = vld [vmem:[#allocation10_spill] sm:$0xff] }
 0x1d0   : > { %1594 = vmatpush.msra.mxu2 %v558_v4  ;;  %1655 = vmatpush.msra.mxu3 %v814_v14  ;;  %v716_v14 = vsel %vm702_vm4, %v9593_v36, %v9592_v25  ;;  %v738_v4 = vmul.f32 %v722_v30, %v717_v56  ;;  %v536_v19 = vsel %vm527_vm3, %v9597_v58, %v9596_v63  ;;  %v9599_v36 = vld [vmem:[#allocation38_spill] sm:$0xff] }
 0x1d1   : > { %v552_v25 = vmul.f32 %v546_v39, %v537_v10  ;;  %v715_v53 = vsel %vm702_vm4, %v9600_v8, %v9599_v36  ;;  %v736_v56 = vmul.f32 %v722_v30, %v716_v14  ;;  %v550_v2 = vmul.f32 %v546_v39, %v536_v19  ;;  %v9605_v36 = vld [vmem:[#allocation31_spill] sm:$0xff]  ;;  %v5233_v39 = vld [vmem:[%s9187_s0 + $0x5] ss:$8 sm:$0x3] }
 0x1d2   : > { %1595 = vmatpush.msra.mxu2 %v556_v16  ;;  %1656 = vmatpush.msra.mxu3 %v740_v50  ;;  %v9598_v16 = vld [vmem:[#allocation15_spill] sm:$0xff]  ;;  %v714_v10 = vsel %vm702_vm4, %v9604_v9, %v9603_v26  ;;  %v734_v37 = vmul.f32 %v722_v30, %v715_v53  ;;  %9607 = vst [vmem:[#allocation23_spill] sm:$0xff] %v5233_v39  ;;  %v9616_v26 = vld [vmem:[#allocation18_spill] sm:$0xff] }
 0x1d3   : > { %1140 = vrot.lane.b32.xlu1 %v9594_v1, %s4506_s14  ;;  %1138 = vrot.lane.b32.xlu0 %v9595_v32, %s4506_s14  ;;  %v732_v19 = vmul.f32 %v722_v30, %v714_v10  ;;  %v9612_v10 = vld [vmem:[#allocation5_spill] sm:$0xff] }
 0x1d4   : > { %1136 = vrot.lane.b32.xlu2 %v9598_v16, %s4506_s14  ;;  %1596 = vmatpush.msra.mxu2 %v554_v45  ;;  %v5208_v11 = vpop.permute.xlu0 %886  ;;  %v5214_v54 = vpop.permute.xlu2 %958  ;;  %v5219_v45 = vld [vmem:[%s9191_s4] sm:$0xff] }
 0x1d5   : > { %v5206_v50 = vpop.permute.xlu1 %888  ;;  %1657 = vmatpush.msra.mxu3 %v738_v4  ;;  %9601 = vst [vmem:[#allocation14_spill] sm:$0xff] %v5214_v54  ;;  %v9606_v4 = vld [vmem:[#allocation26_spill] sm:$0xff]  ;;  %v9609_v54 = vld [vmem:[#allocation25_spill] sm:$0xff] }
 0x1d6   : > { %1597 = vmatpush.msra.mxu2 %v552_v25  ;;  %9602 = vst [vmem:[#allocation30_spill] sm:$0xff] %v5219_v45  ;;  %v713_v14 = vsel %vm702_vm4, %v9606_v4, %v9605_v36  ;;  %v9608_v25 = vld [vmem:[#allocation19_spill] sm:$0xff]  ;;  %v9615_v4 = vld [vmem:[#allocation17_spill] sm:$0xff] }
 0x1d7   : > { %1658 = vmatpush.msra.mxu3 %v736_v56  ;;  %v712_v53 = vsel %vm702_vm4, %v9609_v54, %v9608_v25  ;;  %v730_v56 = vmul.f32 %v722_v30, %v713_v14 }
 0x1d8   : > { %1598 = vmatpush.msra.mxu2 %v550_v2  ;;  %v9610_v2 = vld [vmem:[#allocation8_spill] sm:$0xff]  ;;  %v728_v14 = vmul.f32 %v722_v30, %v712_v53  ;;  %v622_v53 = vsel %vm614_vm1, %v5017_v31, %v5019_v24  ;;  %v9621_v31 = vld [vmem:[#allocation49_spill] sm:$0xff] }
 0x1d9   : > { %1659 = vmatpush.msra.mxu3 %v734_v37  ;;  %1599 = vmatmul.f32.vlgmr.msra.gmra.mxu2 %v5219_v45  ;;  %v9611_v37 = vld [vmem:[#allocation7_spill] sm:$0xff]  ;;  %v900_v24 = vsel %vm894_vm5, %v9621_v31, %v5206_v50 }
 0x1db   : > { %1660 = vmatpush.msra.mxu3 %v732_v19  ;;  %1146 = vrot.lane.b32.xlu1 %v9610_v2, %s4506_s14  ;;  %v711_v19 = vsel %vm702_vm4, %v9616_v26, %v9615_v4  ;;  %v5255_v2 = vperm.slane %v5233_v39, 0 }
 0x1dc   : > { %1144 = vrot.lane.b32.xlu0 %v9611_v37, %s4506_s14  ;;  %1142 = vrot.lane.b32.xlu2 %v9612_v10, %s4506_s14  ;;  %v5248_v36 = vpop.permute.xlu0 %892  ;;  %v5257_v25 = vpop.permute.xlu2 %964  ;;  %v901_v37 = vsel %vm894_vm5, %v5110_v12, %v5117_v52  ;;  %v726_v39 = vmul.f32 %v722_v30, %v711_v19  ;;  %v9620_v52 = vld [vmem:[#allocation59_spill] sm:$0xff] }
 0x1dd   : > { %v5246_v45 = vpop.permute.xlu1 %950  ;;  %9614 = vst [vmem:[#allocation13_spill] sm:$0xff] %v5248_v36  ;;  %1661 = vmatpush.msra.mxu3 %v730_v56  ;;  %v902_v10 = vsel %vm894_vm5, %v5108_v38, %v5248_v36  ;;  %v5280_v36 = vld [vmem:[%s9191_s4 + $0x8] sm:$0xff]  ;;  %v635_v12 = vperm.slane %v9620_v52, 1  ;;  %v621_v38 = vsel %vm614_vm1, %v4976_v28, %v4954_v40  ;;  %v9622_v52 = vld [vmem:[#allocation43_spill] sm:$0xff]  ;;  %v928_v19 = vmul.f32 %v5255_v2, %v900_v24 }
 0x1de   : > { %9613 = vst [vmem:[#allocation10_spill] sm:$0xff] %v5246_v45  ;;  %v5270_v45 = vld [vmem:[%s9191_s4 + $0x28] sm:$0xff]  ;;  %v932_v56 = vmul.f32 %v5255_v2, %v902_v10  ;;  %v620_v10 = vsel %vm614_vm1, %v9622_v52, %v4950_v3  ;;  %v9623_v28 = vld [vmem:[#allocation47_spill] sm:$0xff]  ;;  %v9630_v52 = vld [vmem:[#allocation42_spill] sm:$0xff] }
 0x1df   : > { %9617 = vst [vmem:[#allocation15_spill] sm:$0xff] %v5257_v25  ;;  %1662 = vmatpush.msra.mxu3 %v728_v14  ;;  %v930_v25 = vmul.f32 %v5255_v2, %v901_v37  ;;  %v653_v30 = vmul.f32 %v635_v12, %v622_v53  ;;  %v899_v40 = vsel %vm894_vm5, %v9623_v28, %v5208_v11  ;;  %v9625_v14 = vld [vmem:[#allocation11_spill] sm:$0xff] }
 0x1e0   : > { %9618 = vst [vmem:[#allocation44_spill] sm:$0xff] %v5270_v45  ;;  %1713 = vmatpush.msrb.mxu0 %v932_v56  ;;  %v651_v37 = vmul.f32 %v635_v12, %v621_v38  ;;  %v9629_v56 = vld [vmem:[#allocation45_spill] sm:$0xff]  ;;  %v926_v24 = vmul.f32 %v5255_v2, %v899_v40  ;;  %v5336_v40 = vld [vmem:[%s9191_s4 + $0x30] sm:$0xff] }
 0x1e1   : > { %9619 = vst [vmem:[#allocation37_spill] sm:$0xff] %v5280_v36  ;;  %1663 = vmatpush.msra.mxu3 %v726_v39  ;;  %1602 = vmatmul.f32.gmra.mxu2 %v5270_v45  ;;  %v9624_v39 = vld [vmem:[#allocation16_spill] sm:$0xff]  ;;  %v619_v38 = vsel %vm614_vm1, %v9630_v52, %v9629_v56  ;;  %v617_v56 = vsel %vm614_vm1, %v4790_v23, %v4842_v47  ;;  %v9637_v47 = vld [vmem:[#allocation27_spill] sm:$0xff] }
 0x1e2   : > { %1664 = vmatmul.f32.vlgmr.msra.gmra.mxu3 %v5280_v36  ;;  %1714 = vmatpush.msrb.mxu0 %v930_v25  ;;  %v9626_v25 = vld [vmem:[#allocation9_spill] sm:$0xff]  ;;  %v9632_v45 = vld [vmem:[#allocation40_spill] sm:$0xff]  ;;  %9635 = vst [vmem:[#allocation49_spill] sm:$0xff] %v5336_v40  ;;  %v616_v23 = vsel %vm614_vm1, %v4786_v21, %v4804_v27  ;;  %v615_v21 = vsel %vm614_vm1, %v4748_v7, %v4730_v62 }
 0x1e3   : > { %1908 = vmatpush.msrb.mxu3 %v653_v30  ;;  %1152 = vrot.lane.b32.xlu1 %v9624_v39, %s4506_s14  ;;  %v649_v30 = vmul.f32 %v635_v12, %v620_v10  ;;  %v9634_v39 = vld [vmem:[#allocation35_spill] sm:$0xff]  ;;  %v1438_v52 = vld [vmem:[%s9192_s5] sm:$0xff]  ;;  %v639_v62 = vmul.f32 %v635_v12, %v615_v21  ;;  %v532_v21 = vsel %vm527_vm3, %v4904_v17, %v4870_v57 }
 0x1e4   : > { %1150 = vrot.lane.b32.xlu0 %v9625_v14, %s4506_s14  ;;  %1148 = vrot.lane.b32.xlu2 %v9626_v25, %s4506_s14  ;;  %v5311_v3 = vpop.permute.xlu0 %954  ;;  %v5317_v36 = vpop.permute.xlu2 %970  ;;  %v898_v25 = vsel %vm894_vm5, %v9632_v45, %v5064_v5  ;;  %v5327_v14 = vld [vmem:[%s9191_s4 + $0x50] sm:$0xff]  ;;  %v618_v10 = vsel %vm614_vm1, %v9634_v39, %v4846_v49  ;;  %v9636_v49 = vld [vmem:[#allocation29_spill] sm:$0xff]  ;;  %v9639_v27 = vld [vmem:[#allocation60_spill] sm:$0xff]  ;;  %v530_v17 = vsel %vm527_vm3, %v4828_v41, %v4830_v42 }
 0x1e5   : > { %v5309_v53 = vpop.permute.xlu1 %956  ;;  %9628 = vst [vmem:[#allocation17_spill] sm:$0xff] %v5311_v3  ;;  %1909 = vmatpush.msrb.mxu3 %v651_v37  ;;  %1715 = vmatpush.msrb.mxu0 %v928_v19  ;;  %v647_v37 = vmul.f32 %v635_v12, %v619_v38  ;;  %v924_v19 = vmul.f32 %v5255_v2, %v898_v25  ;;  %v5440_v57 = vld [vmem:[%s9191_s4 + $0x80] sm:$0xff] }
 0x1e6   : > { %9627 = vst [vmem:[#allocation25_spill] sm:$0xff] %v5309_v53  ;;  %v897_v39 = vsel %vm894_vm5, %v9636_v49, %v5163_v20  ;;  %v645_v38 = vmul.f32 %v635_v12, %v618_v10  ;;  %v896_v25 = vsel %vm894_vm5, %v9637_v47, %v5165_v0  ;;  %v9638_v10 = vld [vmem:[#allocation24_spill] sm:$0xff] }
 0x1e7   : > { %9631 = vst [vmem:[#allocation18_spill] sm:$0xff] %v5317_v36  ;;  %1910 = vmatpush.msrb.mxu3 %v649_v30  ;;  %1716 = vmatpush.msrb.mxu0 %v926_v24  ;;  %v643_v30 = vmul.f32 %v635_v12, %v617_v56  ;;  %v922_v24 = vmul.f32 %v5255_v2, %v897_v39  ;;  %v9640_v56 = vld [vmem:[#allocation21_spill] sm:$0xff] }
 0x1e8   : > { %9633 = vst [vmem:[#allocation59_spill] sm:$0xff] %v5327_v14  ;;  %v641_v39 = vmul.f32 %v635_v12, %v616_v23  ;;  %v5393_v23 = vld [vmem:[%s9191_s4 + $0x58] sm:$0xff] }
 0x1e9   : > { %1911 = vmatpush.msrb.mxu3 %v647_v37  ;;  %1605 = vmatmul.f32.gmra.mxu2 %v5327_v14  ;;  %v535_v14 = vsel %vm527_vm3, %v5000_v6, %v4978_v48  ;;  %9641 = vst [vmem:[#allocation43_spill] sm:$0xff] %v5393_v23  ;;  %v534_v6 = vsel %vm527_vm3, %v4942_v35, %v4974_v13  ;;  %v1441_v48 = vld [vmem:[%s9192_s5 + $0x18] sm:$0xff] }
 0x1ea   : > { %1667 = vmatmul.f32.gmra.mxu3 %v5336_v40  ;;  %1717 = vmatpush.msrb.mxu0 %v924_v19  ;;  %v533_v13 = vsel %vm527_vm3, %v4938_v15, %v4940_v33  ;;  %v5430_v33 = vld [vmem:[%s9191_s4 + $0xa0] sm:$0xff]  ;;  %9645 = vst [vmem:[#allocation40_spill] sm:$0xff] %v5440_v57 }
 0x1eb   : > { %1912 = vmatpush.msrb.mxu3 %v645_v38  ;;  %1456 = vperm.xlu1 %4478, %v1438_v52   ;;  %v895_v52 = vsel %vm894_vm5, %v9640_v56, %v9639_v27  ;;  %v920_v38 = vmul.f32 %v5255_v2, %v896_v25  ;;  %v547_v25 = vperm.slane %v5099_v61, 1  ;;  %v1439_v61 = vld [vmem:[%s9192_s5 + $0x8] sm:$0xff]  ;;  %9644 = vst [vmem:[#allocation42_spill] sm:$0xff] %v5430_v33 }
 0x1ec   : > { %1156 = vrot.lane.b32.xlu0 %v4834_v46, %s4506_s14  ;;  %1154 = vrot.lane.b32.xlu2 %v9638_v10, %s4506_s14  ;;  %v5367_v19 = vpop.permute.xlu0 %960  ;;  %v5378_v40 = vpop.permute.xlu2 %976  ;;  %v918_v7 = vmul.f32 %v5255_v2, %v895_v52  ;;  %v1440_v2 = vld [vmem:[%s9192_s5 + $0x10] sm:$0xff] }
 0x1ed   : > { %v5365_v37 = vpop.permute.xlu1 %962  ;;  %1913 = vmatpush.msrb.mxu3 %v643_v30  ;;  %1718 = vmatpush.msrb.mxu0 %v922_v24  ;;  %v5388_v30 = vld [vmem:[%s9191_s4 + $0x78] sm:$0xff]  ;;  %v565_v12 = vmul.f32 %v547_v25, %v535_v14  ;;  %v563_v35 = vmul.f32 %v547_v25, %v534_v6  ;;  %v561_v52 = vmul.f32 %v547_v25, %v533_v13  ;;  %v9655_v13 = vld [vmem:[#allocation4_spill] sm:$0xff] }
 0x1ee   : > { %v559_v15 = vmul.f32 %v547_v25, %v532_v21  ;;  %v555_v41 = vmul.f32 %v547_v25, %v530_v17  ;;  %v1445_v21 = vld [vmem:[%s9192_s5 + $0x38] sm:$0xff] }
 0x1ef   : > { %1914 = vmatpush.msrb.mxu3 %v641_v39  ;;  %1719 = vmatpush.msrb.mxu0 %v920_v38 }
 0x1f1   : > { %1915 = vmatpush.msrb.mxu3 %v639_v62  ;;  %1720 = vmatpush.msrb.mxu0 %v918_v7  ;;  %v528_v7 = vsel %vm527_vm3, %v9596_v63, %v9597_v58  ;;  %v5486_v58 = vld [vmem:[%s9191_s4 + $0xa8] sm:$0xff] }
 0x1f2   : > { %1608 = vmatmul.f32.gmra.mxu2 %v5388_v30  ;;  %1670 = vmatmul.f32.gmra.mxu3 %v5393_v23  ;;  %v551_v6 = vmul.f32 %v547_v25, %v528_v7  ;;  %9649 = vst [vmem:[#allocation24_spill] sm:$0xff] %v5486_v58  ;;  %v9650_v63 = vld [vmem:[#allocation61_spill] sm:$0xff] }
 0x1f3   : > { %1916 = vmatpush.msrb.mxu3 %v565_v12  ;;  %1721 = vmatpush.msrb.mxu0 %v9594_v1  ;;  %v531_v1 = vsel %vm527_vm3, %v4832_v43, %v4866_v55  ;;  %v1444_v43 = vld [vmem:[%s9192_s5 + $0x30] sm:$0xff]  ;;  %v1443_v55 = vld [vmem:[%s9192_s5 + $0x28] sm:$0xff]  ;;  %v811_v12 = vperm.slane %v9650_v63, 1 }
 0x1f4   : > { %1471 = vperm.xlu1 %4478, %v1441_v48   ;;  %1466 = vperm.xlu0 %4477, %v1440_v2   ;;  %v5418_v24 = vpop.permute.xlu0 %966  ;;  %v5424_v39 = vpop.permute.xlu2 %1038  ;;  %v5493_v48 = vld [vmem:[%s9191_s4 + $0x10] sm:$0xff]  ;;  %v9653_v2 = vld [vmem:[#allocation57_spill] sm:$0xff] }
 0x1f5   : > { %v5416_v14 = vpop.permute.xlu1 %968  ;;  %9643 = vst [vmem:[#allocation45_spill] sm:$0xff] %v5418_v24  ;;  %1917 = vmatpush.msrb.mxu3 %v563_v35  ;;  %1461 = vperm.xlu2 %4479, %v1439_v61   ;;  %v9654_v61 = vld [vmem:[#allocation53_spill] sm:$0xff]  ;;  %v1446_v35 = vld [vmem:[%s9192_s5 + $0x40] sm:$0xff] }
 0x1f6   : > { %9642 = vst [vmem:[#allocation47_spill] sm:$0xff] %v5416_v14  ;;  %1722 = vmatpush.msrb.mxu0 %v9595_v32  ;;  %v557_v32 = vmul.f32 %v547_v25, %v531_v1 }
 0x1f7   : > { %1918 = vmatpush.msrb.mxu3 %v561_v52  ;;  %9652 = vst [vmem:[#allocation60_spill] sm:$0xff] %v5493_v48  ;;  %v9656_v52 = vld [vmem:[#allocation52_spill] sm:$0xff] }
 0x1f8   : > { %1723 = vmatpush.msrb.mxu0 %v9598_v16  ;;  %v1442_v16 = vld [vmem:[%s9192_s5 + $0x20] sm:$0xff] }
 0x1f9   : > { %1919 = vmatpush.msrb.mxu3 %v559_v15  ;;  %v9657_v15 = vld [vmem:[#allocation51_spill] sm:$0xff] }
 0x1fa   : > { %1724 = vmatpush.msrb.mxu0 %v4720_v60  ;;  %1611 = vmatmul.f32.gmra.mxu2 %v5430_v33  ;;  %v529_v60 = vsel %vm527_vm3, %v4788_v22, %v9591_v34  ;;  %v798_v34 = vsel %vm790_vm2, %v5055_v18, %v5002_v59  ;;  %v797_v59 = vsel %vm790_vm2, %v9654_v61, %v9653_v2  ;;  %v1447_v18 = vld [vmem:[%s9192_s5 + $0x48] sm:$0xff]  ;;  %v5543_v61 = vld [vmem:[%s9191_s4 + $0x38] sm:$0xff] }
 0x1fb   : > { %1673 = vmatmul.f32.gmra.mxu3 %v5440_v57  ;;  %v553_v22 = vmul.f32 %v547_v25, %v529_v60  ;;  %v829_v25 = vmul.f32 %v811_v12, %v798_v34  ;;  %v796_v1 = vsel %vm790_vm2, %v9657_v15, %v9656_v52  ;;  %v9659_v60 = vld [vmem:[#allocation48_spill] sm:$0xff]  ;;  %v9661_v34 = vld [vmem:[#allocation39_spill] sm:$0xff]  ;;  %v1448_v52 = vld [vmem:[%s9192_s5 + $0x50] sm:$0xff] }
 0x1fc   : > { %1920 = vmatpush.msrb.mxu3 %v557_v32  ;;  %1725 = vmatpush.msrb.mxu0 %v4696_v51  ;;  %v5465_v38 = vpop.permute.xlu0 %972  ;;  %v5467_v62 = vpop.permute.xlu2 %1044  ;;  %v5477_v51 = vld [vmem:[%s9191_s4 + $0xc8] sm:$0xff]  ;;  %v825_v7 = vmul.f32 %v811_v12, %v796_v1  ;;  %v9667_v15 = vld [vmem:[#allocation22_spill] sm:$0xff]  ;;  %v9668_v1 = vld [vmem:[#allocation28_spill] sm:$0xff] }
 0x1fd   : > { %v5463_v42 = vpop.permute.xlu1 %974  ;;  %9647 = vst [vmem:[#allocation29_spill] sm:$0xff] %v5465_v38  ;;  %1486 = vperm.xlu1 %4478, %v1444_v43   ;;  %1481 = vperm.xlu0 %4477, %v1443_v55   ;;  %v827_v43 = vmul.f32 %v811_v12, %v797_v59  ;;  %v9665_v59 = vld [vmem:[#allocation33_spill] sm:$0xff]  ;;  %v9706_v33 = vld [vmem:[#allocation67_spill] sm:$0xff] }
 0x1fe   : > { %9646 = vst [vmem:[#allocation35_spill] sm:$0xff] %v5463_v42  ;;  %1921 = vmatpush.msrb.mxu3 %v555_v41  ;;  %1476 = vperm.xlu2 %4479, %v1442_v16   ;;  %v9658_v16 = vld [vmem:[#allocation41_spill] sm:$0xff] }
 0x1ff   : > { %1726 = vmatpush.msrb.mxu0 %v4674_v44  ;;  %9648 = vst [vmem:[#allocation27_spill] sm:$0xff] %v5477_v51  ;;  %v9651_v44 = vld [vmem:[#allocation6_spill] sm:$0xff]  ;;  %v795_v41 = vsel %vm790_vm2, %v9659_v60, %v9658_v16 }
 0x200   : > { %1922 = vmatpush.msrb.mxu3 %v553_v22  ;;  %v5529_v22 = vld [vmem:[%s9191_s4 + $0xf0] sm:$0xff]  ;;  %v823_v2 = vmul.f32 %v811_v12, %v795_v41  ;;  %9664 = vst [vmem:[#allocation6_spill] sm:$0xff] %v5543_v61 }
 0x201   : > { %1727 = vmatpush.msrb.mxu0 %v9651_v44  ;;  %9660 = vst [vmem:[#allocation21_spill] sm:$0xff] %v5529_v22  ;;  %v5538_v44 = vld [vmem:[%s9191_s4 + $0xd0] sm:$0xff] }
 0x202   : > { %1923 = vmatpush.msrb.mxu3 %v551_v6  ;;  %1614 = vmatmul.f32.gmra.mxu2 %v5477_v51  ;;  %v9662_v6 = vld [vmem:[#allocation34_spill] sm:$0xff]  ;;  %9663 = vst [vmem:[#allocation61_spill] sm:$0xff] %v5538_v44  ;;  %v986_v51 = vsel %vm982_vm7, %v5309_v53, %v5465_v38  ;;  %v9712_v53 = vld [vmem:[#allocation65_spill] sm:$0xff] }
 0x203   : > { %1728 = vmatpush.msrb.mxu0 %v9655_v13  ;;  %1676 = vmatmul.f32.gmra.mxu3 %v5486_v58  ;;  %v794_v63 = vsel %vm790_vm2, %v9662_v6, %v9661_v34  ;;  %v1450_v13 = vld [vmem:[%s9192_s5 + $0x60] sm:$0xff] }
 0x204   : > { %1729 = vmatmul.f32.vlgmr.msrb.gmra.mxu0 %v5493_v48  ;;  %v5518_v32 = vpop.permute.xlu0 %978  ;;  %v5520_v55 = vpop.permute.xlu2 %1050  ;;  %v9669_v34 = vld [vmem:[#allocation20_spill] sm:$0xff] }
 0x205   : > { %v5516_v17 = vpop.permute.xlu1 %980  ;;  %1973 = vmatpush.msra.mxu0 %v829_v25  ;;  %1501 = vperm.xlu1 %4478, %v1447_v18   ;;  %v9666_v18 = vld [vmem:[#allocation32_spill] sm:$0xff] }
 0x206   : > { %1496 = vperm.xlu0 %4477, %v1446_v35   ;;  %1491 = vperm.xlu2 %4479, %v1445_v21   ;;  %v793_v25 = vsel %vm790_vm2, %v9666_v18, %v9665_v59  ;;  %v821_v35 = vmul.f32 %v811_v12, %v794_v63  ;;  %v1449_v21 = vld [vmem:[%s9192_s5 + $0x58] sm:$0xff]  ;;  %v9670_v6 = vld [vmem:[#allocation12_spill] sm:$0xff]  ;;  %v9672_v18 = vld [vmem:[#allocation62_spill] sm:$0xff] }
 0x207   : > { %1974 = vmatpush.msra.mxu0 %v827_v43  ;;  %v792_v43 = vsel %vm790_vm2, %v9668_v1, %v9667_v15  ;;  %v819_v41 = vmul.f32 %v811_v12, %v793_v25  ;;  %v791_v63 = vsel %vm790_vm2, %v9670_v6, %v9669_v34  ;;  %v5578_v59 = vld [vmem:[%s9191_s4 + $0x118] sm:$0xff]  ;;  %v9675_v15 = vld [vmem:[#allocation66_spill] sm:$0xff]  ;;  %v5593_v1 = vld [vmem:[%s9191_s4 + $0x60] sm:$0xff] }
 0x208   : > { %9671 = vst [vmem:[#allocation57_spill] sm:$0xff] %v5578_v59  ;;  %v1453_v6 = vld [vmem:[%s9192_s5 + $0x78] sm:$0xff] }
 0x209   : > { %1975 = vmatpush.msra.mxu0 %v825_v7  ;;  %9676 = vst [vmem:[#allocation4_spill] sm:$0xff] %v5593_v1 }
 0x20a   : > { %1617 = vmatmul.f32.gmra.mxu2 %v5529_v22 }
 0x20b   : > { %1976 = vmatpush.msra.mxu0 %v823_v2  ;;  %1679 = vmatmul.f32.gmra.mxu3 %v5538_v44  ;;  %v817_v2 = vmul.f32 %v811_v12, %v792_v43  ;;  %v9677_v43 = vld [vmem:[#allocation55_spill] sm:$0xff] }
 0x20c   : > { %1732 = vmatmul.f32.gmra.mxu0 %v5543_v61  ;;  %v5567_v60 = vpop.permute.xlu0 %1040  ;;  %v5569_v7 = vpop.permute.xlu2 %1056  ;;  %v9681_v61 = vld [vmem:[#allocation38_spill] sm:$0xff] }
 0x20d   : > { %v5565_v16 = vpop.permute.xlu1 %1042  ;;  %1977 = vmatpush.msra.mxu0 %v821_v35  ;;  %1516 = vperm.xlu1 %4478, %v1450_v13   ;;  %v9673_v35 = vld [vmem:[#allocation56_spill] sm:$0xff]  ;;  %v5587_v13 = vld [vmem:[%s9191_s4 + $0xf8] sm:$0xff]  ;;  %v707_v48 = vsel %vm702_vm4, %v9681_v61, %v9600_v8  ;;  %v5642_v61 = vld [vmem:[%s9191_s4 + $0x88] sm:$0xff] }
 0x20e   : > { %1511 = vperm.xlu0 %4477, %v1449_v21   ;;  %1506 = vperm.xlu2 %4479, %v1448_v52   ;;  %v710_v25 = vsel %vm702_vm4, %v9673_v35, %v9672_v18  ;;  %9674 = vst [vmem:[#allocation53_spill] sm:$0xff] %v5587_v13  ;;  %v723_v21 = vperm.slane %v9675_v15, 1  ;;  %v815_v52 = vmul.f32 %v811_v12, %v791_v63  ;;  %v1452_v63 = vld [vmem:[%s9192_s5 + $0x70] sm:$0xff] }
 0x20f   : > { %1978 = vmatpush.msra.mxu0 %v819_v41  ;;  %v9678_v41 = vld [vmem:[#allocation54_spill] sm:$0xff]  ;;  %9685 = vst [vmem:[#allocation41_spill] sm:$0xff] %v5642_v61 }
 0x210   : > { %v709_v34 = vsel %vm702_vm4, %v9678_v41, %v9677_v43  ;;  %v741_v12 = vmul.f32 %v723_v21, %v710_v25  ;;  %v9679_v18 = vld [vmem:[#allocation46_spill] sm:$0xff]  ;;  %v735_v8 = vmul.f32 %v723_v21, %v707_v48 }
 0x211   : > { %1979 = vmatpush.msra.mxu0 %v817_v2  ;;  %v1451_v2 = vld [vmem:[%s9192_s5 + $0x68] sm:$0xff]  ;;  %v9680_v35 = vld [vmem:[#allocation50_spill] sm:$0xff]  ;;  %v739_v25 = vmul.f32 %v723_v21, %v709_v34 }
 0x212   : > { %1620 = vmatmul.f32.gmra.mxu2 %v5578_v59  ;;  %v708_v15 = vsel %vm702_vm4, %v9680_v35, %v9679_v18  ;;  %v5628_v35 = vld [vmem:[%s9191_s4 + $0x140] sm:$0xff] }
 0x213   : > { %1980 = vmatpush.msra.mxu0 %v815_v52  ;;  %1682 = vmatmul.f32.gmra.mxu3 %v5587_v13  ;;  %v737_v18 = vmul.f32 %v723_v21, %v708_v15  ;;  %9682 = vst [vmem:[#allocation52_spill] sm:$0xff] %v5628_v35 }
 0x214   : > { %1735 = vmatmul.f32.gmra.mxu0 %v5593_v1  ;;  %v5617_v52 = vpop.permute.xlu0 %1046  ;;  %v5619_v41 = vpop.permute.xlu2 %1062 }
 0x215   : > { %v5615_v43 = vpop.permute.xlu1 %1048  ;;  %1981 = vmatpush.msra.mxu0 %v741_v12  ;;  %1531 = vperm.xlu1 %4478, %v1453_v6   ;;  %v9683_v12 = vld [vmem:[#allocation36_spill] sm:$0xff] }
 0x216   : > { %1526 = vperm.xlu0 %4477, %v1452_v63   ;;  %1521 = vperm.xlu2 %4479, %v1451_v2   ;;  %v706_v34 = vsel %vm702_vm4, %v9683_v12, %v9604_v9  ;;  %v5637_v6 = vld [vmem:[%s9191_s4 + $0x120] sm:$0xff]  ;;  %v9686_v63 = vld [vmem:[#allocation26_spill] sm:$0xff]  ;;  %v9687_v2 = vld [vmem:[#allocation31_spill] sm:$0xff] }
 0x217   : > { %1982 = vmatpush.msra.mxu0 %v739_v25  ;;  %9684 = vst [vmem:[#allocation51_spill] sm:$0xff] %v5637_v6  ;;  %v705_v15 = vsel %vm702_vm4, %v9687_v2, %v9686_v63  ;;  %v5652_v9 = vld [vmem:[%s9187_s0 + $0x7] ss:$8 sm:$0x3]  ;;  %v733_v48 = vmul.f32 %v723_v21, %v706_v34  ;;  %v9688_v25 = vld [vmem:[#allocation19_spill] sm:$0xff]  ;;  %v703_v34 = vsel %vm702_vm4, %v9615_v4, %v9616_v26  ;;  %v5689_v4 = vld [vmem:[%s9191_s4 + $0xb0] sm:$0xff] }
 0x218   : > { %v731_v2 = vmul.f32 %v723_v21, %v705_v15  ;;  %v5679_v15 = vld [vmem:[%s9191_s4 + $0x168] sm:$0xff]  ;;  %v727_v26 = vmul.f32 %v723_v21, %v703_v34  ;;  %9691 = vst [vmem:[#allocation34_spill] sm:$0xff] %v5689_v4  ;;  %v5706_v34 = vld [vmem:[%s9191_s4 + $0x170] sm:$0xff] }
 0x219   : > { %1983 = vmatpush.msra.mxu0 %v737_v18  ;;  %v704_v18 = vsel %vm702_vm4, %v9688_v25, %v9609_v54  ;;  %9689 = vst [vmem:[#allocation48_spill] sm:$0xff] %v5679_v15 }
 0x21a   : > { %1623 = vmatmul.f32.gmra.mxu2 %v5628_v35  ;;  %v729_v25 = vmul.f32 %v723_v21, %v704_v18  ;;  %v5701_v21 = vld [vmem:[%s9191_s4 + $0x190] sm:$0xff]  ;;  %9693 = vst [vmem:[#allocation32_spill] sm:$0xff] %v5706_v34  ;;  %v9701_v35 = vld [vmem:[#allocation15_spill] sm:$0xff] }
 0x21b   : > { %1984 = vmatpush.msra.mxu0 %v735_v8  ;;  %1685 = vmatmul.f32.gmra.mxu3 %v5637_v6  ;;  %v1090_v8 = vperm.slane %v5652_v9, 0  ;;  %9692 = vst [vmem:[#allocation33_spill] sm:$0xff] %v5701_v21  ;;  %v5740_v6 = vld [vmem:[%s9191_s4 + $0x198] sm:$0xff]  ;;  %v990_v57 = vsel %vm982_vm7, %v9701_v35, %v5516_v17 }
 0x21c   : > { %1738 = vmatmul.f32.gmra.mxu0 %v5642_v61  ;;  %v5662_v63 = vpop.permute.xlu0 %1052  ;;  %v5665_v1 = vpop.permute.xlu2 %1068  ;;  %v5684_v61 = vld [vmem:[%s9191_s4 + $0x148] sm:$0xff]  ;;  %9696 = vst [vmem:[#allocation20_spill] sm:$0xff] %v5740_v6 }
 0x21d   : > { %v5660_v12 = vpop.permute.xlu1 %1054  ;;  %1985 = vmatpush.msra.mxu0 %v733_v48  ;;  %v1078_v54 = vsel %vm1070_vm6, %v5662_v63, %v5665_v1  ;;  %9690 = vst [vmem:[#allocation39_spill] sm:$0xff] %v5684_v61 }
 0x21e   : > { %v1108_v48 = vmul.f32 %v1090_v8, %v1078_v54  ;;  %v5711_v54 = vld [vmem:[%s9191_s4 + $0xd8] sm:$0xff] }
 0x21f   : > { %1986 = vmatpush.msra.mxu0 %v731_v2  ;;  %9694 = vst [vmem:[#allocation22_spill] sm:$0xff] %v5711_v54 }
 0x220   : > { %1778 = vmatpush.msrb.mxu1 %v1108_v48 }
 0x221   : > { %1987 = vmatpush.msra.mxu0 %v729_v25 }
 0x222   : > { %1626 = vmatmul.f32.gmra.mxu2 %v5679_v15 }
 0x223   : > { %1988 = vmatpush.msra.mxu0 %v727_v26  ;;  %1688 = vmatmul.f32.gmra.mxu3 %v5684_v61 }
 0x224   : > { %1741 = vmatmul.f32.gmra.mxu0 %v5689_v4  ;;  %v5696_v2 = vpop.permute.xlu0 %1058 }
 0x225   : > { %v5694_v18 = vpop.permute.xlu1 %1060 }
 0x22a   : > { %1629 = vmatmul.f32.gmra.mxu2 %v5701_v21  ;;  %v1074_v21 = vsel %vm1070_vm6, %v5467_v62, %v5694_v18 }
 0x22b   : > { %1691 = vmatmul.f32.gmra.mxu3 %v5706_v34  ;;  %v5731_v34 = vld [vmem:[%s9191_s4 + $0x1b8] sm:$0xff]  ;;  %v1100_v58 = vmul.f32 %v1090_v8, %v1074_v21  ;;  %v5780_v21 = vld [vmem:[%s9187_s0 + $0x6] ss:$8 sm:$0x3] }
 0x22c   : > { %1744 = vmatmul.f32.gmra.mxu0 %v5711_v54  ;;  %v5718_v48 = vpop.permute.xlu0 %1064  ;;  %9695 = vst [vmem:[#allocation28_spill] sm:$0xff] %v5731_v34  ;;  %v1075_v54 = vsel %vm1070_vm6, %v5617_v52, %v5619_v41  ;;  %v1002_v23 = vperm.slane %v5780_v21, 0 }
 0x22d   : > { %v5716_v25 = vpop.permute.xlu1 %1066  ;;  %v1076_v4 = vsel %vm1070_vm6, %v5615_v43, %v5718_v48  ;;  %v1102_v44 = vmul.f32 %v1090_v8, %v1075_v54 }
 0x22e   : > { %v1077_v26 = vsel %vm1070_vm6, %v5520_v55, %v5716_v25  ;;  %v1104_v13 = vmul.f32 %v1090_v8, %v1076_v4  ;;  %v5757_v4 = vpop.permute.xlu2 %1130 }
 0x22f   : > { %v1106_v61 = vmul.f32 %v1090_v8, %v1077_v26  ;;  %v5745_v26 = vld [vmem:[%s9191_s4 + $0x100] sm:$0xff] }
 0x230   : > { %9697 = vst [vmem:[#allocation12_spill] sm:$0xff] %v5745_v26 }
 0x231   : > { %1779 = vmatpush.msrb.mxu1 %v1106_v61  ;;  %v1073_v61 = vsel %vm1070_vm6, %v5565_v16, %v5696_v2 }
 0x232   : > { %1632 = vmatmul.f32.gmra.mxu2 %v5731_v34  ;;  %v5771_v34 = vld [vmem:[%s9191_s4 + $0x1e0] sm:$0xff] }
 0x233   : > { %1780 = vmatpush.msrb.mxu1 %v1104_v13  ;;  %1694 = vmatmul.f32.gmra.mxu3 %v5740_v6  ;;  %v1072_v13 = vsel %vm1070_vm6, %v5567_v60, %v5569_v7  ;;  %v1098_v6 = vmul.f32 %v1090_v8, %v1073_v61  ;;  %9698 = vst [vmem:[#allocation62_spill] sm:$0xff] %v5771_v34 }
 0x234   : > { %1747 = vmatmul.f32.gmra.mxu0 %v5745_v26  ;;  %v5760_v15 = vpop.permute.xlu0 %1126  ;;  %v1096_v61 = vmul.f32 %v1090_v8, %v1072_v13  ;;  %v5791_v26 = vld [vmem:[%s9191_s4 + $0x128] sm:$0xff]  ;;  %v1020_v13 = vmul.f32 %v1002_v23, %v990_v57 }
 0x235   : > { %1781 = vmatpush.msrb.mxu1 %v1102_v44  ;;  %v5766_v54 = vpop.permute.xlu1 %1128  ;;  %v1071_v44 = vsel %vm1070_vm6, %v5424_v39, %v5660_v12  ;;  %9700 = vst [vmem:[#allocation66_spill] sm:$0xff] %v5791_v26 }
 0x236   : > { %v1094_v59 = vmul.f32 %v1090_v8, %v1071_v44  ;;  %v988_v8 = vsel %vm982_vm7, %v5367_v19, %v5378_v40  ;;  %v5811_v44 = vpop.permute.xlu2 %1136 }
 0x237   : > { %1782 = vmatpush.msrb.mxu1 %v1100_v58  ;;  %v5786_v58 = vld [vmem:[%s9191_s4 + $0x1c0] sm:$0xff] }
 0x238   : > { %9699 = vst [vmem:[#allocation56_spill] sm:$0xff] %v5786_v58 }
 0x239   : > { %1783 = vmatpush.msrb.mxu1 %v1098_v6  ;;  %v989_v6 = vsel %vm982_vm7, %v5365_v37, %v5518_v32 }
 0x23a   : > { %1635 = vmatmul.f32.gmra.mxu2 %v5771_v34  ;;  %v5827_v34 = vld [vmem:[%s9191_s4 + $0x1e8] sm:$0xff] }
 0x23b   : > { %1784 = vmatpush.msrb.mxu1 %v1096_v61  ;;  %1697 = vmatmul.f32.gmra.mxu3 %v5786_v58  ;;  %v1018_v61 = vmul.f32 %v1002_v23, %v989_v6  ;;  %v5816_v58 = vld [vmem:[%s9191_s4 + $0x208] sm:$0xff]  ;;  %9704 = vst [vmem:[#allocation54_spill] sm:$0xff] %v5827_v34  ;;  %v5832_v6 = vld [vmem:[%s9191_s4 + $0x150] sm:$0xff] }
 0x23c   : > { %1750 = vmatmul.f32.gmra.mxu0 %v5791_v26  ;;  %v5805_v22 = vpop.permute.xlu0 %1132  ;;  %9702 = vst [vmem:[#allocation55_spill] sm:$0xff] %v5816_v58  ;;  %v9703_v26 = vld [vmem:[#allocation14_spill] sm:$0xff] }
 0x23d   : > { %1785 = vmatpush.msrb.mxu1 %v1094_v59  ;;  %v987_v57 = vsel %vm982_vm7, %v9703_v26, %v5463_v42  ;;  %v5822_v59 = vpop.permute.xlu1 %1134  ;;  %9705 = vst [vmem:[#allocation46_spill] sm:$0xff] %v5832_v6 }
 0x23e   : > { %v1014_v42 = vmul.f32 %v1002_v23, %v987_v57 }
 0x23f   : > { %1786 = vmatpush.msrb.mxu1 %v1020_v13  ;;  %v1016_v13 = vmul.f32 %v1002_v23, %v988_v8  ;;  %v985_v8 = vsel %vm982_vm7, %v5311_v3, %v5317_v36  ;;  %v5874_v36 = vld [vmem:[%s9191_s4 + $0x178] sm:$0xff] }
 0x240   : > { %v1010_v57 = vmul.f32 %v1002_v23, %v985_v8  ;;  %v9708_v8 = vld [vmem:[#allocation63_spill] sm:$0xff] }
 0x241   : > { %1787 = vmatpush.msrb.mxu1 %v1018_v61  ;;  %v1012_v61 = vmul.f32 %v1002_v23, %v986_v51  ;;  %v5860_v51 = vpop.permute.xlu2 %1142 }
 0x242   : > { %1638 = vmatmul.f32.gmra.mxu2 %v5816_v58  ;;  %v984_v58 = vsel %vm982_vm7, %v9706_v33, %v5416_v14  ;;  %v9709_v14 = vld [vmem:[#allocation13_spill] sm:$0xff] }
 0x243   : > { %1788 = vmatpush.msrb.mxu1 %v1016_v13  ;;  %1700 = vmatmul.f32.gmra.mxu3 %v5827_v34  ;;  %v5854_v13 = vld [vmem:[%s9191_s4 + $0x230] sm:$0xff]  ;;  %v910_v33 = vsel %vm894_vm5, %v9709_v14, %v9708_v8 }
 0x244   : > { %1753 = vmatmul.f32.gmra.mxu0 %v5832_v6  ;;  %v9707_v34 = vld [vmem:[#allocation10_spill] sm:$0xff] }
 0x245   : > { %1789 = vmatpush.msrb.mxu1 %v1014_v42  ;;  %v5845_v26 = vpop.permute.xlu0 %1138  ;;  %v983_v42 = vsel %vm982_vm7, %v9707_v34, %v5418_v24  ;;  %v5865_v6 = vld [vmem:[%s9191_s4 + $0x210] sm:$0xff]  ;;  %v9710_v24 = vld [vmem:[#allocation23_spill] sm:$0xff]  ;;  %v1141_v3 = vpop.permute.xlu1 %1140 }
 0x246   : > { %v915_v34 = vperm.slane %v9710_v24, 1  ;;  %v1006_v38 = vmul.f32 %v1002_v23, %v983_v42 }
 0x247   : > { %1790 = vmatpush.msrb.mxu1 %v1012_v61  ;;  %v1008_v61 = vmul.f32 %v1002_v23, %v984_v58  ;;  %v5881_v58 = vld [vmem:[%s9191_s4 + $0x18] sm:$0xff]  ;;  %v908_v23 = vsel %vm894_vm5, %v5206_v50, %v9621_v31 }
 0x248   : > { %v933_v8 = vmul.f32 %v915_v34, %v910_v33  ;;  %v5903_v33 = vld [vmem:[%s9191_s4 + $0x258] sm:$0xff]  ;;  %v929_v31 = vmul.f32 %v915_v34, %v908_v23 }
 0x249   : > { %1791 = vmatpush.msrb.mxu1 %v1010_v57  ;;  %v9711_v57 = vld [vmem:[#allocation64_spill] sm:$0xff]  ;;  %v5908_v50 = vld [vmem:[%s9191_s4 + $0x238] sm:$0xff] }
 0x24a   : > { %1641 = vmatmul.f32.gmra.mxu2 %v5854_v13  ;;  %v909_v14 = vsel %vm894_vm5, %v9712_v53, %v9711_v57  ;;  %v907_v53 = vsel %vm894_vm5, %v5208_v11, %v9623_v28  ;;  %v5917_v11 = vld [vmem:[%s9191_s4 + $0x1a0] sm:$0xff]  ;;  %v5919_v28 = vpop.permute.xlu2 %1148 }
 0x24b   : > { %1792 = vmatpush.msrb.mxu1 %v1008_v61  ;;  %1703 = vmatmul.f32.gmra.mxu3 %v5865_v6  ;;  %v931_v42 = vmul.f32 %v915_v34, %v909_v14  ;;  %v927_v61 = vmul.f32 %v915_v34, %v907_v53  ;;  %v5925_v57 = vld [vmem:[%s9191_s4 + $0x40] sm:$0xff] }
 0x24c   : > { %1756 = vmatmul.f32.gmra.mxu0 %v5874_v36 }
 0x24d   : > { %1793 = vmatpush.msrb.mxu1 %v1006_v38  ;;  %v906_v38 = vsel %vm894_vm5, %v5064_v5, %v9632_v45  ;;  %v905_v5 = vsel %vm894_vm5, %v5163_v20, %v9636_v49  ;;  %v5932_v45 = vpop.permute.xlu1 %1146  ;;  %v903_v20 = vsel %vm894_vm5, %v9639_v27, %v9640_v56  ;;  %v5947_v49 = vld [vmem:[%s9191_s4 + $0x260] sm:$0xff]  ;;  %v4414_v27 = vld [vmem:[%s9187_s0 + $0x10] ss:$8 sm:$0x3] }
 0x24e   : > { %1794 = vmatmul.f32.vlgmr.msrb.gmra.mxu1 %v5881_v58  ;;  %v5894_v24 = vpop.permute.xlu0 %1144  ;;  %v925_v14 = vmul.f32 %v915_v34, %v906_v38 }
 0x24f   : > { %2038 = vmatpush.msra.mxu1 %v933_v8  ;;  %v904_v8 = vsel %vm894_vm5, %v5165_v0, %v9637_v47  ;;  %v5952_v0 = vld [vmem:[%s9191_s4 + $0x1c8] sm:$0xff]  ;;  %v919_v47 = vmul.f32 %v915_v34, %v903_v20 }
 0x250   : > { %v921_v53 = vmul.f32 %v915_v34, %v904_v8  ;;  %9713 = vst [vmem:[#allocation50_spill] sm:$0xff] %v5952_v0 }
 0x251   : > { %2039 = vmatpush.msra.mxu1 %v931_v42  ;;  %v923_v42 = vmul.f32 %v915_v34, %v905_v5 }
 0x252   : > { %1644 = vmatmul.f32.gmra.mxu2 %v5903_v33  ;;  %v1155_v56 = vpop.permute.xlu2 %1154 }
 0x253   : > { %2040 = vmatpush.msra.mxu1 %v929_v31  ;;  %1706 = vmatmul.f32.gmra.mxu3 %v5908_v50  ;;  %v5957_v31 = vld [vmem:[%s9191_s4 + $0x68] sm:$0xff]  ;;  %v1165_v20 = vsel %vm1158_vm8, %v5845_v26, %v1155_v56 }
 0x254   : > { %1759 = vmatmul.f32.gmra.mxu0 %v5917_v11 }
 0x255   : > { %2041 = vmatpush.msra.mxu1 %v927_v61  ;;  %v1153_v34 = vpop.permute.xlu1 %1152  ;;  %v5968_v61 = vperm.slane %v4414_v27, 1 }
 0x256   : > { %1797 = vmatmul.f32.gmra.mxu1 %v5925_v57  ;;  %v1151_v23 = vpop.permute.xlu0 %1150 }
 0x257   : > { %2042 = vmatpush.msra.mxu1 %v925_v14  ;;  %v5971_v14 = vperm.slane %v4414_v27, 0  ;;  %v5989_v27 = vld [vmem:[%s9191_s4 + $0x1f0] sm:$0xff] }
 0x259   : > { %2043 = vmatpush.msra.mxu1 %v923_v42 }
 0x25b   : > { %2044 = vmatpush.msra.mxu1 %v921_v53  ;;  %1709 = vmatmul.f32.gmra.mxu3 %v5947_v49  ;;  %v1173_v53 = vsel %vm1158_vm8, %v1155_v56, %v5845_v26  ;;  %v1194_v26 = vmul.f32 %v5971_v14, %v1165_v20  ;;  %v9715_v56 = vld [vmem:[#allocation16_spill] sm:$0xff] }
 0x25c   : > { %1762 = vmatmul.f32.gmra.mxu0 %v5952_v0  ;;  %v5964_v38 = vpop.f32.mrf.mxu2  ;;  %v1163_v0 = vsel %vm1158_vm8, %v5822_v59, %v1151_v23 }
 0x25d   : > { %2045 = vmatpush.msra.mxu1 %v919_v47 }
 0x25e   : > { %1800 = vmatmul.f32.gmra.mxu1 %v5957_v31  ;;  %v1157_v5 = vpop.permute.xlu0 %1156 }
 0x25f   : > { %2046 = vmatpush.msra.mxu1 %v4834_v46  ;;  %v1174_v8 = vsel %vm1158_vm8, %v1157_v5, %v1141_v3  ;;  %v1166_v42 = vsel %vm1158_vm8, %v1141_v3, %v1157_v5  ;;  %v1164_v3 = vsel %vm1158_vm8, %v5811_v44, %v1153_v34  ;;  %v1172_v5 = vsel %vm1158_vm8, %v1153_v34, %v5811_v44 }
 0x260   : > { %v1197_v47 = vmul.f32 %v5968_v61, %v1174_v8  ;;  %v1196_v46 = vmul.f32 %v5971_v14, %v1166_v42  ;;  %v1195_v8 = vmul.f32 %v5968_v61, %v1173_v53  ;;  %v6004_v42 = vld [vmem:[%s9191_s4 + $0x90] sm:$0xff]  ;;  %v1171_v44 = vsel %vm1158_vm8, %v1151_v23, %v5822_v59  ;;  %v9716_v53 = vld [vmem:[#allocation11_spill] sm:$0xff] }
 0x261   : > { %2047 = vmatpush.msra.mxu1 %v9638_v10  ;;  %v9714_v10 = vld [vmem:[#allocation30_spill] sm:$0xff]  ;;  %v1192_v20 = vmul.f32 %v5971_v14, %v1164_v3  ;;  %v1190_v59 = vmul.f32 %v5971_v14, %v1163_v0  ;;  %v1170_v23 = vsel %vm1158_vm8, %v5919_v28, %v5805_v22  ;;  %v9717_v3 = vld [vmem:[#allocation9_spill] sm:$0xff]  ;;  %v1169_v0 = vsel %vm1158_vm8, %v5932_v45, %v5757_v4 }
 0x262   : > { %1851 = vmatpush.msrb.mxu2 %v1196_v46  ;;  %2176 = vmatpush.msra.mxu3 %v1197_v47  ;;  %v1193_v47 = vmul.f32 %v5968_v61, %v1172_v5  ;;  %v1162_v46 = vsel %vm1158_vm8, %v5805_v22, %v5919_v28  ;;  %v1191_v5 = vmul.f32 %v5968_v61, %v1171_v44  ;;  %v6042_v22 = vld [vmem:[%s9191_s4 + $0x218] sm:$0xff]  ;;  %v9718_v28 = vld [vmem:[#allocation8_spill] sm:$0xff] }
 0x263   : > { %1924 = vmatmul.f32.vlgmr.msrb.gmra.mxu3 %v9714_v10  ;;  %2048 = vmatpush.msra.mxu1 %v9715_v56  ;;  %v1161_v10 = vsel %vm1158_vm8, %v5757_v4, %v5932_v45  ;;  %v1189_v56 = vmul.f32 %v5968_v61, %v1170_v23  ;;  %v1168_v4 = vsel %vm1158_vm8, %v5894_v24, %v5766_v54  ;;  %v9719_v45 = vld [vmem:[#allocation44_spill] sm:$0xff]  ;;  %v9720_v44 = vld [vmem:[#allocation7_spill] sm:$0xff] }
 0x264   : > { %1765 = vmatmul.f32.gmra.mxu0 %v5989_v27  ;;  %v6013_v34 = vpop.f32.mrf.mxu2  ;;  %1852 = vmatpush.msrb.mxu2 %v1194_v26  ;;  %v1188_v26 = vmul.f32 %v5971_v14, %v1162_v46  ;;  %v1187_v46 = vmul.f32 %v5968_v61, %v1169_v0  ;;  %v1083_v0 = vsel %vm1070_vm6, %v5619_v41, %v5617_v52  ;;  %v6128_v52 = vld [vmem:[%s9191_s4 + $0x48] sm:$0xff] }
 0x265   : > { %2177 = vmatpush.msra.mxu3 %v1195_v8  ;;  %2049 = vmatpush.msra.mxu1 %v9716_v53  ;;  %v1160_v8 = vsel %vm1158_vm8, %v5766_v54, %v5894_v24  ;;  %v6060_v53 = vld [vmem:[%s9191_s4 + $0xb8] sm:$0xff]  ;;  %v1159_v54 = vsel %vm1158_vm8, %v5760_v15, %v5860_v51  ;;  %v1167_v24 = vsel %vm1158_vm8, %v5860_v51, %v5760_v15  ;;  %v6087_v51 = vld [vmem:[%s9191_s4 + $0x20] sm:$0xff] }
 0x266   : > { %1853 = vmatpush.msrb.mxu2 %v1192_v20  ;;  %1803 = vmatmul.f32.gmra.mxu1 %v6004_v42  ;;  %v1186_v20 = vmul.f32 %v5971_v14, %v1161_v10  ;;  %v1184_v23 = vmul.f32 %v5971_v14, %v1160_v8  ;;  %v1182_v15 = vmul.f32 %v5971_v14, %v1159_v54 }
 0x267   : > { %2178 = vmatpush.msra.mxu3 %v1193_v47  ;;  %2050 = vmatpush.msra.mxu1 %v9717_v3  ;;  %v1086_v3 = vsel %vm1070_vm6, %v5665_v1, %v5662_v63  ;;  %v1085_v1 = vsel %vm1070_vm6, %v5716_v25, %v5520_v55  ;;  %v1183_v63 = vmul.f32 %v5968_v61, %v1167_v24  ;;  %v9722_v55 = vld [vmem:[#allocation59_spill] sm:$0xff] }
 0x268   : > { %1854 = vmatpush.msrb.mxu2 %v1190_v59  ;;  %v9721_v59 = vld [vmem:[#allocation5_spill] sm:$0xff]  ;;  %v1084_v14 = vsel %vm1070_vm6, %v5718_v48, %v5615_v43  ;;  %v1081_v41 = vsel %vm1070_vm6, %v5696_v2, %v5565_v16  ;;  %v1079_v2 = vsel %vm1070_vm6, %v5660_v12, %v5424_v39  ;;  %v6167_v39 = vld [vmem:[%s9191_s4 + $0x70] sm:$0xff]  ;;  %v997_v12 = vsel %vm982_vm7, %v5518_v32, %v5365_v37  ;;  %v9725_v24 = vld [vmem:[#allocation35_spill] sm:$0xff] }
 0x269   : > { %2179 = vmatpush.msra.mxu3 %v1191_v5  ;;  %2051 = vmatpush.msra.mxu1 %v9718_v28  ;;  %v1185_v5 = vmul.f32 %v5968_v61, %v1168_v4  ;;  %v6109_v61 = vld [vmem:[%s9191_s4 + $0xe0] sm:$0xff]  ;;  %v1082_v28 = vsel %vm1070_vm6, %v5694_v18, %v5467_v62  ;;  %v6137_v62 = vld [vmem:[%s9191_s4 + $0x268] sm:$0xff]  ;;  %v1080_v4 = vsel %vm1070_vm6, %v5569_v7, %v5567_v60  ;;  %v1003_v7 = vperm.slane %v5780_v21, 1  ;;  %v9723_v21 = vld [vmem:[#allocation42_spill] sm:$0xff] }
 0x26a   : > { %1855 = vmatpush.msrb.mxu2 %v1188_v26  ;;  %v1091_v26 = vperm.slane %v5652_v9, 1  ;;  %v6097_v9 = vld [vmem:[%s9191_s4 + $0x240] sm:$0xff]  ;;  %v6149_v16 = vld [vmem:[%s9191_s4 + $0x108] sm:$0xff]  ;;  %v6185_v37 = vld [vmem:[%s9191_s4 + $0x130] sm:$0xff] }
 0x26b   : > { %1927 = vmatmul.f32.gmra.mxu3 %v9719_v45  ;;  %2052 = vmatpush.msra.mxu1 %v9720_v44  ;;  %v1019_v54 = vmul.f32 %v1003_v7, %v997_v12  ;;  %v9724_v32 = vld [vmem:[#allocation14_spill] sm:$0xff]  ;;  %v6231_v12 = vld [vmem:[%s9191_s4 + $0xc0] sm:$0xff] }
 0x26c   : > { %1768 = vmatmul.f32.gmra.mxu0 %v6042_v22  ;;  %2180 = vmatpush.msra.mxu3 %v1189_v56  ;;  %v6063_v47 = vpop.f32.mrf.mxu2  ;;  %v1109_v10 = vmul.f32 %v1091_v26, %v1086_v3  ;;  %v1107_v25 = vmul.f32 %v1091_v26, %v1085_v1  ;;  %v1105_v48 = vmul.f32 %v1091_v26, %v1084_v14  ;;  %v6122_v56 = vpop.f32.mrf.mxu3  ;;  %v9728_v3 = vld [vmem:[#allocation29_spill] sm:$0xff] }
 0x26d   : > { %1856 = vmatpush.msrb.mxu2 %v1186_v20  ;;  %2053 = vmatpush.msra.mxu1 %v9721_v59  ;;  %v1103_v8 = vmul.f32 %v1091_v26, %v1083_v0  ;;  %v1101_v18 = vmul.f32 %v1091_v26, %v1082_v28  ;;  %v1099_v45 = vmul.f32 %v1091_v26, %v1081_v41  ;;  %v9729_v1 = vld [vmem:[#allocation17_spill] sm:$0xff]  ;;  %v9732_v0 = vld [vmem:[#allocation47_spill] sm:$0xff] }
 0x26e   : > { %2181 = vmatpush.msra.mxu3 %v1187_v46  ;;  %1806 = vmatmul.f32.gmra.mxu1 %v6060_v53  ;;  %v1097_v60 = vmul.f32 %v1091_v26, %v1080_v4  ;;  %v1095_v20 = vmul.f32 %v1091_v26, %v1079_v2  ;;  %v995_v59 = vsel %vm982_vm7, %v9725_v24, %v9724_v32  ;;  %v9734_v4 = vld [vmem:[#allocation10_spill] sm:$0xff]  ;;  %v6250_v32 = vld [vmem:[%s9191_s4 + $0xe8] sm:$0xff] }
 0x26f   : > { %1857 = vmatpush.msrb.mxu2 %v1184_v23  ;;  %v9726_v23 = vld [vmem:[#allocation37_spill] sm:$0xff]  ;;  %v1015_v26 = vmul.f32 %v1003_v7, %v995_v59 }
 0x270   : > { %2182 = vmatpush.msra.mxu3 %v1185_v5  ;;  %v9739_v24 = vld [vmem:[#allocation57_spill] sm:$0xff] }
 0x271   : > { %1858 = vmatpush.msrb.mxu2 %v1182_v15  ;;  %v6200_v15 = vld [vmem:[%s9191_s4 + $0x98] sm:$0xff]  ;;  %v6258_v59 = vld [vmem:[%s9191_s4 + $0x1a8] sm:$0xff] }
 0x272   : > { %2183 = vmatpush.msra.mxu3 %v1183_v63  ;;  %4415 = vmatmul.msk.f32.vlgmr.msrb.gmra.mxu2 %vm1534_vm9, %v6087_v51  ;;  %v9730_v63 = vld [vmem:[#allocation18_spill] sm:$0xff] }
 0x273   : > { %1930 = vmatmul.f32.gmra.mxu3 %v9722_v55  ;;  %2103 = vmatpush.msra.mxu2 %v1109_v10  ;;  %v993_v10 = vsel %vm982_vm7, %v9730_v63, %v9729_v1  ;;  %v9743_v1 = vld [vmem:[#allocation24_spill] sm:$0xff] }
 0x274   : > { %1771 = vmatmul.f32.gmra.mxu0 %v6097_v9  ;;  %v6173_v46 = vpop.f32.mrf.mxu3  ;;  %v1011_v41 = vmul.f32 %v1003_v7, %v993_v10  ;;  %v6286_v10 = vld [vmem:[%s9191_s4 + $0x138] sm:$0xff] }
 0x275   : > { %2104 = vmatpush.msra.mxu2 %v1107_v25  ;;  %v6116_v43 = vpop.f32.mrf.mxu2  ;;  %v9731_v25 = vld [vmem:[#allocation67_spill] sm:$0xff] }
 0x276   : > { %1809 = vmatmul.f32.gmra.mxu1 %v6109_v61 }
 0x277   : > { %2105 = vmatpush.msra.mxu2 %v1105_v48  ;;  %v992_v48 = vsel %vm982_vm7, %v9732_v0, %v9731_v25  ;;  %v9745_v25 = vld [vmem:[#allocation48_spill] sm:$0xff]  ;;  %v6296_v0 = vld [vmem:[%s9191_s4 + $0x1f8] sm:$0xff] }
 0x279   : > { %2106 = vmatpush.msra.mxu2 %v1103_v8  ;;  %v9733_v8 = vld [vmem:[#allocation27_spill] sm:$0xff] }
 0x27a   : > { %4416 = vmatmul.msk.f32.gmra.mxu2 %vm1534_vm9, %v6128_v52 }
 0x27b   : > { %1933 = vmatmul.f32.gmra.mxu3 %v5388_v30  ;;  %2107 = vmatpush.msra.mxu2 %v1101_v18  ;;  %v998_v30 = vsel %vm982_vm7, %v5516_v17, %v9701_v35  ;;  %v996_v35 = vsel %vm982_vm7, %v5378_v40, %v5367_v19  ;;  %v9727_v19 = vld [vmem:[#allocation25_spill] sm:$0xff]  ;;  %v6220_v18 = vld [vmem:[%s9191_s4 + $0x158] sm:$0xff] }
 0x27c   : > { %1774 = vmatmul.f32.gmra.mxu0 %v6137_v62  ;;  %v1021_v17 = vmul.f32 %v1003_v7, %v998_v30  ;;  %v1017_v40 = vmul.f32 %v1003_v7, %v996_v35  ;;  %v994_v5 = vsel %vm982_vm7, %v9728_v3, %v9727_v19  ;;  %v6212_v28 = vpop.f32.mrf.mxu3  ;;  %v1009_v30 = vmul.f32 %v1003_v7, %v992_v48  ;;  %v9737_v35 = vld [vmem:[#allocation21_spill] sm:$0xff]  ;;  %v6269_v3 = vld [vmem:[%s9191_s4 + $0x110] sm:$0xff] }
 0x27d   : > { %2108 = vmatpush.msra.mxu2 %v1099_v45  ;;  %v6162_v44 = vpop.f32.mrf.mxu2  ;;  %v1013_v55 = vmul.f32 %v1003_v7, %v994_v5  ;;  %v9735_v45 = vld [vmem:[#allocation45_spill] sm:$0xff]  ;;  %v9742_v5 = vld [vmem:[#allocation52_spill] sm:$0xff] }
 0x27e   : > { %1812 = vmatmul.f32.gmra.mxu1 %v6149_v16  ;;  %v991_v2 = vsel %vm982_vm7, %v9735_v45, %v9734_v4  ;;  %v9746_v48 = vld [vmem:[#allocation61_spill] sm:$0xff] }
 0x27f   : > { %2109 = vmatpush.msra.mxu2 %v1097_v60  ;;  %v9736_v60 = vld [vmem:[#allocation49_spill] sm:$0xff] }
 0x280   : > { %v9748_v45 = vld [vmem:[#allocation33_spill] sm:$0xff] }
 0x281   : > { %2110 = vmatpush.msra.mxu2 %v1095_v20  ;;  %v1007_v20 = vmul.f32 %v1003_v7, %v991_v2  ;;  %v9738_v7 = vld [vmem:[#allocation43_spill] sm:$0xff]  ;;  %v6315_v2 = vld [vmem:[%s9191_s4 + $0x220] sm:$0xff] }
 0x282   : > { %4417 = vmatmul.msk.f32.gmra.mxu2 %vm1534_vm9, %v6167_v39  ;;  %9749 = vst [vmem:[#allocation31_spill] sm:$0xff] %v6315_v2 }
 0x283   : > { %1936 = vmatmul.f32.gmra.mxu3 %v9723_v21  ;;  %2111 = vmatpush.msra.mxu2 %v1021_v17  ;;  %v6241_v21 = vld [vmem:[%s9191_s4 + $0x180] sm:$0xff] }
 0x284   : > { %1989 = vmatmul.f32.vlgmr.msra.gmra.mxu0 %v9726_v23  ;;  %v9740_v23 = vld [vmem:[#allocation40_spill] sm:$0xff] }
 0x285   : > { %2112 = vmatpush.msra.mxu2 %v1019_v54  ;;  %v6206_v14 = vpop.f32.mrf.mxu2  ;;  %v6243_v54 = vpop.f32.mrf.mxu3 }
 0x286   : > { %1815 = vmatmul.f32.gmra.mxu1 %v6185_v37 }
 0x287   : > { %2113 = vmatpush.msra.mxu2 %v1017_v40 }
 0x289   : > { %2114 = vmatpush.msra.mxu2 %v1015_v26  ;;  %v6277_v26 = vld [vmem:[%s9191_s4 + $0x1d0] sm:$0xff] }
 0x28a   : > { %4418 = vmatmul.msk.f32.gmra.mxu2 %vm1534_vm9, %v6200_v15 }
 0x28b   : > { %1939 = vmatmul.f32.gmra.mxu3 %v9733_v8  ;;  %2115 = vmatpush.msra.mxu2 %v1013_v55  ;;  %v6303_v8 = vld [vmem:[%s9191_s4 + $0x160] sm:$0xff] }
 0x28c   : > { %1992 = vmatmul.f32.gmra.mxu0 %v9736_v60  ;;  %v9750_v60 = vld [vmem:[#allocation53_spill] sm:$0xff] }
 0x28d   : > { %2116 = vmatpush.msra.mxu2 %v1011_v41  ;;  %v6235_v17 = vpop.f32.mrf.mxu2  ;;  %v6263_v19 = vpop.f32.mrf.mxu3 }
 0x28e   : > { %1818 = vmatmul.f32.gmra.mxu1 %v6220_v18 }
 0x28f   : > { %2117 = vmatpush.msra.mxu2 %v1009_v30  ;;  %v1730_v30 = vpop.f32.mrf.mxu0 }
 0x291   : > { %2118 = vmatpush.msra.mxu2 %v1007_v20  ;;  %v6322_v20 = vld [vmem:[%s9191_s4 + $0x188] sm:$0xff] }
 0x292   : > { %4419 = vmatmul.msk.f32.gmra.mxu2 %vm1534_vm9, %v6231_v12 }
 0x293   : > { %1942 = vmatmul.f32.gmra.mxu3 %v9737_v35 }
 0x294   : > { %1995 = vmatmul.f32.gmra.mxu0 %v9738_v7  ;;  %v9752_v7 = vld [vmem:[#allocation28_spill] sm:$0xff] }
 0x295   : > { %v6261_v40 = vpop.f32.mrf.mxu2  ;;  %v6288_v55 = vpop.f32.mrf.mxu3 }
 0x296   : > { %1821 = vmatmul.f32.gmra.mxu1 %v6241_v21  ;;  %9741 = vst [vmem:[#allocation38_spill] sm:$0xff] %v6261_v40 }
 0x29a   : > { %4420 = vmatmul.msk.f32.gmra.mxu2 %vm1534_vm9, %v6250_v32 }
 0x29b   : > { %1945 = vmatmul.f32.gmra.mxu3 %v9739_v24  ;;  %v6332_v24 = vld [vmem:[%s9191_s4 + $0x248] sm:$0xff] }
 0x29c   : > { %1998 = vmatmul.f32.gmra.mxu0 %v9740_v23  ;;  %9753 = vst [vmem:[#allocation15_spill] sm:$0xff] %v6332_v24 }
 0x29d   : > { %v6281_v63 = vpop.f32.mrf.mxu2  ;;  %v6307_v4 = vpop.f32.mrf.mxu3 }
 0x29e   : > { %1824 = vmatmul.f32.gmra.mxu1 %v6258_v59  ;;  %9744 = vst [vmem:[#allocation36_spill] sm:$0xff] %v6281_v63 }
 0x2a2   : > { %4421 = vmatmul.msk.f32.gmra.mxu2 %vm1534_vm9, %v6269_v3 }
 0x2a3   : > { %1948 = vmatmul.f32.gmra.mxu3 %v9742_v5  ;;  %v9755_v5 = vld [vmem:[#allocation51_spill] sm:$0xff] }
 0x2a4   : > { %2001 = vmatmul.f32.gmra.mxu0 %v9743_v1  ;;  %v6341_v1 = vld [vmem:[%s9191_s4 + $0x1b0] sm:$0xff] }
 0x2a5   : > { %v6305_v41 = vpop.f32.mrf.mxu2  ;;  %v6334_v23 = vpop.f32.mrf.mxu3 }
 0x2a6   : > { %1827 = vmatmul.f32.gmra.mxu1 %v6277_v26  ;;  %9747 = vst [vmem:[#allocation26_spill] sm:$0xff] %v6305_v41  ;;  %v9762_v41 = vld [vmem:[#allocation32_spill] sm:$0xff] }
 0x2a7   : > { %9754 = vst [vmem:[#allocation63_spill] sm:$0xff] %v6334_v23 }
 0x2aa   : > { %4422 = vmatmul.msk.f32.gmra.mxu2 %vm1534_vm9, %v6286_v10 }
 0x2ab   : > { %1951 = vmatmul.f32.gmra.mxu3 %v9745_v25  ;;  %v6343_v25 = vpop.f32.mrf.mxu0 }
 0x2ac   : > { %2004 = vmatmul.f32.gmra.mxu0 %v9746_v48  ;;  %v9756_v48 = vld [vmem:[#allocation62_spill] sm:$0xff] }
 0x2ad   : > { %v6326_v35 = vpop.f32.mrf.mxu2 }
 0x2ae   : > { %1830 = vmatmul.f32.gmra.mxu1 %v6296_v0  ;;  %9751 = vst [vmem:[#allocation19_spill] sm:$0xff] %v6326_v35 }
 0x2b2   : > { %4423 = vmatmul.msk.f32.gmra.mxu2 %vm1534_vm9, %v6303_v8 }
 0x2b3   : > { %1954 = vmatmul.f32.gmra.mxu3 %v9748_v45  ;;  %v6351_v45 = vld [vmem:[%s9191_s4 + $0x270] sm:$0xff]  ;;  %v6364_v35 = vpop.f32.mrf.mxu0 }
 0x2b4   : > { %2007 = vmatmul.f32.gmra.mxu0 %v9750_v60  ;;  %9757 = vst [vmem:[#allocation13_spill] sm:$0xff] %v6351_v45  ;;  %v9758_v60 = vld [vmem:[#allocation39_spill] sm:$0xff] }
 0x2b6   : > { %1833 = vmatmul.f32.gmra.mxu1 %v6315_v2 }
 0x2ba   : > { %4424 = vmatmul.msk.f32.gmra.mxu2 %vm1534_vm9, %v6322_v20 }
 0x2bb   : > { %1957 = vmatmul.f32.gmra.mxu3 %v9752_v7  ;;  %v6354_v7 = vpop.f32.mrf.mxu2  ;;  %v6383_v63 = vpop.f32.mrf.mxu0 }
 0x2bc   : > { %2010 = vmatmul.f32.gmra.mxu0 %v9755_v5  ;;  %9759 = vst [vmem:[#allocation23_spill] sm:$0xff] %v6354_v7  ;;  %v6356_v5 = vpop.f32.mrf.mxu3 }
 0x2bd   : > { %9760 = vst [vmem:[#allocation64_spill] sm:$0xff] %v6356_v5 }
 0x2be   : > { %1836 = vmatmul.f32.gmra.mxu1 %v6332_v24 }
 0x2c2   : > { %4425 = vmatmul.msk.f32.gmra.mxu2 %vm1534_vm9, %v6341_v1 }
 0x2c3   : > { %1960 = vmatmul.f32.gmra.mxu3 %v9756_v48  ;;  %v9761_v48 = vld [vmem:[#allocation55_spill] sm:$0xff]  ;;  %v6371_v7 = vpop.f32.mrf.mxu2 }
 0x2c4   : > { %2013 = vmatmul.f32.gmra.mxu0 %v9758_v60  ;;  %v9763_v60 = vld [vmem:[#allocation60_spill] sm:$0xff]  ;;  %9764 = vst [vmem:[#allocation65_spill] sm:$0xff] %v6371_v7  ;;  %v6378_v5 = vpop.f32.mrf.mxu3 }
 0x2c5   : > { %9765 = vst [vmem:[#allocation30_spill] sm:$0xff] %v6378_v5  ;;  %v6400_v5 = vpop.f32.mrf.mxu0 }
 0x2c6   : > { %1839 = vmatmul.f32.gmra.mxu1 %v6351_v45  ;;  %v6376_v45 = vld [vmem:[%s9191_s4 + $0x200] sm:$0xff] }
 0x2ca   : > { %4426 = vmatmul.msk.f32.gmra.mxu2 %vm1534_vm9, %v6362_v29 }
 0x2cb   : > { %1963 = vmatmul.f32.gmra.mxu3 %v9761_v48  ;;  %v9766_v48 = vld [vmem:[#allocation20_spill] sm:$0xff]  ;;  %v6392_v7 = vpop.f32.mrf.mxu2  ;;  %v1795_v2 = vpop.f32.mrf.mxu1 }
 0x2cc   : > { %2016 = vmatmul.f32.gmra.mxu0 %v9762_v41  ;;  %v9767_v41 = vld [vmem:[#allocation6_spill] sm:$0xff]  ;;  %9768 = vst [vmem:[#allocation16_spill] sm:$0xff] %v6392_v7  ;;  %v6394_v24 = vpop.f32.mrf.mxu3 }
 0x2cd   : > { %9769 = vst [vmem:[#allocation11_spill] sm:$0xff] %v6394_v24  ;;  %v9776_v24 = vld [vmem:[#allocation41_spill] sm:$0xff]  ;;  %v6423_v23 = vpop.f32.mrf.mxu0 }
 0x2ce   : > { %2054 = vmatmul.f32.vlgmr.msra.gmra.mxu1 %v9763_v60  ;;  %v6390_v60 = vld [vmem:[%s9191_s4 + $0x228] sm:$0xff] }
 0x2d2   : > { %4427 = vmatmul.msk.f32.gmra.mxu2 %vm1534_vm9, %v6376_v45 }
 0x2d3   : > { %1966 = vmatmul.f32.gmra.mxu3 %v5854_v13  ;;  %v9770_v13 = vld [vmem:[#allocation56_spill] sm:$0xff]  ;;  %v6410_v7 = vpop.f32.mrf.mxu2 }
 0x2d4   : > { %2019 = vmatmul.f32.gmra.mxu0 %v9766_v48  ;;  %v9771_v48 = vld [vmem:[#allocation4_spill] sm:$0xff]  ;;  %9773 = vst [vmem:[#allocation8_spill] sm:$0xff] %v6410_v7  ;;  %v6427_v7 = vpop.permute.xlu1 %1456 }
 0x2d5   : > { %9778 = vst [vmem:[#allocation5_spill] sm:$0xff] %v6427_v7 }
 0x2d6   : > { %2057 = vmatmul.f32.gmra.mxu1 %v9767_v41  ;;  %v6406_v41 = vld [vmem:[%s9191_s4 + $0x250] sm:$0xff] }
 0x2d7   : > { %9772 = vst [vmem:[#allocation9_spill] sm:$0xff] %v6406_v41 }
 0x2da   : > { %4428 = vmatmul.msk.f32.gmra.mxu2 %vm1534_vm9, %v6390_v60 }
 0x2db   : > { %1969 = vmatmul.f32.gmra.mxu3 %v5903_v33  ;;  %v6414_v33 = vpop.f32.mrf.mxu3 }
 0x2dc   : > { %2022 = vmatmul.f32.gmra.mxu0 %v9770_v13  ;;  %9774 = vst [vmem:[#allocation44_spill] sm:$0xff] %v6414_v33  ;;  %v9775_v13 = vld [vmem:[#allocation54_spill] sm:$0xff] }
 0x2dd   : > { %v9780_v33 = vld [vmem:[#allocation34_spill] sm:$0xff] }
 0x2de   : > { %2060 = vmatmul.f32.gmra.mxu1 %v9771_v48  ;;  %v6421_v48 = vld [vmem:[%s9191_s4 + $0x278] sm:$0xff] }
 0x2df   : > { %9777 = vst [vmem:[#allocation7_spill] sm:$0xff] %v6421_v48 }
 0x2e2   : > { %4429 = vmatmul.msk.f32.gmra.mxu2 %vm1534_vm9, %v6406_v41  ;;  %v6440_v41 = vpop.f32.mrf.mxu0 }
 0x2e3   : > { %4431 = vmatmul.msk.f32.vlgmr.msra.gmra.mxu3 %vm1534_vm9, %v6087_v51  ;;  %v6432_v51 = vpop.f32.mrf.mxu2 }
 0x2e4   : > { %2025 = vmatmul.f32.gmra.mxu0 %v9775_v13  ;;  %9779 = vst [vmem:[#allocation59_spill] sm:$0xff] %v6432_v51  ;;  %v6436_v13 = vpop.f32.mrf.mxu3 }
 0x2e6   : > { %2063 = vmatmul.f32.gmra.mxu1 %v9776_v24  ;;  %v1601_v24 = vadd.f32 %v5964_v38, %v6427_v7  ;;  %v9781_v7 = vld [vmem:[#allocation22_spill] sm:$0xff] }
 0x2e8   : > { %v1666_v40 = vadd.f32 %v6122_v56, %v1601_v24 }
 0x2ea   : > { %4430 = vmatmul.msk.f32.gmra.mxu2 %vm1534_vm9, %v6421_v48  ;;  %v1731_v48 = vadd.f32 %v1730_v30, %v1666_v40  ;;  %v6462_v56 = vpop.f32.mrf.mxu0  ;;  %v1798_v40 = vpop.f32.mrf.mxu1 }
 0x2eb   : > { %4432 = vmatmul.msk.f32.gmra.mxu3 %vm1534_vm9, %v6128_v52 }
 0x2ec   : > { %2028 = vmatmul.f32.gmra.mxu0 %v5865_v6  ;;  %v1796_v6 = vadd.f32 %v1795_v2, %v1731_v48  ;;  %v6447_v51 = vpop.f32.mrf.mxu3 }
 0x2ee   : > { %2066 = vmatmul.f32.gmra.mxu1 %v9780_v33 }
 0x2f2   : > { %2119 = vmatmul.f32.vlgmr.msra.gmra.mxu2 %v5881_v58  ;;  %v6454_v58 = vpop.permute.xlu2 %1461  ;;  %v1801_v24 = vpop.f32.mrf.mxu1 }
 0x2f3   : > { %4433 = vmatmul.msk.f32.gmra.mxu3 %vm1534_vm9, %v6167_v39  ;;  %v9783_v39 = vld [vmem:[#allocation12_spill] sm:$0xff] }
 0x2f4   : > { %2031 = vmatmul.f32.gmra.mxu0 %v5908_v50  ;;  %v1604_v50 = vadd.f32 %v6013_v34, %v6454_v58  ;;  %v9784_v34 = vld [vmem:[#allocation66_spill] sm:$0xff] }
 0x2f5   : > { %v1860_v52 = vpop.f32.mrf.mxu2 }
 0x2f6   : > { %v1861_v38 = vadd.f32 %v1860_v52, %v1796_v6  ;;  %2069 = vmatmul.f32.gmra.mxu1 %v9781_v7  ;;  %v6470_v7 = vpop.f32.mrf.mxu3 }
 0x2f8   : > { %v6449_v33 = vmax.f32 %v1861_v38, 0.0 }
 0x2fa   : > { %9782 = vst [vmem:[#allocation42_spill] sm:$0xff] %v6449_v33  ;;  %2122 = vmatmul.f32.gmra.mxu2 %v5925_v57  ;;  %2597 = vrot.lane.b32.xlu0 %v6449_v33, %s4501_s25  ;;  %v1669_v57 = vadd.f32 %v6173_v46, %v1604_v50 }
 0x2fb   : > { %2431 = vrot.lane.b32.xlu1 %v6449_v33, %s4500_s24  ;;  %2265 = vrot.lane.b32.xlu2 %v6449_v33, %s4499_s23 }
 0x2fc   : > { %2034 = vmatmul.f32.gmra.mxu0 %v5947_v49  ;;  %4434 = vmatmul.msk.f32.gmra.mxu3 %vm1534_vm9, %v6200_v15  ;;  %v1734_v2 = vadd.f32 %v6343_v25, %v1669_v57  ;;  %v9786_v25 = vld [vmem:[#allocation46_spill] sm:$0xff] }
 0x2fd   : > { %v1863_v30 = vpop.f32.mrf.mxu2 }
 0x2fe   : > { %2072 = vmatmul.f32.gmra.mxu1 %v9783_v39  ;;  %v1799_v48 = vadd.f32 %v1798_v40, %v1734_v2 }
 0x300   : > { %v1864_v49 = vadd.f32 %v1863_v30, %v1799_v48 }
 0x302   : > { %2125 = vmatmul.f32.gmra.mxu2 %v5957_v31  ;;  %3127 = vrot.lane.b32.xlu0 %v6449_v33, %s4504_s30  ;;  %v6482_v46 = vmax.f32 %v1864_v49, 0.0  ;;  %v6487_v31 = vpop.permute.xlu0 %1466 }
 0x303   : > { %2961 = vrot.lane.b32.xlu1 %v6449_v33, %s4503_s29  ;;  %2763 = vrot.lane.b32.xlu2 %v6449_v33, %s4502_s26  ;;  %v1607_v15 = vadd.f32 %v6063_v47, %v6487_v31 }
 0x304   : > { %4435 = vmatmul.msk.f32.gmra.mxu3 %vm1534_vm9, %v6231_v12  ;;  %9785 = vst [vmem:[#allocation14_spill] sm:$0xff] %v6482_v46  ;;  %v6495_v12 = vpop.f32.mrf.mxu3 }
 0x305   : > { %v1866_v52 = vpop.f32.mrf.mxu2 }
 0x306   : > { %2075 = vmatmul.f32.gmra.mxu1 %v9784_v34 }
 0x30a   : > { %2128 = vmatmul.f32.gmra.mxu2 %v6004_v42  ;;  %2267 = vrot.lane.b32.xlu0 %v6482_v46, %s4499_s23  ;;  %v1672_v42 = vadd.f32 %v6212_v28, %v1607_v15 }
 0x30b   : > { %2599 = vrot.lane.b32.xlu1 %v6482_v46, %s4501_s25  ;;  %2433 = vrot.lane.b32.xlu2 %v6482_v46, %s4500_s24 }
 0x30c   : > { %4436 = vmatmul.msk.f32.gmra.mxu3 %vm1534_vm9, %v6250_v32  ;;  %v1737_v6 = vadd.f32 %v6364_v35, %v1672_v42  ;;  %v6511_v28 = vpop.f32.mrf.mxu3 }
 0x30d   : > { %v1869_v57 = vpop.f32.mrf.mxu2 }
 0x30e   : > { %2078 = vmatmul.f32.gmra.mxu1 %v9786_v25  ;;  %v1802_v38 = vadd.f32 %v1801_v24, %v1737_v6 }
 0x310   : > { %v1867_v47 = vadd.f32 %v1866_v52, %v1802_v38 }
 0x312   : > { %2131 = vmatmul.f32.gmra.mxu2 %v6060_v53  ;;  %2765 = vrot.lane.b32.xlu0 %v6482_v46, %s4502_s26  ;;  %v6514_v32 = vmax.f32 %v1867_v47, 0.0  ;;  %v6519_v53 = vpop.permute.xlu1 %1471 }
 0x313   : > { %3129 = vrot.lane.b32.xlu1 %v6482_v46, %s4504_s30  ;;  %2963 = vrot.lane.b32.xlu2 %v6482_v46, %s4503_s29 }
 0x314   : > { %4437 = vmatmul.msk.f32.gmra.mxu3 %vm1534_vm9, %v6269_v3  ;;  %9787 = vst [vmem:[#allocation35_spill] sm:$0xff] %v6514_v32  ;;  %v1610_v3 = vadd.f32 %v6116_v43, %v6519_v53  ;;  %v6532_v50 = vpop.f32.mrf.mxu3 }
 0x315   : > { %v1872_v2 = vpop.f32.mrf.mxu2 }
 0x316   : > { %2081 = vmatmul.f32.gmra.mxu1 %v5874_v36  ;;  %v1675_v36 = vadd.f32 %v6243_v54, %v1610_v3 }
 0x318   : > { %v1740_v35 = vadd.f32 %v6383_v63, %v1675_v36  ;;  %v9796_v36 = vld [vmem:[#allocation38_spill] sm:$0xff] }
 0x31a   : > { %2134 = vmatmul.f32.gmra.mxu2 %v6109_v61  ;;  %2435 = vrot.lane.b32.xlu0 %v6514_v32, %s4500_s24  ;;  %v1804_v61 = vpop.f32.mrf.mxu1 }
 0x31b   : > { %2269 = vrot.lane.b32.xlu1 %v6514_v32, %s4499_s23  ;;  %2601 = vrot.lane.b32.xlu2 %v6514_v32, %s4501_s25  ;;  %v1805_v39 = vadd.f32 %v1804_v61, %v1740_v35 }
 0x31c   : > { %4438 = vmatmul.msk.f32.gmra.mxu3 %vm1534_vm9, %v6286_v10  ;;  %v6546_v10 = vpop.f32.mrf.mxu3 }
 0x31d   : > { %v1870_v43 = vadd.f32 %v1869_v57, %v1805_v39  ;;  %v1875_v34 = vpop.f32.mrf.mxu2  ;;  %v9797_v57 = vld [vmem:[#allocation7_spill] sm:$0xff] }
 0x31e   : > { %2084 = vmatmul.f32.gmra.mxu1 %v5917_v11  ;;  %v9788_v11 = vld [vmem:[#allocation50_spill] sm:$0xff] }
 0x31f   : > { %v6544_v63 = vmax.f32 %v1870_v43, 0.0  ;;  %v9799_v43 = vld [vmem:[#allocation63_spill] sm:$0xff] }
 0x321   : > { %9789 = vst [vmem:[#allocation37_spill] sm:$0xff] %v6544_v63 }
 0x322   : > { %2137 = vmatmul.f32.gmra.mxu2 %v6149_v16  ;;  %2965 = vrot.lane.b32.xlu0 %v6514_v32, %s4503_s29  ;;  %v1807_v54 = vpop.f32.mrf.mxu1  ;;  %v6551_v16 = vpop.permute.xlu2 %1476 }
 0x323   : > { %2767 = vrot.lane.b32.xlu1 %v6514_v32, %s4502_s26  ;;  %3131 = vrot.lane.b32.xlu2 %v6514_v32, %s4504_s30 }
 0x324   : > { %4439 = vmatmul.msk.f32.gmra.mxu3 %vm1534_vm9, %v6303_v8  ;;  %v1613_v8 = vadd.f32 %v6162_v44, %v6551_v16  ;;  %v6571_v44 = vpop.f32.mrf.mxu3 }
 0x325   : > { %v1878_v6 = vpop.f32.mrf.mxu2 }
 0x326   : > { %2087 = vmatmul.f32.gmra.mxu1 %v9788_v11  ;;  %v1678_v40 = vadd.f32 %v6263_v19, %v1613_v8 }
 0x32a   : > { %2140 = vmatmul.f32.gmra.mxu2 %v6185_v37  ;;  %2603 = vrot.lane.b32.xlu0 %v6544_v63, %s4501_s25  ;;  %v1743_v37 = vadd.f32 %v6400_v5, %v1678_v40  ;;  %v1810_v48 = vpop.f32.mrf.mxu1 }
 0x32b   : > { %2437 = vrot.lane.b32.xlu1 %v6544_v63, %s4500_s24  ;;  %2271 = vrot.lane.b32.xlu2 %v6544_v63, %s4499_s23 }
 0x32c   : > { %4440 = vmatmul.msk.f32.gmra.mxu3 %vm1534_vm9, %v6322_v20  ;;  %v1808_v30 = vadd.f32 %v1807_v54, %v1743_v37  ;;  %v6583_v20 = vpop.permute.xlu0 %1481  ;;  %v6594_v5 = vpop.f32.mrf.mxu3  ;;  %v9800_v37 = vld [vmem:[#allocation15_spill] sm:$0xff] }
 0x32d   : > { %v1881_v8 = vpop.f32.mrf.mxu2 }
 0x32e   : > { %2090 = vmatmul.f32.gmra.mxu1 %v5989_v27  ;;  %v1873_v19 = vadd.f32 %v1872_v2, %v1808_v30 }
 0x330   : > { %v6576_v27 = vmax.f32 %v1873_v19, 0.0 }
 0x332   : > { %2143 = vmatmul.f32.gmra.mxu2 %v6220_v18  ;;  %3133 = vrot.lane.b32.xlu0 %v6544_v63, %s4504_s30  ;;  %9790 = vst [vmem:[#allocation25_spill] sm:$0xff] %v6576_v27  ;;  %v6578_v18 = vpop.permute.xlu2 %1491 }
 0x333   : > { %2967 = vrot.lane.b32.xlu1 %v6544_v63, %s4503_s29  ;;  %2769 = vrot.lane.b32.xlu2 %v6544_v63, %s4502_s26  ;;  %v1622_v61 = vadd.f32 %v9796_v36, %v6578_v18  ;;  %v9811_v36 = vld [vmem:[#allocation26_spill] sm:$0xff] }
 0x334   : > { %4441 = vmatmul.msk.f32.gmra.mxu3 %vm1534_vm9, %v6341_v1  ;;  %v1813_v1 = vpop.f32.mrf.mxu1 }
 0x335   : > { %v1687_v11 = vadd.f32 %v9799_v43, %v1622_v61 }
 0x336   : > { %2093 = vmatmul.f32.gmra.mxu1 %v6042_v22  ;;  %v1616_v22 = vadd.f32 %v6206_v14, %v6583_v20 }
 0x337   : > { %v1752_v54 = vadd.f32 %v6462_v56, %v1687_v11  ;;  %v9801_v56 = vld [vmem:[#allocation36_spill] sm:$0xff] }
 0x33a   : > { %2146 = vmatmul.f32.gmra.mxu2 %v6241_v21  ;;  %2273 = vrot.lane.b32.xlu0 %v6576_v27, %s4499_s23  ;;  %v1681_v21 = vadd.f32 %v6288_v55, %v1616_v22  ;;  %v6601_v14 = vpop.permute.xlu2 %1506  ;;  %v6610_v55 = vpop.permute.xlu1 %1486 }
 0x33b   : > { %2605 = vrot.lane.b32.xlu1 %v6576_v27, %s4501_s25  ;;  %2439 = vrot.lane.b32.xlu2 %v6576_v27, %s4500_s24 }
 0x33c   : > { %4442 = vmatmul.msk.f32.gmra.mxu3 %vm1534_vm9, %v6362_v29  ;;  %v1746_v49 = vadd.f32 %v6423_v23, %v1681_v21  ;;  %v9803_v21 = vld [vmem:[#allocation64_spill] sm:$0xff] }
 0x33e   : > { %2096 = vmatmul.f32.gmra.mxu1 %v6097_v9  ;;  %v1811_v15 = vadd.f32 %v1810_v48, %v1746_v49  ;;  %v1816_v9 = vpop.f32.mrf.mxu1 }
 0x33f   : > { %v1817_v40 = vadd.f32 %v1816_v9, %v1752_v54  ;;  %v1884_v9 = vpop.f32.mrf.mxu2  ;;  %v9814_v54 = vld [vmem:[#allocation30_spill] sm:$0xff] }
 0x340   : > { %v1876_v29 = vadd.f32 %v1875_v34, %v1811_v15 }
 0x341   : > { %v1882_v30 = vadd.f32 %v1881_v8, %v1817_v40 }
 0x342   : > { %2149 = vmatmul.f32.gmra.mxu2 %v6258_v59  ;;  %2771 = vrot.lane.b32.xlu0 %v6576_v27, %s4502_s26  ;;  %v6612_v59 = vpop.f32.mrf.mxu3  ;;  %v6614_v23 = vmax.f32 %v1876_v29, 0.0  ;;  %v6633_v24 = vpop.permute.xlu1 %1501 }
 0x343   : > { %3135 = vrot.lane.b32.xlu1 %v6576_v27, %s4504_s30  ;;  %2969 = vrot.lane.b32.xlu2 %v6576_v27, %s4503_s29  ;;  %v6687_v15 = vmax.f32 %v1882_v30, 0.0  ;;  %v1628_v61 = vadd.f32 %v9811_v36, %v6633_v24 }
 0x344   : > { %4443 = vmatmul.msk.f32.gmra.mxu3 %vm1534_vm9, %v6376_v45  ;;  %9791 = vst [vmem:[#allocation29_spill] sm:$0xff] %v6614_v23  ;;  %v6627_v45 = vpop.permute.xlu2 %1521 }
 0x345   : > { %9804 = vst [vmem:[#allocation27_spill] sm:$0xff] %v6687_v15  ;;  %v1693_v8 = vadd.f32 %v9814_v54, %v1628_v61  ;;  %v9823_v61 = vld [vmem:[#allocation11_spill] sm:$0xff] }
 0x346   : > { %2099 = vmatmul.f32.gmra.mxu1 %v6137_v62  ;;  %v1619_v62 = vadd.f32 %v6235_v17, %v6610_v55  ;;  %v1819_v34 = vpop.f32.mrf.mxu1 }
 0x347   : > { %v1887_v30 = vpop.f32.mrf.mxu2 }
 0x348   : > { %v1684_v42 = vadd.f32 %v6307_v4, %v1619_v62  ;;  %v9792_v4 = vld [vmem:[#allocation9_spill] sm:$0xff] }
 0x349   : > { %v9805_v62 = vld [vmem:[#allocation13_spill] sm:$0xff] }
 0x34a   : > { %2152 = vmatmul.f32.gmra.mxu2 %v6277_v26  ;;  %2441 = vrot.lane.b32.xlu0 %v6614_v23, %s4500_s24  ;;  %v6630_v26 = vpop.permute.xlu0 %1496  ;;  %v1749_v25 = vadd.f32 %v6440_v41, %v1684_v42  ;;  %v6635_v38 = vpop.f32.mrf.mxu3 }
 0x34b   : > { %2275 = vrot.lane.b32.xlu1 %v6614_v23, %s4499_s23  ;;  %2607 = vrot.lane.b32.xlu2 %v6614_v23, %s4501_s25  ;;  %v6655_v3 = vpop.permute.xlu1 %1516  ;;  %v1625_v19 = vadd.f32 %v9801_v56, %v6630_v26 }
 0x34c   : > { %4444 = vmatmul.msk.f32.gmra.mxu3 %vm1534_vm9, %v6390_v60  ;;  %v1814_v52 = vadd.f32 %v1813_v1, %v1749_v25  ;;  %v1754_v1 = vpop.f32.mrf.mxu0 }
 0x34d   : > { %v1690_v49 = vadd.f32 %v9803_v21, %v1625_v19 }
 0x34e   : > { %v1879_v17 = vadd.f32 %v1878_v6, %v1814_v52  ;;  %v1822_v40 = vpop.f32.mrf.mxu1 }
 0x34f   : > { %v1755_v29 = vadd.f32 %v1754_v1, %v1690_v49 }
 0x350   : > { %v6648_v41 = vmax.f32 %v1879_v17, 0.0 }
 0x351   : > { %v1820_v42 = vadd.f32 %v1819_v34, %v1755_v29  ;;  %v9819_v29 = vld [vmem:[#allocation19_spill] sm:$0xff] }
 0x352   : > { %2155 = vmatmul.f32.gmra.mxu2 %v6296_v0  ;;  %2971 = vrot.lane.b32.xlu0 %v6614_v23, %s4503_s29  ;;  %9794 = vst [vmem:[#allocation18_spill] sm:$0xff] %v6648_v41  ;;  %v6650_v47 = vpop.permute.xlu0 %1511  ;;  %v9795_v0 = vld [vmem:[#allocation31_spill] sm:$0xff]  ;;  %v6663_v35 = vpop.f32.mrf.mxu3 }
 0x353   : > { %2773 = vrot.lane.b32.xlu1 %v6614_v23, %s4502_s26  ;;  %3137 = vrot.lane.b32.xlu2 %v6614_v23, %s4504_s30  ;;  %v6680_v48 = vpop.permute.xlu1 %1531  ;;  %v1885_v6 = vadd.f32 %v1884_v9, %v1820_v42  ;;  %v1631_v9 = vadd.f32 %v9819_v29, %v6601_v14 }
 0x354   : > { %4445 = vmatmul.msk.f32.gmra.mxu3 %vm1534_vm9, %v9792_v4  ;;  %v1757_v11 = vpop.f32.mrf.mxu0 }
 0x355   : > { %v6646_v60 = vpop.permute.xlu2 %2265  ;;  %v6702_v4 = vmax.f32 %v1885_v6, 0.0 }
 0x356   : > { %9793 = vst [vmem:[#allocation17_spill] sm:$0xff] %v6646_v60  ;;  %v1825_v54 = vpop.f32.mrf.mxu1 }
 0x357   : > { %9809 = vst [vmem:[#allocation21_spill] sm:$0xff] %v6702_v4 }
 0x35a   : > { %2158 = vmatmul.f32.gmra.mxu2 %v9795_v0  ;;  %2609 = vrot.lane.b32.xlu0 %v6648_v41, %s4501_s25  ;;  %v6678_v2 = vpop.permute.xlu0 %1526 }
 0x35b   : > { %2443 = vrot.lane.b32.xlu1 %v6648_v41, %s4500_s24  ;;  %2277 = vrot.lane.b32.xlu2 %v6648_v41, %s4499_s23 }
 0x35c   : > { %4446 = vmatmul.msk.f32.gmra.mxu3 %vm1534_vm9, %v9797_v57 }
 0x35d   : > { %v6667_v39 = vpop.permute.xlu2 %2763 }
 0x35e   : > { %9798 = vst [vmem:[#allocation67_spill] sm:$0xff] %v6667_v39 }
 0x362   : > { %2161 = vmatmul.f32.gmra.mxu2 %v9800_v37  ;;  %3139 = vrot.lane.b32.xlu0 %v6648_v41, %s4504_s30  ;;  %v1758_v37 = vadd.f32 %v1757_v11, %v1693_v8  ;;  %v1696_v11 = vadd.f32 %v9823_v61, %v1631_v9 }
 0x363   : > { %2973 = vrot.lane.b32.xlu1 %v6648_v41, %s4503_s29  ;;  %2775 = vrot.lane.b32.xlu2 %v6648_v41, %s4502_s26 }
 0x364   : > { %v1823_v56 = vadd.f32 %v1822_v40, %v1758_v37  ;;  %v1890_v40 = vpop.f32.mrf.mxu2 }
 0x365   : > { %v6684_v22 = vpop.permute.xlu2 %2433 }
 0x366   : > { %9802 = vst [vmem:[#allocation47_spill] sm:$0xff] %v6684_v22  ;;  %v1888_v1 = vadd.f32 %v1887_v30, %v1823_v56 }
 0x368   : > { %v6731_v34 = vmax.f32 %v1888_v1, 0.0  ;;  %v9825_v1 = vld [vmem:[#allocation23_spill] sm:$0xff] }
 0x369   : > { %v1634_v29 = vadd.f32 %v9825_v1, %v6650_v47 }
 0x36a   : > { %2164 = vmatmul.f32.gmra.mxu2 %v9805_v62  ;;  %2279 = vrot.lane.b32.xlu0 %v6687_v15, %s4499_s23  ;;  %9818 = vst [vmem:[#allocation61_spill] sm:$0xff] %v6731_v34  ;;  %v1760_v62 = vpop.f32.mrf.mxu0 }
 0x36b   : > { %2611 = vrot.lane.b32.xlu1 %v6687_v15, %s4501_s25  ;;  %2445 = vrot.lane.b32.xlu2 %v6687_v15, %s4500_s24  ;;  %v1761_v8 = vadd.f32 %v1760_v62, %v1696_v11  ;;  %v9828_v11 = vld [vmem:[#allocation44_spill] sm:$0xff] }
 0x36c   : > { %v6696_v25 = vpop.permute.xlu0 %2597  ;;  %v1893_v33 = vpop.f32.mrf.mxu2 }
 0x36d   : > { %9806 = vst [vmem:[#allocation10_spill] sm:$0xff] %v6696_v25  ;;  %v6698_v52 = vpop.permute.xlu1 %2431  ;;  %v6700_v17 = vpop.permute.xlu2 %2963  ;;  %v1826_v37 = vadd.f32 %v1825_v54, %v1761_v8  ;;  %v1699_v54 = vadd.f32 %v9828_v11, %v1634_v29 }
 0x36e   : > { %9807 = vst [vmem:[#allocation45_spill] sm:$0xff] %v6698_v52  ;;  %v1828_v8 = vpop.f32.mrf.mxu1 }
 0x36f   : > { %9808 = vst [vmem:[#allocation49_spill] sm:$0xff] %v6700_v17  ;;  %v1891_v30 = vadd.f32 %v1890_v40, %v1826_v37 }
 0x372   : > { %2777 = vrot.lane.b32.xlu0 %v6687_v15, %s4502_s26  ;;  %v1763_v61 = vpop.f32.mrf.mxu0 }
 0x373   : > { %2281 = vrot.lane.b32.xlu1 %v6702_v4, %s4499_s23  ;;  %2975 = vrot.lane.b32.xlu2 %v6687_v15, %s4503_s29 }
 0x374   : > { %v6710_v0 = vpop.permute.xlu0 %3127  ;;  %v1896_v32 = vpop.f32.mrf.mxu2 }
 0x375   : > { %9810 = vst [vmem:[#allocation43_spill] sm:$0xff] %v6710_v0  ;;  %v6714_v57 = vpop.permute.xlu1 %2961  ;;  %v6716_v43 = vpop.permute.xlu2 %2601  ;;  %v6763_v0 = vmax.f32 %v1891_v30, 0.0 }
 0x376   : > { %9812 = vst [vmem:[#allocation57_spill] sm:$0xff] %v6714_v57  ;;  %v1831_v57 = vpop.f32.mrf.mxu1 }
 0x377   : > { %9813 = vst [vmem:[#allocation40_spill] sm:$0xff] %v6716_v43 }
 0x378   : > { %9829 = vst [vmem:[#allocation55_spill] sm:$0xff] %v6763_v0 }
 0x37a   : > { %2447 = vrot.lane.b32.xlu0 %v6702_v4, %s4500_s24 }
 0x37b   : > { %2779 = vrot.lane.b32.xlu1 %v6702_v4, %s4502_s26  ;;  %2613 = vrot.lane.b32.xlu2 %v6702_v4, %s4501_s25 }
 0x37c   : > { %v6725_v19 = vpop.permute.xlu0 %2267  ;;  %v1899_v63 = vpop.f32.mrf.mxu2 }
 0x37d   : > { %9815 = vst [vmem:[#allocation52_spill] sm:$0xff] %v6725_v19  ;;  %v6727_v21 = vpop.permute.xlu1 %2599  ;;  %v6729_v49 = vpop.permute.xlu2 %3131 }
 0x37e   : > { %9816 = vst [vmem:[#allocation24_spill] sm:$0xff] %v6727_v21 }
 0x37f   : > { %9817 = vst [vmem:[#allocation48_spill] sm:$0xff] %v6729_v49  ;;  %v1764_v49 = vadd.f32 %v1763_v61, %v1699_v54 }
 0x381   : > { %v1829_v40 = vadd.f32 %v1828_v8, %v1764_v49 }
 0x382   : > { %2977 = vrot.lane.b32.xlu0 %v6702_v4, %s4503_s29 }
 0x383   : > { %2449 = vrot.lane.b32.xlu1 %v6731_v34, %s4500_s24  ;;  %2283 = vrot.lane.b32.xlu2 %v6731_v34, %s4499_s23  ;;  %v1894_v1 = vadd.f32 %v1893_v33, %v1829_v40  ;;  %v9834_v33 = vld [vmem:[#allocation65_spill] sm:$0xff] }
 0x384   : > { %v6741_v42 = vpop.permute.xlu0 %2765  ;;  %v1637_v54 = vadd.f32 %v9834_v33, %v6655_v3  ;;  %v1902_v23 = vpop.f32.mrf.mxu2 }
 0x385   : > { %9820 = vst [vmem:[#allocation33_spill] sm:$0xff] %v6741_v42  ;;  %v6743_v6 = vpop.permute.xlu1 %3129  ;;  %v6745_v36 = vpop.permute.xlu2 %2271  ;;  %v6779_v61 = vmax.f32 %v1894_v1, 0.0 }
 0x386   : > { %9821 = vst [vmem:[#allocation53_spill] sm:$0xff] %v6743_v6  ;;  %v6765_v6 = vpop.f32.mrf.mxu3  ;;  %v1766_v1 = vpop.f32.mrf.mxu0  ;;  %v1702_v46 = vadd.f32 %v6436_v13, %v1637_v54 }
 0x387   : > { %9822 = vst [vmem:[#allocation28_spill] sm:$0xff] %v6745_v36 }
 0x388   : > { %9832 = vst [vmem:[#allocation20_spill] sm:$0xff] %v6779_v61  ;;  %v1767_v17 = vadd.f32 %v1766_v1, %v1702_v46 }
 0x38a   : > { %2615 = vrot.lane.b32.xlu0 %v6731_v34, %s4501_s25 }
 0x38b   : > { %2979 = vrot.lane.b32.xlu1 %v6731_v34, %s4503_s29  ;;  %2781 = vrot.lane.b32.xlu2 %v6731_v34, %s4502_s26 }
 0x38c   : > { %v6754_v56 = vpop.permute.xlu0 %2435  ;;  %v1905_v60 = vpop.f32.mrf.mxu2 }
 0x38d   : > { %9824 = vst [vmem:[#allocation51_spill] sm:$0xff] %v6754_v56  ;;  %v6758_v9 = vpop.permute.xlu1 %2269  ;;  %v6760_v62 = vpop.permute.xlu2 %2769 }
 0x38e   : > { %9826 = vst [vmem:[#allocation62_spill] sm:$0xff] %v6758_v9  ;;  %v6787_v49 = vpop.f32.mrf.mxu3 }
 0x38f   : > { %9827 = vst [vmem:[#allocation39_spill] sm:$0xff] %v6760_v62 }
 0x392   : > { %2285 = vrot.lane.b32.xlu0 %v6763_v0, %s4499_s23 }
 0x393   : > { %2617 = vrot.lane.b32.xlu1 %v6763_v0, %s4501_s25  ;;  %2451 = vrot.lane.b32.xlu2 %v6763_v0, %s4500_s24 }
 0x394   : > { %v6773_v37 = vpop.permute.xlu0 %2965 }
 0x395   : > { %9830 = vst [vmem:[#allocation32_spill] sm:$0xff] %v6773_v37  ;;  %v6775_v29 = vpop.permute.xlu1 %2767  ;;  %v6777_v30 = vpop.permute.xlu2 %2439  ;;  %v1832_v37 = vadd.f32 %v1831_v57, %v1767_v17  ;;  %v9841_v17 = vld [vmem:[#allocation16_spill] sm:$0xff] }
 0x396   : > { %9831 = vst [vmem:[#allocation60_spill] sm:$0xff] %v6775_v29  ;;  %v6810_v13 = vpop.f32.mrf.mxu3  ;;  %v1769_v57 = vpop.f32.mrf.mxu0 }
 0x397   : > { %v1897_v25 = vadd.f32 %v1896_v32, %v1832_v37  ;;  %v1640_v32 = vadd.f32 %v9841_v17, %v6627_v45 }
 0x399   : > { %v6812_v46 = vmax.f32 %v1897_v25, 0.0  ;;  %v1705_v25 = vadd.f32 %v6447_v51, %v1640_v32  ;;  %v9846_v51 = vld [vmem:[#allocation8_spill] sm:$0xff] }
 0x39a   : > { %2783 = vrot.lane.b32.xlu0 %v6763_v0, %s4502_s26  ;;  %v1643_v32 = vadd.f32 %v9846_v51, %v6678_v2 }
 0x39b   : > { %2287 = vrot.lane.b32.xlu1 %v6779_v61, %s4499_s23  ;;  %2981 = vrot.lane.b32.xlu2 %v6763_v0, %s4503_s29  ;;  %9840 = vst [vmem:[#allocation22_spill] sm:$0xff] %v6812_v46 }
 0x39c   : > { %v6789_v11 = vpop.permute.xlu0 %2603 }
 0x39d   : > { %9833 = vst [vmem:[#allocation6_spill] sm:$0xff] %v6789_v11  ;;  %v6793_v8 = vpop.permute.xlu1 %2437  ;;  %v6795_v40 = vpop.permute.xlu2 %2969 }
 0x39e   : > { %9835 = vst [vmem:[#allocation56_spill] sm:$0xff] %v6793_v8  ;;  %v6829_v11 = vpop.f32.mrf.mxu3  ;;  %v2120_v8 = vpop.f32.mrf.mxu2 }
 0x39f   : > { %9836 = vst [vmem:[#allocation4_spill] sm:$0xff] %v6795_v40 }
 0x3a2   : > { %2453 = vrot.lane.b32.xlu0 %v6779_v61, %s4500_s24 }
 0x3a3   : > { %2785 = vrot.lane.b32.xlu1 %v6779_v61, %s4502_s26  ;;  %2619 = vrot.lane.b32.xlu2 %v6779_v61, %s4501_s25 }
 0x3a4   : > { %v6804_v33 = vpop.permute.xlu0 %3133 }
 0x3a5   : > { %9837 = vst [vmem:[#allocation54_spill] sm:$0xff] %v6804_v33  ;;  %v6806_v21 = vpop.permute.xlu1 %2967  ;;  %v6808_v43 = vpop.permute.xlu2 %2607 }
 0x3a6   : > { %9838 = vst [vmem:[#allocation41_spill] sm:$0xff] %v6806_v21  ;;  %v1834_v33 = vpop.f32.mrf.mxu1  ;;  %v1770_v21 = vadd.f32 %v1769_v57, %v1705_v25  ;;  %v6848_v62 = vpop.f32.mrf.mxu3 }
 0x3a7   : > { %9839 = vst [vmem:[#allocation34_spill] sm:$0xff] %v6808_v43 }
 0x3a8   : > { %v1835_v27 = vadd.f32 %v1834_v33, %v1770_v21  ;;  %v1772_v21 = vpop.f32.mrf.mxu0  ;;  %v1708_v33 = vadd.f32 %v6470_v7, %v1643_v32 }
 0x3aa   : > { %2983 = vrot.lane.b32.xlu0 %v6779_v61, %s4503_s29  ;;  %v1900_v17 = vadd.f32 %v1899_v63, %v1835_v27  ;;  %v1773_v39 = vadd.f32 %v1772_v21, %v1708_v33 }
 0x3ab   : > { %2455 = vrot.lane.b32.xlu1 %v6812_v46, %s4500_s24  ;;  %2289 = vrot.lane.b32.xlu2 %v6812_v46, %s4499_s23 }
 0x3ac   : > { %v6822_v37 = vpop.permute.xlu0 %2273  ;;  %v6846_v29 = vmax.f32 %v1900_v17, 0.0 }
 0x3ad   : > { %9842 = vst [vmem:[#allocation12_spill] sm:$0xff] %v6822_v37  ;;  %v6824_v54 = vpop.permute.xlu1 %2605  ;;  %v6826_v1 = vpop.permute.xlu2 %3137 }
 0x3ae   : > { %9843 = vst [vmem:[#allocation66_spill] sm:$0xff] %v6824_v54 }
 0x3af   : > { %9844 = vst [vmem:[#allocation46_spill] sm:$0xff] %v6826_v1  ;;  %v1837_v1 = vpop.f32.mrf.mxu1 }
 0x3b0   : > { %9849 = vst [vmem:[#allocation38_spill] sm:$0xff] %v6846_v29  ;;  %v1838_v63 = vadd.f32 %v1837_v1, %v1773_v39  ;;  %v6870_v39 = vpop.f32.mrf.mxu3 }
 0x3b2   : > { %2621 = vrot.lane.b32.xlu0 %v6812_v46, %s4501_s25  ;;  %v1903_v7 = vadd.f32 %v1902_v23, %v1838_v63  ;;  %v9854_v23 = vld [vmem:[#allocation59_spill] sm:$0xff] }
 0x3b3   : > { %2985 = vrot.lane.b32.xlu1 %v6812_v46, %s4503_s29  ;;  %2787 = vrot.lane.b32.xlu2 %v6812_v46, %s4502_s26  ;;  %v1646_v21 = vadd.f32 %v9854_v23, %v6680_v48  ;;  %v1929_v46 = vadd.f32 %v6532_v50, %v6454_v58 }
 0x3b4   : > { %v6837_v42 = vpop.permute.xlu0 %2771  ;;  %v6862_v32 = vmax.f32 %v1903_v7, 0.0  ;;  %v1775_v7 = vpop.f32.mrf.mxu0 }
 0x3b5   : > { %9845 = vst [vmem:[#allocation50_spill] sm:$0xff] %v6837_v42  ;;  %v6841_v57 = vpop.permute.xlu1 %3135  ;;  %v6843_v25 = vpop.permute.xlu2 %2277 }
 0x3b6   : > { %9847 = vst [vmem:[#allocation9_spill] sm:$0xff] %v6841_v57  ;;  %v1711_v57 = vadd.f32 %v6495_v12, %v1646_v21 }
 0x3b7   : > { %9848 = vst [vmem:[#allocation31_spill] sm:$0xff] %v6843_v25  ;;  %v1840_v19 = vpop.f32.mrf.mxu1 }
 0x3b8   : > { %9852 = vst [vmem:[#allocation15_spill] sm:$0xff] %v6862_v32  ;;  %v1776_v9 = vadd.f32 %v1775_v7, %v1711_v57  ;;  %v6893_v12 = vpop.f32.mrf.mxu3 }
 0x3ba   : > { %2291 = vrot.lane.b32.xlu0 %v6846_v29, %s4499_s23  ;;  %v1841_v36 = vadd.f32 %v1840_v19, %v1776_v9 }
 0x3bb   : > { %2623 = vrot.lane.b32.xlu1 %v6846_v29, %s4501_s25  ;;  %2457 = vrot.lane.b32.xlu2 %v6846_v29, %s4500_s24 }
 0x3bc   : > { %v6856_v27 = vpop.permute.xlu0 %2441  ;;  %v1906_v41 = vadd.f32 %v1905_v60, %v1841_v36  ;;  %v1990_v9 = vpop.f32.mrf.mxu0 }
 0x3bd   : > { %v6858_v51 = vpop.permute.xlu1 %2275  ;;  %v6860_v17 = vpop.permute.xlu2 %2775 }
 0x3be   : > { %9850 = vst [vmem:[#allocation7_spill] sm:$0xff] %v6858_v51  ;;  %v6895_v57 = vmax.f32 %v1906_v41, 0.0  ;;  %v9862_v41 = vld [vmem:[#allocation5_spill] sm:$0xff] }
 0x3bf   : > { %9851 = vst [vmem:[#allocation63_spill] sm:$0xff] %v6860_v17  ;;  %v1926_v7 = vadd.f32 %v6511_v28, %v9862_v41  ;;  %v2055_v56 = vpop.f32.mrf.mxu1 }
 0x3c0   : > { %9858 = vst [vmem:[#allocation30_spill] sm:$0xff] %v6895_v57  ;;  %v6909_v21 = vpop.f32.mrf.mxu3 }
 0x3c2   : > { %2789 = vrot.lane.b32.xlu0 %v6846_v29, %s4502_s26 }
 0x3c3   : > { %2293 = vrot.lane.b32.xlu1 %v6862_v32, %s4499_s23  ;;  %2987 = vrot.lane.b32.xlu2 %v6846_v29, %s4503_s29 }
 0x3c4   : > { %v6872_v1 = vpop.permute.xlu0 %2971  ;;  %v1993_v61 = vpop.f32.mrf.mxu0 }
 0x3c5   : > { %9853 = vst [vmem:[#allocation36_spill] sm:$0xff] %v6872_v1  ;;  %v6876_v33 = vpop.permute.xlu1 %2773  ;;  %v6878_v63 = vpop.permute.xlu2 %2445 }
 0x3c6   : > { %9855 = vst [vmem:[#allocation64_spill] sm:$0xff] %v6876_v33 }
 0x3c8   : > { %v2185_v41 = vpop.f32.mrf.mxu3 }
 0x3ca   : > { %2459 = vrot.lane.b32.xlu0 %v6862_v32, %s4500_s24 }
 0x3cb   : > { %2791 = vrot.lane.b32.xlu1 %v6862_v32, %s4502_s26  ;;  %2625 = vrot.lane.b32.xlu2 %v6862_v32, %s4501_s25 }
 0x3cc   : > { %v6887_v23 = vpop.permute.xlu0 %2609 }
 0x3cd   : > { %9856 = vst [vmem:[#allocation13_spill] sm:$0xff] %v6887_v23  ;;  %v6889_v22 = vpop.permute.xlu1 %2443  ;;  %v6891_v52 = vpop.permute.xlu2 %2975 }
 0x3ce   : > { %9857 = vst [vmem:[#allocation26_spill] sm:$0xff] %v6891_v52 }
 0x3d0   : > { %v2188_v50 = vpop.f32.mrf.mxu3 }
 0x3d2   : > { %2989 = vrot.lane.b32.xlu0 %v6862_v32, %s4503_s29 }
 0x3d3   : > { %2461 = vrot.lane.b32.xlu1 %v6895_v57, %s4500_s24  ;;  %2295 = vrot.lane.b32.xlu2 %v6895_v57, %s4499_s23 }
 0x3d4   : > { %v6903_v19 = vpop.permute.xlu0 %3139 }
 0x3d5   : > { %9859 = vst [vmem:[#allocation19_spill] sm:$0xff] %v6903_v19  ;;  %v6905_v60 = vpop.permute.xlu1 %2973  ;;  %v6907_v36 = vpop.permute.xlu2 %2613  ;;  %v1991_v19 = vadd.f32 %v1990_v9, %v1926_v7 }
 0x3d6   : > { %9860 = vst [vmem:[#allocation11_spill] sm:$0xff] %v6905_v60  ;;  %v2058_v9 = vpop.f32.mrf.mxu1 }
 0x3d7   : > { %9861 = vst [vmem:[#allocation23_spill] sm:$0xff] %v6907_v36  ;;  %v2056_v0 = vadd.f32 %v2055_v56, %v1991_v19  ;;  %v1994_v56 = vadd.f32 %v1993_v61, %v1929_v46  ;;  %v2123_v19 = vpop.f32.mrf.mxu2 }
 0x3d9   : > { %v2121_v28 = vadd.f32 %v2120_v8, %v2056_v0 }
 0x3da   : > { %3155 = vrot.lane.b32.xlu0 %v6862_v32, %s4504_s30 }
 0x3db   : > { %2991 = vrot.lane.b32.xlu1 %v6895_v57, %s4503_s29  ;;  %2793 = vrot.lane.b32.xlu2 %v6895_v57, %s4502_s26  ;;  %v2186_v7 = vadd.f32 %v2185_v41, %v2121_v28 }
 0x3dc   : > { %v6919_v15 = vpop.permute.xlu0 %2279 }
 0x3dd   : > { %9863 = vst [vmem:[#allocation44_spill] sm:$0xff] %v6919_v15  ;;  %v6921_v4 = vpop.permute.xlu1 %2611  ;;  %v6923_v34 = vpop.permute.xlu2 %2283  ;;  %v6939_v32 = vmax.f32 %v2186_v7, 0.0  ;;  %v1932_v7 = vadd.f32 %v6546_v10, %v6487_v31 }
 0x3de   : > { %9864 = vst [vmem:[#allocation65_spill] sm:$0xff] %v6921_v4 }
 0x3df   : > { %9865 = vst [vmem:[#allocation16_spill] sm:$0xff] %v6923_v34  ;;  %v2059_v34 = vadd.f32 %v2058_v9, %v1994_v56  ;;  %v2061_v56 = vpop.f32.mrf.mxu1 }
 0x3e0   : > { %9868 = vst [vmem:[#allocation5_spill] sm:$0xff] %v6939_v32 }
 0x3e1   : > { %v2124_v58 = vadd.f32 %v2123_v19, %v2059_v34  ;;  %v1996_v34 = vpop.f32.mrf.mxu0 }
 0x3e2   : > { %2627 = vrot.lane.b32.xlu0 %v6895_v57, %s4501_s25 }
 0x3e3   : > { %3157 = vrot.lane.b32.xlu1 %v6895_v57, %s4504_s30  ;;  %3323 = vrot.lane.b32.xlu2 %v6895_v57, %s4505_s9  ;;  %v2189_v46 = vadd.f32 %v2188_v50, %v2124_v58  ;;  %v1997_v58 = vadd.f32 %v1996_v34, %v1932_v7  ;;  %v2126_v57 = vpop.f32.mrf.mxu2 }
 0x3e4   : > { %v6933_v36 = vpop.permute.xlu0 %2777 }
 0x3e5   : > { %9866 = vst [vmem:[#allocation8_spill] sm:$0xff] %v6933_v36  ;;  %v6935_v0 = vpop.permute.xlu1 %2281  ;;  %v6937_v8 = vpop.permute.xlu2 %2781  ;;  %v6953_v9 = vmax.f32 %v2189_v46, 0.0 }
 0x3e6   : > { %9867 = vst [vmem:[#allocation59_spill] sm:$0xff] %v6937_v8 }
 0x3e7   : > { %9872 = vst [vmem:[#allocation71_spill] sm:$0xff] %v6953_v9 }
 0x3ea   : > { %2297 = vrot.lane.b32.xlu0 %v6939_v32, %s4499_s23 }
 0x3eb   : > { %2629 = vrot.lane.b32.xlu1 %v6939_v32, %s4501_s25  ;;  %2463 = vrot.lane.b32.xlu2 %v6939_v32, %s4500_s24 }
 0x3ec   : > { %v6947_v61 = vpop.permute.xlu0 %2447 }
 0x3ed   : > { %9869 = vst [vmem:[#allocation68_spill] sm:$0xff] %v6947_v61  ;;  %v6949_v28 = vpop.permute.xlu1 %2779  ;;  %v6951_v41 = vpop.permute.xlu2 %2451 }
 0x3ee   : > { %9870 = vst [vmem:[#allocation69_spill] sm:$0xff] %v6949_v28  ;;  %v2191_v61 = vpop.f32.mrf.mxu3 }
 0x3ef   : > { %9871 = vst [vmem:[#allocation70_spill] sm:$0xff] %v6951_v41  ;;  %v2062_v41 = vadd.f32 %v2061_v56, %v1997_v58 }
 0x3f1   : > { %v2127_v8 = vadd.f32 %v2126_v57, %v2062_v41  ;;  %v1935_v57 = vadd.f32 %v6571_v44, %v6519_v53  ;;  %v2064_v41 = vpop.f32.mrf.mxu1 }
 0x3f2   : > { %2795 = vrot.lane.b32.xlu0 %v6939_v32, %s4502_s26 }
 0x3f3   : > { %2299 = vrot.lane.b32.xlu1 %v6953_v9, %s4499_s23  ;;  %2993 = vrot.lane.b32.xlu2 %v6939_v32, %s4503_s29  ;;  %v2192_v10 = vadd.f32 %v2191_v61, %v2127_v8  ;;  %v1999_v32 = vpop.f32.mrf.mxu0  ;;  %v2129_v61 = vpop.f32.mrf.mxu2 }
 0x3f4   : > { %v6963_v19 = vpop.permute.xlu0 %2977  ;;  %v2000_v8 = vadd.f32 %v1999_v32, %v1935_v57 }
 0x3f5   : > { %9873 = vst [vmem:[#allocation72_spill] sm:$0xff] %v6963_v19  ;;  %v6965_v50 = vpop.permute.xlu1 %2449  ;;  %v6967_v46 = vpop.permute.xlu2 %2981  ;;  %v6981_v56 = vmax.f32 %v2192_v10, 0.0 }
 0x3f6   : > { %9874 = vst [vmem:[#allocation73_spill] sm:$0xff] %v6967_v46  ;;  %v2065_v46 = vadd.f32 %v2064_v41, %v2000_v8  ;;  %v2194_v44 = vpop.f32.mrf.mxu3 }
 0x3f7   : > { %9878 = vst [vmem:[#allocation77_spill] sm:$0xff] %v6981_v56 }
 0x3f8   : > { %v2130_v53 = vadd.f32 %v2129_v61, %v2065_v46 }
 0x3f9   : > { %v2067_v32 = vpop.f32.mrf.mxu1 }
 0x3fa   : > { %2465 = vrot.lane.b32.xlu0 %v6953_v9, %s4500_s24  ;;  %v2195_v57 = vadd.f32 %v2194_v44, %v2130_v53 }
 0x3fb   : > { %2797 = vrot.lane.b32.xlu1 %v6953_v9, %s4502_s26  ;;  %2631 = vrot.lane.b32.xlu2 %v6953_v9, %s4501_s25  ;;  %v2132_v61 = vpop.f32.mrf.mxu2 }
 0x3fc   : > { %v6975_v31 = vpop.permute.xlu0 %2615 }
 0x3fd   : > { %9875 = vst [vmem:[#allocation74_spill] sm:$0xff] %v6975_v31  ;;  %v6977_v34 = vpop.permute.xlu1 %2979  ;;  %v6979_v7 = vpop.permute.xlu2 %2619 }
 0x3fe   : > { %9876 = vst [vmem:[#allocation75_spill] sm:$0xff] %v6977_v34  ;;  %v2002_v31 = vpop.f32.mrf.mxu0 }
 0x3ff   : > { %9877 = vst [vmem:[#allocation76_spill] sm:$0xff] %v6979_v7 }
 0x402   : > { %2995 = vrot.lane.b32.xlu0 %v6953_v9, %s4503_s29  ;;  %v1938_v9 = vadd.f32 %v6594_v5, %v6551_v16  ;;  %v2197_v5 = vpop.f32.mrf.mxu3 }
 0x403   : > { %2467 = vrot.lane.b32.xlu1 %v6981_v56, %s4500_s24  ;;  %2301 = vrot.lane.b32.xlu2 %v6981_v56, %s4499_s23 }
 0x404   : > { %v6991_v58 = vpop.permute.xlu0 %2285  ;;  %v2003_v41 = vadd.f32 %v2002_v31, %v1938_v9 }
 0x405   : > { %9879 = vst [vmem:[#allocation78_spill] sm:$0xff] %v6991_v58  ;;  %v6993_v7 = vpop.permute.xlu1 %2617  ;;  %v6995_v10 = vpop.permute.xlu2 %2289 }
 0x406   : > { %9880 = vst [vmem:[#allocation79_spill] sm:$0xff] %v6993_v7  ;;  %v7011_v7 = vmax.f32 %v2195_v57, 0.0  ;;  %v1941_v57 = vadd.f32 %v6612_v59, %v6583_v20 }
 0x407   : > { %9881 = vst [vmem:[#allocation80_spill] sm:$0xff] %v6995_v10  ;;  %v2068_v10 = vadd.f32 %v2067_v32, %v2003_v41  ;;  %v2070_v41 = vpop.f32.mrf.mxu1 }
 0x408   : > { %9884 = vst [vmem:[#allocation83_spill] sm:$0xff] %v7011_v7 }
 0x409   : > { %v2133_v16 = vadd.f32 %v2132_v61, %v2068_v10  ;;  %v2005_v10 = vpop.f32.mrf.mxu0 }
 0x40a   : > { %2633 = vrot.lane.b32.xlu0 %v6981_v56, %s4501_s25 }
 0x40b   : > { %2997 = vrot.lane.b32.xlu1 %v6981_v56, %s4503_s29  ;;  %2799 = vrot.lane.b32.xlu2 %v6981_v56, %s4502_s26  ;;  %v2198_v31 = vadd.f32 %v2197_v5, %v2133_v16  ;;  %v2006_v16 = vadd.f32 %v2005_v10, %v1941_v57  ;;  %v2135_v56 = vpop.f32.mrf.mxu2 }
 0x40c   : > { %v7005_v58 = vpop.permute.xlu0 %2783 }
 0x40d   : > { %9882 = vst [vmem:[#allocation81_spill] sm:$0xff] %v7005_v58  ;;  %v7007_v46 = vpop.permute.xlu1 %2287  ;;  %v7009_v8 = vpop.permute.xlu2 %2787  ;;  %v7025_v32 = vmax.f32 %v2198_v31, 0.0 }
 0x40e   : > { %9883 = vst [vmem:[#allocation82_spill] sm:$0xff] %v7009_v8 }
 0x40f   : > { %9888 = vst [vmem:[#allocation87_spill] sm:$0xff] %v7025_v32 }
 0x412   : > { %2303 = vrot.lane.b32.xlu0 %v7011_v7, %s4499_s23 }
 0x413   : > { %2635 = vrot.lane.b32.xlu1 %v7011_v7, %s4501_s25  ;;  %2469 = vrot.lane.b32.xlu2 %v7011_v7, %s4500_s24 }
 0x414   : > { %v7019_v9 = vpop.permute.xlu0 %2453 }
 0x415   : > { %9885 = vst [vmem:[#allocation84_spill] sm:$0xff] %v7019_v9  ;;  %v7021_v53 = vpop.permute.xlu1 %2785  ;;  %v7023_v44 = vpop.permute.xlu2 %2457 }
 0x416   : > { %9886 = vst [vmem:[#allocation85_spill] sm:$0xff] %v7021_v53  ;;  %v2200_v9 = vpop.f32.mrf.mxu3 }
 0x417   : > { %9887 = vst [vmem:[#allocation86_spill] sm:$0xff] %v7023_v44  ;;  %v2071_v44 = vadd.f32 %v2070_v41, %v2006_v16 }
 0x419   : > { %v2136_v8 = vadd.f32 %v2135_v56, %v2071_v44  ;;  %v1944_v56 = vadd.f32 %v6635_v38, %v6610_v55  ;;  %v2073_v44 = vpop.f32.mrf.mxu1 }
 0x41a   : > { %2801 = vrot.lane.b32.xlu0 %v7011_v7, %s4502_s26 }
 0x41b   : > { %2305 = vrot.lane.b32.xlu1 %v7025_v32, %s4499_s23  ;;  %2999 = vrot.lane.b32.xlu2 %v7011_v7, %s4503_s29  ;;  %v2201_v59 = vadd.f32 %v2200_v9, %v2136_v8  ;;  %v2008_v7 = vpop.f32.mrf.mxu0  ;;  %v2138_v9 = vpop.f32.mrf.mxu2 }
 0x41c   : > { %v7035_v61 = vpop.permute.xlu0 %2983  ;;  %v2009_v8 = vadd.f32 %v2008_v7, %v1944_v56 }
 0x41d   : > { %9889 = vst [vmem:[#allocation88_spill] sm:$0xff] %v7035_v61  ;;  %v7037_v5 = vpop.permute.xlu1 %2455  ;;  %v7039_v31 = vpop.permute.xlu2 %2987  ;;  %v7053_v41 = vmax.f32 %v2201_v59, 0.0 }
 0x41e   : > { %9890 = vst [vmem:[#allocation89_spill] sm:$0xff] %v7039_v31  ;;  %v2074_v31 = vadd.f32 %v2073_v44, %v2009_v8  ;;  %v2203_v38 = vpop.f32.mrf.mxu3 }
 0x41f   : > { %9894 = vst [vmem:[#allocation93_spill] sm:$0xff] %v7053_v41 }
 0x420   : > { %v2139_v55 = vadd.f32 %v2138_v9, %v2074_v31 }
 0x421   : > { %v2076_v7 = vpop.f32.mrf.mxu1 }
 0x422   : > { %2471 = vrot.lane.b32.xlu0 %v7025_v32, %s4500_s24  ;;  %v2204_v56 = vadd.f32 %v2203_v38, %v2139_v55 }
 0x423   : > { %2803 = vrot.lane.b32.xlu1 %v7025_v32, %s4502_s26  ;;  %2637 = vrot.lane.b32.xlu2 %v7025_v32, %s4501_s25  ;;  %v2141_v9 = vpop.f32.mrf.mxu2 }
 0x424   : > { %v7047_v20 = vpop.permute.xlu0 %2621 }
 0x425   : > { %9891 = vst [vmem:[#allocation90_spill] sm:$0xff] %v7047_v20  ;;  %v7049_v10 = vpop.permute.xlu1 %2985  ;;  %v7051_v57 = vpop.permute.xlu2 %2625 }
 0x426   : > { %9892 = vst [vmem:[#allocation91_spill] sm:$0xff] %v7049_v10  ;;  %v2011_v20 = vpop.f32.mrf.mxu0 }
 0x427   : > { %9893 = vst [vmem:[#allocation92_spill] sm:$0xff] %v7051_v57 }
 0x42a   : > { %3001 = vrot.lane.b32.xlu0 %v7025_v32, %s4503_s29  ;;  %v1947_v32 = vadd.f32 %v6663_v35, %v6578_v18  ;;  %v2206_v35 = vpop.f32.mrf.mxu3 }
 0x42b   : > { %2473 = vrot.lane.b32.xlu1 %v7053_v41, %s4500_s24  ;;  %2307 = vrot.lane.b32.xlu2 %v7053_v41, %s4499_s23 }
 0x42c   : > { %v7063_v16 = vpop.permute.xlu0 %2291  ;;  %v2012_v44 = vadd.f32 %v2011_v20, %v1947_v32 }
 0x42d   : > { %9895 = vst [vmem:[#allocation94_spill] sm:$0xff] %v7063_v16  ;;  %v7065_v57 = vpop.permute.xlu1 %2623  ;;  %v7067_v59 = vpop.permute.xlu2 %2295 }
 0x42e   : > { %9896 = vst [vmem:[#allocation95_spill] sm:$0xff] %v7065_v57  ;;  %v7083_v57 = vmax.f32 %v2204_v56, 0.0  ;;  %v1950_v56 = vadd.f32 %v6765_v6, %v6630_v26 }
 0x42f   : > { %9897 = vst [vmem:[#allocation96_spill] sm:$0xff] %v7067_v59  ;;  %v2077_v59 = vadd.f32 %v2076_v7, %v2012_v44  ;;  %v2079_v44 = vpop.f32.mrf.mxu1 }
 0x430   : > { %9899 = vst [vmem:[#allocation98_spill] sm:$0xff] %v7083_v57 }
 0x431   : > { %v2142_v18 = vadd.f32 %v2141_v9, %v2077_v59  ;;  %v2014_v59 = vpop.f32.mrf.mxu0 }
 0x432   : > { %2639 = vrot.lane.b32.xlu0 %v7053_v41, %s4501_s25 }
 0x433   : > { %3003 = vrot.lane.b32.xlu1 %v7053_v41, %s4503_s29  ;;  %2805 = vrot.lane.b32.xlu2 %v7053_v41, %s4502_s26  ;;  %v2207_v20 = vadd.f32 %v2206_v35, %v2142_v18  ;;  %v2015_v18 = vadd.f32 %v2014_v59, %v1950_v56 }
 0x434   : > { %v7077_v16 = vpop.permute.xlu0 %2789 }
 0x435   : > { %v7079_v31 = vpop.permute.xlu1 %2293  ;;  %v7081_v8 = vpop.permute.xlu2 %2793  ;;  %v7097_v7 = vmax.f32 %v2207_v20, 0.0  ;;  %v2080_v41 = vadd.f32 %v2079_v44, %v2015_v18 }
 0x436   : > { %9898 = vst [vmem:[#allocation97_spill] sm:$0xff] %v7081_v8 }
 0x43a   : > { %2309 = vrot.lane.b32.xlu0 %v7083_v57, %s4499_s23 }
 0x43b   : > { %2641 = vrot.lane.b32.xlu1 %v7083_v57, %s4501_s25  ;;  %2475 = vrot.lane.b32.xlu2 %v7083_v57, %s4500_s24 }
 0x43c   : > { %v7091_v32 = vpop.permute.xlu0 %2459 }
 0x43d   : > { %9900 = vst [vmem:[#allocation99_spill] sm:$0xff] %v7091_v32  ;;  %v7093_v55 = vpop.permute.xlu1 %2791  ;;  %v7095_v38 = vpop.permute.xlu2 %3323 }
 0x43e   : > { %9901 = vst [vmem:[#allocation100_spill] sm:$0xff] %v7093_v55  ;;  %v2209_v32 = vpop.f32.mrf.mxu3 }
 0x43f   : > { %9902 = vst [vmem:[#allocation101_spill] sm:$0xff] %v7095_v38  ;;  %v2144_v38 = vpop.f32.mrf.mxu2 }
 0x440   : > { %v2145_v8 = vadd.f32 %v2144_v38, %v2080_v41  ;;  %v1953_v41 = vadd.f32 %v6787_v49, %v6633_v24  ;;  %v2082_v38 = vpop.f32.mrf.mxu1 }
 0x442   : > { %2807 = vrot.lane.b32.xlu0 %v7083_v57, %s4502_s26  ;;  %v2210_v6 = vadd.f32 %v2209_v32, %v2145_v8 }
 0x443   : > { %2311 = vrot.lane.b32.xlu1 %v7097_v7, %s4499_s23  ;;  %3005 = vrot.lane.b32.xlu2 %v7083_v57, %s4503_s29 }
 0x444   : > { %v7107_v9 = vpop.permute.xlu0 %2989  ;;  %v7125_v44 = vmax.f32 %v2210_v6, 0.0 }
 0x445   : > { %9903 = vst [vmem:[#allocation102_spill] sm:$0xff] %v7107_v9  ;;  %v7109_v35 = vpop.permute.xlu1 %2461  ;;  %v7111_v20 = vpop.permute.xlu2 %2463  ;;  %v1956_v9 = vadd.f32 %v6810_v13, %v6601_v14 }
 0x446   : > { %9904 = vst [vmem:[#allocation103_spill] sm:$0xff] %v7111_v20  ;;  %v2017_v20 = vpop.f32.mrf.mxu0  ;;  %v2212_v49 = vpop.f32.mrf.mxu3 }
 0x447   : > { %v2018_v8 = vadd.f32 %v2017_v20, %v1953_v41  ;;  %v2147_v32 = vpop.f32.mrf.mxu2 }
 0x448   : > { %v2085_v20 = vpop.f32.mrf.mxu1 }
 0x44a   : > { %2477 = vrot.lane.b32.xlu0 %v7097_v7, %s4500_s24 }
 0x44b   : > { %2809 = vrot.lane.b32.xlu1 %v7097_v7, %s4502_s26  ;;  %2643 = vrot.lane.b32.xlu2 %v7097_v7, %s4501_s25 }
 0x44c   : > { %v7119_v26 = vpop.permute.xlu0 %3155 }
 0x44d   : > { %9905 = vst [vmem:[#allocation104_spill] sm:$0xff] %v7119_v26  ;;  %v7121_v59 = vpop.permute.xlu1 %2991  ;;  %v7123_v56 = vpop.permute.xlu2 %2993  ;;  %v2083_v26 = vadd.f32 %v2082_v38, %v2018_v8 }
 0x44e   : > { %9906 = vst [vmem:[#allocation105_spill] sm:$0xff] %v7123_v56  ;;  %v2020_v57 = vpop.f32.mrf.mxu0  ;;  %v2215_v13 = vpop.f32.mrf.mxu3 }
 0x44f   : > { %v2148_v24 = vadd.f32 %v2147_v32, %v2083_v26  ;;  %v2021_v38 = vadd.f32 %v2020_v57, %v1956_v9  ;;  %v2150_v32 = vpop.f32.mrf.mxu2 }
 0x451   : > { %v2213_v41 = vadd.f32 %v2212_v49, %v2148_v24 }
 0x452   : > { %3007 = vrot.lane.b32.xlu0 %v7097_v7, %s4503_s29 }
 0x453   : > { %2479 = vrot.lane.b32.xlu1 %v7125_v44, %s4500_s24  ;;  %2313 = vrot.lane.b32.xlu2 %v7125_v44, %s4499_s23 }
 0x454   : > { %v7135_v18 = vpop.permute.xlu0 %2627 }
 0x455   : > { %9907 = vst [vmem:[#allocation106_spill] sm:$0xff] %v7135_v18  ;;  %v7137_v56 = vpop.permute.xlu1 %3157  ;;  %v7139_v6 = vpop.permute.xlu2 %2631 }
 0x456   : > { %9908 = vst [vmem:[#allocation107_spill] sm:$0xff] %v7137_v56  ;;  %v7155_v56 = vmax.f32 %v2213_v41, 0.0  ;;  %v1959_v41 = vadd.f32 %v6829_v11, %v6650_v47 }
 0x457   : > { %9909 = vst [vmem:[#allocation108_spill] sm:$0xff] %v7139_v6  ;;  %v2086_v6 = vadd.f32 %v2085_v20, %v2021_v38  ;;  %v2088_v38 = vpop.f32.mrf.mxu1 }
 0x458   : > { %9913 = vst [vmem:[#allocation112_spill] sm:$0xff] %v7155_v56 }
 0x459   : > { %v2151_v14 = vadd.f32 %v2150_v32, %v2086_v6  ;;  %v2023_v6 = vpop.f32.mrf.mxu0 }
 0x45a   : > { %2645 = vrot.lane.b32.xlu0 %v7125_v44, %s4501_s25 }
 0x45b   : > { %3009 = vrot.lane.b32.xlu1 %v7125_v44, %s4503_s29  ;;  %2811 = vrot.lane.b32.xlu2 %v7125_v44, %s4502_s26  ;;  %v2216_v9 = vadd.f32 %v2215_v13, %v2151_v14  ;;  %v2024_v14 = vadd.f32 %v2023_v6, %v1959_v41 }
 0x45c   : > { %v7149_v18 = vpop.permute.xlu0 %2297 }
 0x45d   : > { %9910 = vst [vmem:[#allocation109_spill] sm:$0xff] %v7149_v18  ;;  %v7151_v26 = vpop.permute.xlu1 %2629  ;;  %v7153_v8 = vpop.permute.xlu2 %2301  ;;  %v7169_v20 = vmax.f32 %v2216_v9, 0.0 }
 0x45e   : > { %9911 = vst [vmem:[#allocation110_spill] sm:$0xff] %v7151_v26  ;;  %v2153_v26 = vpop.f32.mrf.mxu2 }
 0x45f   : > { %9912 = vst [vmem:[#allocation111_spill] sm:$0xff] %v7153_v8 }
 0x460   : > { %9917 = vst [vmem:[#allocation116_spill] sm:$0xff] %v7169_v20 }
 0x462   : > { %2315 = vrot.lane.b32.xlu0 %v7155_v56, %s4499_s23 }
 0x463   : > { %2647 = vrot.lane.b32.xlu1 %v7155_v56, %s4501_s25  ;;  %2481 = vrot.lane.b32.xlu2 %v7155_v56, %s4500_s24 }
 0x464   : > { %v7163_v57 = vpop.permute.xlu0 %2795 }
 0x465   : > { %9914 = vst [vmem:[#allocation113_spill] sm:$0xff] %v7163_v57  ;;  %v7165_v24 = vpop.permute.xlu1 %2299  ;;  %v7167_v49 = vpop.permute.xlu2 %2799 }
 0x466   : > { %9915 = vst [vmem:[#allocation114_spill] sm:$0xff] %v7165_v24  ;;  %v2218_v24 = vpop.f32.mrf.mxu3 }
 0x467   : > { %9916 = vst [vmem:[#allocation115_spill] sm:$0xff] %v7167_v49  ;;  %v2089_v49 = vadd.f32 %v2088_v38, %v2024_v14  ;;  %v7206_v14 = vld [vmem:[%s9187_s0 + $0x2] ss:$8 sm:$0x3] }
 0x468   : > { %9925 = vst [vmem:[#allocation124_spill] sm:$0xff] %v7206_v14 }
 0x469   : > { %v2154_v57 = vadd.f32 %v2153_v26, %v2089_v49  ;;  %v1962_v26 = vadd.f32 %v6848_v62, %v6655_v3  ;;  %v2091_v49 = vpop.f32.mrf.mxu1  ;;  %v7217_v62 = vperm.slane %v7206_v14, 1 }
 0x46a   : > { %2813 = vrot.lane.b32.xlu0 %v7155_v56, %s4502_s26 }
 0x46b   : > { %2317 = vrot.lane.b32.xlu1 %v7169_v20, %s4499_s23  ;;  %3011 = vrot.lane.b32.xlu2 %v7155_v56, %s4503_s29  ;;  %v2219_v11 = vadd.f32 %v2218_v24, %v2154_v57  ;;  %v2156_v24 = vpop.f32.mrf.mxu2  ;;  %9928 = vst [vmem:[#allocation127_spill] sm:$0xff] %v7217_v62 }
 0x46c   : > { %v7179_v32 = vpop.permute.xlu0 %2465 }
 0x46d   : > { %9918 = vst [vmem:[#allocation117_spill] sm:$0xff] %v7179_v32  ;;  %v7181_v13 = vpop.permute.xlu1 %2797  ;;  %v7183_v9 = vpop.permute.xlu2 %2469  ;;  %v7197_v38 = vmax.f32 %v2219_v11, 0.0 }
 0x46e   : > { %9919 = vst [vmem:[#allocation118_spill] sm:$0xff] %v7181_v13  ;;  %v2026_v13 = vpop.f32.mrf.mxu0 }
 0x46f   : > { %9920 = vst [vmem:[#allocation119_spill] sm:$0xff] %v7183_v9  ;;  %v2027_v57 = vadd.f32 %v2026_v13, %v1962_v26  ;;  %v2221_v26 = vpop.f32.mrf.mxu3 }
 0x470   : > { %9924 = vst [vmem:[#allocation123_spill] sm:$0xff] %v7197_v38 }
 0x472   : > { %2483 = vrot.lane.b32.xlu0 %v7169_v20, %s4500_s24 }
 0x473   : > { %2815 = vrot.lane.b32.xlu1 %v7169_v20, %s4502_s26  ;;  %2649 = vrot.lane.b32.xlu2 %v7169_v20, %s4501_s25 }
 0x474   : > { %v7191_v47 = vpop.permute.xlu0 %2995 }
 0x475   : > { %9921 = vst [vmem:[#allocation120_spill] sm:$0xff] %v7191_v47  ;;  %v7193_v6 = vpop.permute.xlu1 %2467  ;;  %v7195_v41 = vpop.permute.xlu2 %2999 }
 0x476   : > { %9922 = vst [vmem:[#allocation121_spill] sm:$0xff] %v7193_v6  ;;  %v2029_v6 = vpop.f32.mrf.mxu0 }
 0x477   : > { %9923 = vst [vmem:[#allocation122_spill] sm:$0xff] %v7195_v41  ;;  %v2092_v41 = vadd.f32 %v2091_v49, %v2027_v57  ;;  %v1965_v49 = vadd.f32 %v6870_v39, %v6627_v45 }
 0x479   : > { %v2157_v13 = vadd.f32 %v2156_v24, %v2092_v41  ;;  %v2030_v24 = vadd.f32 %v2029_v6, %v1965_v49  ;;  %v7264_v49 = vld [vmem:[%s9187_s0 + $0x3] ss:$8 sm:$0x3] }
 0x47a   : > { %3013 = vrot.lane.b32.xlu0 %v7169_v20, %s4503_s29  ;;  %9936 = vst [vmem:[#allocation133_spill] sm:$0xff] %v7264_v49 }
 0x47b   : > { %2485 = vrot.lane.b32.xlu1 %v7197_v38, %s4500_s24  ;;  %2319 = vrot.lane.b32.xlu2 %v7197_v38, %s4499_s23  ;;  %v2222_v41 = vadd.f32 %v2221_v26, %v2157_v13  ;;  %v2224_v26 = vpop.f32.mrf.mxu3 }
 0x47c   : > { %v7212_v11 = vpop.permute.xlu0 %2633 }
 0x47d   : > { %9926 = vst [vmem:[#allocation125_spill] sm:$0xff] %v7212_v11  ;;  %v7214_v3 = vpop.permute.xlu1 %2997  ;;  %v7219_v47 = vpop.permute.xlu2 %2637  ;;  %v7257_v13 = vmax.f32 %v2222_v41, 0.0 }
 0x47e   : > { %9927 = vst [vmem:[#allocation126_spill] sm:$0xff] %v7214_v3  ;;  %v2665_v18 = vsel %vm702_vm4, %v6824_v54, %v7219_v47  ;;  %v7233_v3 = vld [vmem:[%s9187_s0] ss:$8 sm:$0x3]  ;;  %v2159_v54 = vpop.f32.mrf.mxu2 }
 0x47f   : > { %9929 = vst [vmem:[#allocation128_spill] sm:$0xff] %v7219_v47  ;;  %v7226_v32 = vmul.f32 %v7217_v62, %v2665_v18  ;;  %v2094_v18 = vpop.f32.mrf.mxu1  ;;  %v7246_v11 = vperm.slane %v7233_v3, 1 }
 0x480   : > { %v2095_v39 = vadd.f32 %v2094_v18, %v2030_v24 }
 0x481   : > { %9931 = vst [vmem:[#allocation58_spill] sm:$0xff] %v7226_v32 }
 0x482   : > { %2651 = vrot.lane.b32.xlu0 %v7197_v38, %s4501_s25  ;;  %v2160_v6 = vadd.f32 %v2159_v54, %v2095_v39  ;;  %v7275_v54 = vperm.slane %v7264_v49, 1 }
 0x483   : > { %3015 = vrot.lane.b32.xlu1 %v7197_v38, %s4503_s29  ;;  %2817 = vrot.lane.b32.xlu2 %v7197_v38, %s4502_s26 }
 0x484   : > { %v7241_v57 = vpop.permute.xlu0 %2303  ;;  %v2225_v41 = vadd.f32 %v2224_v26, %v2160_v6  ;;  %9939 = vst [vmem:[#allocation136_spill] sm:$0xff] %v7275_v54 }
 0x485   : > { %9932 = vst [vmem:[#allocation129_spill] sm:$0xff] %v7241_v57  ;;  %v7243_v32 = vpop.permute.xlu1 %2635  ;;  %v7248_v47 = vpop.permute.xlu2 %2307 }
 0x486   : > { %9933 = vst [vmem:[#allocation130_spill] sm:$0xff] %v7243_v32  ;;  %v2334_v45 = vsel %vm527_vm3, %v6858_v51, %v7248_v47  ;;  %v7293_v26 = vmax.f32 %v2225_v41, 0.0  ;;  %v2032_v57 = vpop.f32.mrf.mxu0 }
 0x487   : > { %9934 = vst [vmem:[#allocation131_spill] sm:$0xff] %v7248_v47  ;;  %v7255_v14 = vmul.f32 %v7246_v11, %v2334_v45 }
 0x488   : > { %9943 = vst [vmem:[#allocation140_spill] sm:$0xff] %v7293_v26 }
 0x489   : > { %9935 = vst [vmem:[#allocation132_spill] sm:$0xff] %v7255_v14 }
 0x48a   : > { %2321 = vrot.lane.b32.xlu0 %v7257_v13, %s4499_s23 }
 0x48b   : > { %2653 = vrot.lane.b32.xlu1 %v7257_v13, %s4501_s25  ;;  %2487 = vrot.lane.b32.xlu2 %v7257_v13, %s4500_s24 }
 0x48c   : > { %v7270_v18 = vpop.permute.xlu0 %2801 }
 0x48d   : > { %9937 = vst [vmem:[#allocation134_spill] sm:$0xff] %v7270_v18  ;;  %v7272_v24 = vpop.permute.xlu1 %2305  ;;  %v7277_v45 = vpop.permute.xlu2 %2805  ;;  %v7298_v18 = vld [vmem:[%s9187_s0 + $0x1] ss:$8 sm:$0x3] }
 0x48e   : > { %9938 = vst [vmem:[#allocation135_spill] sm:$0xff] %v7272_v24  ;;  %v2333_v39 = vsel %vm527_vm3, %v6822_v37, %v7272_v24  ;;  %v2832_v14 = vsel %vm790_vm2, %v6876_v33, %v7277_v45  ;;  %v7309_v41 = vperm.slane %v7298_v18, 1  ;;  %v2162_v33 = vpop.f32.mrf.mxu2 }
 0x48f   : > { %9940 = vst [vmem:[#allocation137_spill] sm:$0xff] %v7277_v45  ;;  %v7288_v32 = vmul.f32 %v7246_v11, %v2333_v39  ;;  %v7291_v6 = vmul.f32 %v7275_v54, %v2832_v14  ;;  %v1968_v45 = vadd.f32 %v6893_v12, %v6678_v2  ;;  %v2097_v14 = vpop.f32.mrf.mxu1 }
 0x490   : > { %9944 = vst [vmem:[#allocation141_spill] sm:$0xff] %v7309_v41 }
 0x491   : > { %9941 = vst [vmem:[#allocation138_spill] sm:$0xff] %v7288_v32 }
 0x492   : > { %9942 = vst [vmem:[#allocation139_spill] sm:$0xff] %v7291_v6  ;;  %2819 = vrot.lane.b32.xlu0 %v7257_v13, %s4502_s26  ;;  %v2033_v6 = vadd.f32 %v2032_v57, %v1968_v45 }
 0x493   : > { %2323 = vrot.lane.b32.xlu1 %v7293_v26, %s4499_s23  ;;  %3017 = vrot.lane.b32.xlu2 %v7257_v13, %s4503_s29 }
 0x494   : > { %v7311_v39 = vpop.permute.xlu0 %2471  ;;  %v2098_v47 = vadd.f32 %v2097_v14, %v2033_v6 }
 0x495   : > { %v7313_v32 = vpop.permute.xlu1 %2803  ;;  %v2499_v2 = vsel %vm614_vm1, %v6777_v30, %v7311_v39  ;;  %v7319_v12 = vpop.permute.xlu2 %2475 }
 0x496   : > { %9945 = vst [vmem:[#allocation142_spill] sm:$0xff] %v7313_v32  ;;  %v2831_v24 = vsel %vm790_vm2, %v6837_v42, %v7313_v32  ;;  %v7326_v37 = vmul.f32 %v7309_v41, %v2499_v2  ;;  %v2501_v45 = vsel %vm614_vm1, %v6889_v22, %v7319_v12  ;;  %v2163_v49 = vadd.f32 %v2162_v33, %v2098_v47  ;;  %v7341_v32 = vld [vmem:[%s9187_s0 + $0x5] ss:$8 sm:$0x3]  ;;  %v2227_v2 = vpop.f32.mrf.mxu3 }
 0x497   : > { %v7329_v57 = vmul.f32 %v7275_v54, %v2831_v24  ;;  %v7336_v51 = vmul.f32 %v7309_v41, %v2501_v45  ;;  %9949 = vst [vmem:[#allocation146_spill] sm:$0xff] %v7341_v32  ;;  %v7350_v24 = vperm.slane %v7341_v32, 1  ;;  %v1971_v32 = vadd.f32 %v6909_v21, %v6680_v48 }
 0x498   : > { %9946 = vst [vmem:[#allocation143_spill] sm:$0xff] %v7326_v37  ;;  %v2228_v33 = vadd.f32 %v2227_v2, %v2163_v49 }
 0x499   : > { %9947 = vst [vmem:[#allocation144_spill] sm:$0xff] %v7329_v57 }
 0x49a   : > { %9948 = vst [vmem:[#allocation145_spill] sm:$0xff] %v7336_v51  ;;  %2489 = vrot.lane.b32.xlu0 %v7293_v26, %s4500_s24 }
 0x49b   : > { %2821 = vrot.lane.b32.xlu1 %v7293_v26, %s4502_s26  ;;  %2655 = vrot.lane.b32.xlu2 %v7293_v26, %s4501_s25  ;;  %9950 = vst [vmem:[#allocation147_spill] sm:$0xff] %v7350_v24 }
 0x49c   : > { %v7352_v6 = vpop.permute.xlu0 %3001 }
 0x49d   : > { %9951 = vst [vmem:[#allocation148_spill] sm:$0xff] %v7352_v6  ;;  %v7354_v47 = vpop.permute.xlu1 %2473  ;;  %v3045_v14 = vsel %vm894_vm5, %v7352_v6, %v6795_v40  ;;  %v7360_v45 = vpop.permute.xlu2 %3005  ;;  %v7379_v6 = vmax.f32 %v2228_v33, 0.0 }
 0x49e   : > { %9952 = vst [vmem:[#allocation149_spill] sm:$0xff] %v7360_v45  ;;  %v2500_v57 = vsel %vm614_vm1, %v6856_v27, %v7354_v47  ;;  %v7367_v37 = vmul.f32 %v7350_v24, %v3045_v14  ;;  %v3047_v49 = vsel %vm894_vm5, %v7360_v45, %v6905_v60  ;;  %v2035_v40 = vpop.f32.mrf.mxu0  ;;  %v2100_v14 = vpop.f32.mrf.mxu1 }
 0x49f   : > { %v7370_v51 = vmul.f32 %v7309_v41, %v2500_v57  ;;  %v7377_v2 = vmul.f32 %v7350_v24, %v3047_v49  ;;  %9956 = vst [vmem:[#allocation153_spill] sm:$0xff] %v7379_v6  ;;  %v2036_v57 = vadd.f32 %v2035_v40, %v1971_v32 }
 0x4a0   : > { %9953 = vst [vmem:[#allocation150_spill] sm:$0xff] %v7367_v37  ;;  %v2165_v37 = vpop.f32.mrf.mxu2 }
 0x4a1   : > { %9954 = vst [vmem:[#allocation151_spill] sm:$0xff] %v7370_v51  ;;  %v2101_v33 = vadd.f32 %v2100_v14, %v2036_v57  ;;  %v2230_v14 = vpop.f32.mrf.mxu3 }
 0x4a2   : > { %9955 = vst [vmem:[#allocation152_spill] sm:$0xff] %v7377_v2  ;;  %3019 = vrot.lane.b32.xlu0 %v7293_v26, %s4503_s29 }
 0x4a3   : > { %2491 = vrot.lane.b32.xlu1 %v7379_v6, %s4500_s24  ;;  %2325 = vrot.lane.b32.xlu2 %v7379_v6, %s4499_s23  ;;  %v2166_v45 = vadd.f32 %v2165_v37, %v2101_v33 }
 0x4a4   : > { %v7389_v49 = vpop.permute.xlu0 %2639 }
 0x4a5   : > { %9957 = vst [vmem:[#allocation154_spill] sm:$0xff] %v7389_v49  ;;  %v7391_v2 = vpop.permute.xlu1 %3003  ;;  %v2666_v48 = vsel %vm702_vm4, %v6808_v43, %v7389_v49  ;;  %v7397_v21 = vpop.permute.xlu2 %2643 }
 0x4a6   : > { %9958 = vst [vmem:[#allocation155_spill] sm:$0xff] %v7391_v2  ;;  %v3046_v51 = vsel %vm894_vm5, %v7391_v2, %v6872_v1  ;;  %v7404_v40 = vmul.f32 %v7217_v62, %v2666_v48  ;;  %v2668_v60 = vsel %vm702_vm4, %v6921_v4, %v7397_v21 }
 0x4a7   : > { %9959 = vst [vmem:[#allocation156_spill] sm:$0xff] %v7397_v21  ;;  %v7407_v32 = vmul.f32 %v7350_v24, %v3046_v51  ;;  %v7414_v49 = vmul.f32 %v7217_v62, %v2668_v60  ;;  %v2231_v51 = vadd.f32 %v2230_v14, %v2166_v45 }
 0x4a8   : > { %9960 = vst [vmem:[#allocation157_spill] sm:$0xff] %v7404_v40 }
 0x4a9   : > { %9961 = vst [vmem:[#allocation158_spill] sm:$0xff] %v7407_v32  ;;  %v7446_v40 = vmax.f32 %v2231_v51, 0.0 }
 0x4aa   : > { %9962 = vst [vmem:[#allocation159_spill] sm:$0xff] %v7414_v49  ;;  %2657 = vrot.lane.b32.xlu0 %v7379_v6, %s4501_s25 }
 0x4ab   : > { %3021 = vrot.lane.b32.xlu1 %v7379_v6, %s4503_s29  ;;  %2823 = vrot.lane.b32.xlu2 %v7379_v6, %s4502_s26  ;;  %9967 = vst [vmem:[#allocation164_spill] sm:$0xff] %v7446_v40 }
 0x4ac   : > { %v7422_v57 = vpop.permute.xlu0 %2309 }
 0x4ad   : > { %9963 = vst [vmem:[#allocation160_spill] sm:$0xff] %v7422_v57  ;;  %v7424_v48 = vpop.permute.xlu1 %2641  ;;  %v2335_v37 = vsel %vm527_vm3, %v6843_v25, %v7422_v57  ;;  %v7430_v60 = vpop.permute.xlu2 %2313 }
 0x4ae   : > { %9964 = vst [vmem:[#allocation161_spill] sm:$0xff] %v7424_v48  ;;  %v2667_v33 = vsel %vm702_vm4, %v6887_v23, %v7424_v48  ;;  %v7437_v32 = vmul.f32 %v7246_v11, %v2335_v37  ;;  %v2337_v14 = vsel %vm527_vm3, %v6935_v0, %v7430_v60 }
 0x4af   : > { %v7440_v45 = vmul.f32 %v7217_v62, %v2667_v33  ;;  %v7449_v49 = vmul.f32 %v7246_v11, %v2337_v14 }
 0x4b0   : > { %9965 = vst [vmem:[#allocation162_spill] sm:$0xff] %v7437_v32 }
 0x4b1   : > { %9966 = vst [vmem:[#allocation163_spill] sm:$0xff] %v7440_v45 }
 0x4b2   : > { %9968 = vst [vmem:[#allocation165_spill] sm:$0xff] %v7449_v49  ;;  %2327 = vrot.lane.b32.xlu0 %v7446_v40, %s4499_s23 }
 0x4b3   : > { %3187 = vrot.lane.b32.xlu1 %v7379_v6, %s4504_s30  ;;  %2493 = vrot.lane.b32.xlu2 %v7446_v40, %s4500_s24 }
 0x4b4   : > { %v7457_v37 = vpop.permute.xlu0 %2807 }
 0x4b5   : > { %9969 = vst [vmem:[#allocation166_spill] sm:$0xff] %v7457_v37  ;;  %v7459_v33 = vpop.permute.xlu1 %2311  ;;  %v2833_v51 = vsel %vm790_vm2, %v6860_v17, %v7457_v37  ;;  %v7465_v14 = vpop.permute.xlu2 %2811  ;;  %v9992_v37 = vld [vmem:[#allocation79_spill] sm:$0xff] }
 0x4b6   : > { %9970 = vst [vmem:[#allocation167_spill] sm:$0xff] %v7459_v33  ;;  %v2336_v45 = vsel %vm527_vm3, %v6919_v15, %v7459_v33  ;;  %v7472_v32 = vmul.f32 %v7275_v54, %v2833_v51  ;;  %v2835_v1 = vsel %vm790_vm2, %v6949_v28, %v7465_v14 }
 0x4b7   : > { %9971 = vst [vmem:[#allocation168_spill] sm:$0xff] %v7465_v14  ;;  %v7475_v49 = vmul.f32 %v7246_v11, %v2336_v45  ;;  %v7482_v2 = vmul.f32 %v7275_v54, %v2835_v1 }
 0x4b8   : > { %9972 = vst [vmem:[#allocation169_spill] sm:$0xff] %v7472_v32 }
 0x4b9   : > { %9973 = vst [vmem:[#allocation170_spill] sm:$0xff] %v7475_v49 }
 0x4ba   : > { %9974 = vst [vmem:[#allocation171_spill] sm:$0xff] %v7482_v2  ;;  %2825 = vrot.lane.b32.xlu0 %v7446_v40, %s4502_s26 }
 0x4bb   : > { %2659 = vrot.lane.b32.xlu1 %v7446_v40, %s4501_s25  ;;  %3023 = vrot.lane.b32.xlu2 %v7446_v40, %s4503_s29 }
 0x4bc   : > { %v7490_v51 = vpop.permute.xlu0 %2477 }
 0x4bd   : > { %v7492_v45 = vpop.permute.xlu1 %2809  ;;  %v2502_v32 = vsel %vm614_vm1, %v6878_v63, %v7490_v51  ;;  %v7498_v1 = vpop.permute.xlu2 %2481 }
 0x4be   : > { %9975 = vst [vmem:[#allocation172_spill] sm:$0xff] %v7492_v45  ;;  %v2834_v2 = vsel %vm790_vm2, %v6933_v36, %v7492_v45  ;;  %v7505_v49 = vmul.f32 %v7309_v41, %v2502_v32  ;;  %v2504_v48 = vsel %vm614_vm1, %v6965_v50, %v7498_v1  ;;  %v10001_v36 = vld [vmem:[#allocation20_spill] sm:$0xff] }
 0x4bf   : > { %v7508_v43 = vmul.f32 %v7275_v54, %v2834_v2  ;;  %v7515_v23 = vmul.f32 %v7309_v41, %v2504_v48 }
 0x4c0   : > { %9976 = vst [vmem:[#allocation173_spill] sm:$0xff] %v7505_v49  ;;  %v9981_v49 = vld [vmem:[#allocation68_spill] sm:$0xff] }
 0x4c1   : > { %9977 = vst [vmem:[#allocation174_spill] sm:$0xff] %v7508_v43 }
 0x4c2   : > { %9978 = vst [vmem:[#allocation175_spill] sm:$0xff] %v7515_v23  ;;  %3355 = vrot.lane.b32.xlu0 %v7446_v40, %s4505_s9 }
 0x4c3   : > { %3153 = vrot.lane.b32.xlu1 %v6846_v29, %s4504_s30  ;;  %3189 = vrot.lane.b32.xlu2 %v7446_v40, %s4504_s30 }
 0x4c4   : > { %v7523_v32 = vpop.permute.xlu0 %3007 }
 0x4c5   : > { %9979 = vst [vmem:[#allocation176_spill] sm:$0xff] %v7523_v32  ;;  %v7525_v2 = vpop.permute.xlu1 %2479  ;;  %v3048_v43 = vsel %vm894_vm5, %v7523_v32, %v6891_v52  ;;  %v7531_v48 = vpop.permute.xlu2 %3011  ;;  %v9985_v32 = vld [vmem:[#allocation15_spill] sm:$0xff] }
 0x4c6   : > { %9980 = vst [vmem:[#allocation177_spill] sm:$0xff] %v7531_v48  ;;  %v2503_v23 = vsel %vm614_vm1, %v9981_v49, %v7525_v2  ;;  %v7538_v21 = vmul.f32 %v7350_v24, %v3048_v43  ;;  %v3050_v42 = vsel %vm894_vm5, %v7531_v48, %v6977_v34 }
 0x4c7   : > { %v7541_v4 = vmul.f32 %v7309_v41, %v2503_v23  ;;  %v7548_v52 = vmul.f32 %v7350_v24, %v3050_v42 }
 0x4c8   : > { %9982 = vst [vmem:[#allocation68_spill] sm:$0xff] %v7538_v21  ;;  %v9988_v21 = vld [vmem:[#allocation23_spill] sm:$0xff] }
 0x4c9   : > { %9983 = vst [vmem:[#allocation178_spill] sm:$0xff] %v7541_v4 }
 0x4ca   : > { %9984 = vst [vmem:[#allocation179_spill] sm:$0xff] %v7548_v52  ;;  %3321 = vrot.lane.b32.xlu0 %v9985_v32, %s4505_s9 }
 0x4cb   : > { %3353 = vrot.lane.b32.xlu1 %v7379_v6, %s4505_s9  ;;  %3185 = vrot.lane.b32.xlu2 %v7293_v26, %s4504_s30 }
 0x4cc   : > { %v7556_v43 = vpop.permute.xlu0 %2645 }
 0x4cd   : > { %9986 = vst [vmem:[#allocation180_spill] sm:$0xff] %v7556_v43  ;;  %v7558_v23 = vpop.permute.xlu1 %3009  ;;  %v2669_v4 = vsel %vm702_vm4, %v9988_v21, %v7556_v43  ;;  %v7564_v42 = vpop.permute.xlu2 %2649 }
 0x4ce   : > { %9987 = vst [vmem:[#allocation181_spill] sm:$0xff] %v7558_v23  ;;  %v3049_v52 = vsel %vm894_vm5, %v7558_v23, %v6963_v19  ;;  %v7571_v34 = vmul.f32 %v7217_v62, %v2669_v4  ;;  %v2671_v17 = vsel %vm702_vm4, %v9992_v37, %v7564_v42  ;;  %v9994_v4 = vld [vmem:[#allocation22_spill] sm:$0xff] }
 0x4cf   : > { %9989 = vst [vmem:[#allocation182_spill] sm:$0xff] %v7564_v42  ;;  %v7574_v48 = vmul.f32 %v7350_v24, %v3049_v52  ;;  %v7581_v43 = vmul.f32 %v7217_v62, %v2671_v17 }
 0x4d0   : > { %9990 = vst [vmem:[#allocation183_spill] sm:$0xff] %v7571_v34 }
 0x4d1   : > { %9991 = vst [vmem:[#allocation184_spill] sm:$0xff] %v7574_v48  ;;  %v9996_v48 = vld [vmem:[#allocation16_spill] sm:$0xff] }
 0x4d2   : > { %9993 = vst [vmem:[#allocation185_spill] sm:$0xff] %v7581_v43  ;;  %3183 = vrot.lane.b32.xlu0 %v7257_v13, %s4504_s30  ;;  %v9997_v43 = vld [vmem:[#allocation74_spill] sm:$0xff] }
 0x4d3   : > { %3319 = vrot.lane.b32.xlu1 %v6846_v29, %s4505_s9  ;;  %3151 = vrot.lane.b32.xlu2 %v9994_v4, %s4504_s30 }
 0x4d4   : > { %v7589_v34 = vpop.permute.xlu0 %2315 }
 0x4d5   : > { %v7591_v52 = vpop.permute.xlu1 %2647  ;;  %v2338_v19 = vsel %vm527_vm3, %v9996_v48, %v7589_v34  ;;  %v7597_v17 = vpop.permute.xlu2 %2319 }
 0x4d6   : > { %9995 = vst [vmem:[#allocation22_spill] sm:$0xff] %v7591_v52  ;;  %v2670_v23 = vsel %vm702_vm4, %v9997_v43, %v7591_v52  ;;  %v7604_v21 = vmul.f32 %v7246_v11, %v2338_v19  ;;  %v2340_v37 = vsel %vm527_vm3, %v7007_v46, %v7597_v17 }
 0x4d7   : > { %v7607_v42 = vmul.f32 %v7217_v62, %v2670_v23  ;;  %v7614_v45 = vmul.f32 %v7246_v11, %v2340_v37 }
 0x4d8   : > { %9998 = vst [vmem:[#allocation16_spill] sm:$0xff] %v7604_v21 }
 0x4d9   : > { %9999 = vst [vmem:[#allocation186_spill] sm:$0xff] %v7607_v42  ;;  %v10003_v42 = vld [vmem:[#allocation59_spill] sm:$0xff] }
 0x4da   : > { %10000 = vst [vmem:[#allocation187_spill] sm:$0xff] %v7614_v45  ;;  %3149 = vrot.lane.b32.xlu0 %v10001_v36, %s4504_s30  ;;  %v10005_v45 = vld [vmem:[#allocation78_spill] sm:$0xff] }
 0x4db   : > { %3181 = vrot.lane.b32.xlu1 %v7197_v38, %s4504_s30  ;;  %3351 = vrot.lane.b32.xlu2 %v7293_v26, %s4505_s9 }
 0x4dc   : > { %v7622_v19 = vpop.permute.xlu0 %2813 }
 0x4dd   : > { %10002 = vst [vmem:[#allocation20_spill] sm:$0xff] %v7622_v19  ;;  %v7624_v23 = vpop.permute.xlu1 %2317  ;;  %v2836_v21 = vsel %vm790_vm2, %v10003_v42, %v7622_v19  ;;  %v7630_v37 = vpop.permute.xlu2 %2817  ;;  %v10009_v42 = vld [vmem:[#allocation55_spill] sm:$0xff] }
 0x4de   : > { %10004 = vst [vmem:[#allocation188_spill] sm:$0xff] %v7630_v37  ;;  %v2339_v52 = vsel %vm527_vm3, %v10005_v45, %v7624_v23  ;;  %v7637_v43 = vmul.f32 %v7275_v54, %v2836_v21  ;;  %v2838_v28 = vsel %vm790_vm2, %v7021_v53, %v7630_v37 }
 0x4df   : > { %v7640_v14 = vmul.f32 %v7246_v11, %v2339_v52  ;;  %v7647_v19 = vmul.f32 %v7275_v54, %v2838_v28 }
 0x4e0   : > { %10006 = vst [vmem:[#allocation78_spill] sm:$0xff] %v7637_v43  ;;  %v10011_v43 = vld [vmem:[#allocation70_spill] sm:$0xff] }
 0x4e1   : > { %10007 = vst [vmem:[#allocation189_spill] sm:$0xff] %v7640_v14 }
 0x4e2   : > { %10008 = vst [vmem:[#allocation190_spill] sm:$0xff] %v7647_v19  ;;  %3349 = vrot.lane.b32.xlu0 %v7257_v13, %s4505_s9 }
 0x4e3   : > { %3147 = vrot.lane.b32.xlu1 %v10009_v42, %s4504_s30  ;;  %3317 = vrot.lane.b32.xlu2 %v9994_v4, %s4505_s9 }
 0x4e4   : > { %v7655_v21 = vpop.permute.xlu0 %2483 }
 0x4e5   : > { %v7657_v52 = vpop.permute.xlu1 %2815  ;;  %v2505_v14 = vsel %vm614_vm1, %v10011_v43, %v7655_v21  ;;  %v7663_v28 = vpop.permute.xlu2 %2487 }
 0x4e6   : > { %10010 = vst [vmem:[#allocation191_spill] sm:$0xff] %v7657_v52  ;;  %v2837_v19 = vsel %vm790_vm2, %v7005_v58, %v7657_v52  ;;  %v7670_v37 = vmul.f32 %v7309_v41, %v2505_v14  ;;  %v2507_v57 = vsel %vm614_vm1, %v7037_v5, %v7663_v28 }
 0x4e7   : > { %v7673_v53 = vmul.f32 %v7275_v54, %v2837_v19  ;;  %v7680_v25 = vmul.f32 %v7309_v41, %v2507_v57 }
 0x4e8   : > { %10012 = vst [vmem:[#allocation70_spill] sm:$0xff] %v7670_v37 }
 0x4e9   : > { %10013 = vst [vmem:[#allocation192_spill] sm:$0xff] %v7673_v53  ;;  %v10016_v53 = vld [vmem:[#allocation73_spill] sm:$0xff] }
 0x4ea   : > { %10014 = vst [vmem:[#allocation193_spill] sm:$0xff] %v7680_v25  ;;  %3315 = vrot.lane.b32.xlu0 %v10001_v36, %s4505_s9  ;;  %v10018_v25 = vld [vmem:[#allocation84_spill] sm:$0xff] }
 0x4eb   : > { %3347 = vrot.lane.b32.xlu1 %v7197_v38, %s4505_s9  ;;  %3179 = vrot.lane.b32.xlu2 %v7169_v20, %s4504_s30 }
 0x4ec   : > { %v7688_v14 = vpop.permute.xlu0 %3013 }
 0x4ed   : > { %10015 = vst [vmem:[#allocation194_spill] sm:$0xff] %v7688_v14  ;;  %v7690_v19 = vpop.permute.xlu1 %2485  ;;  %v3051_v37 = vsel %vm894_vm5, %v7688_v14, %v10016_v53  ;;  %v7696_v57 = vpop.permute.xlu2 %3017  ;;  %v10022_v14 = vld [vmem:[#allocation61_spill] sm:$0xff] }
 0x4ee   : > { %10017 = vst [vmem:[#allocation195_spill] sm:$0xff] %v7696_v57  ;;  %v2506_v52 = vsel %vm614_vm1, %v10018_v25, %v7690_v19  ;;  %v7703_v58 = vmul.f32 %v7350_v24, %v3051_v37  ;;  %v3053_v33 = vsel %vm894_vm5, %v7696_v57, %v7049_v10  ;;  %v10023_v37 = vld [vmem:[#allocation30_spill] sm:$0xff]  ;;  %v10030_v57 = vld [vmem:[#allocation95_spill] sm:$0xff] }
 0x4ef   : > { %v7706_v38 = vmul.f32 %v7309_v41, %v2506_v52  ;;  %v7713_v53 = vmul.f32 %v7350_v24, %v3053_v33 }
 0x4f0   : > { %10019 = vst [vmem:[#allocation84_spill] sm:$0xff] %v7703_v58 }
 0x4f1   : > { %10020 = vst [vmem:[#allocation196_spill] sm:$0xff] %v7706_v38  ;;  %v10026_v38 = vld [vmem:[#allocation76_spill] sm:$0xff] }
 0x4f2   : > { %10021 = vst [vmem:[#allocation197_spill] sm:$0xff] %v7713_v53  ;;  %3521 = vrot.lane.b32.xlu0 %v7446_v40, %s4506_s14 }
 0x4f3   : > { %3145 = vrot.lane.b32.xlu1 %v10022_v14, %s4504_s30  ;;  %3489 = vrot.lane.b32.xlu2 %v10023_v37, %s4506_s14 }
 0x4f4   : > { %v7721_v58 = vpop.permute.xlu0 %2651 }
 0x4f5   : > { %10024 = vst [vmem:[#allocation198_spill] sm:$0xff] %v7721_v58  ;;  %v7723_v52 = vpop.permute.xlu1 %3015  ;;  %v2672_v10 = vsel %vm702_vm4, %v10026_v38, %v7721_v58  ;;  %v7729_v33 = vpop.permute.xlu2 %2655 }
 0x4f6   : > { %10025 = vst [vmem:[#allocation199_spill] sm:$0xff] %v7723_v52  ;;  %v3052_v53 = vsel %vm894_vm5, %v7723_v52, %v7035_v61  ;;  %v7736_v40 = vmul.f32 %v7217_v62, %v2672_v10  ;;  %v2674_v15 = vsel %vm702_vm4, %v10030_v57, %v7729_v33 }
 0x4f7   : > { %10027 = vst [vmem:[#allocation200_spill] sm:$0xff] %v7729_v33  ;;  %v7739_v37 = vmul.f32 %v7350_v24, %v3052_v53  ;;  %v7746_v58 = vmul.f32 %v7217_v62, %v2674_v15 }
 0x4f8   : > { %10028 = vst [vmem:[#allocation201_spill] sm:$0xff] %v7736_v40 }
 0x4f9   : > { %10029 = vst [vmem:[#allocation202_spill] sm:$0xff] %v7739_v37  ;;  %v10033_v37 = vld [vmem:[#allocation80_spill] sm:$0xff] }
 0x4fa   : > { %10031 = vst [vmem:[#allocation203_spill] sm:$0xff] %v7746_v58  ;;  %3313 = vrot.lane.b32.xlu0 %v10009_v42, %s4505_s9  ;;  %v10034_v58 = vld [vmem:[#allocation90_spill] sm:$0xff]  ;;  %v10038_v42 = vld [vmem:[#allocation21_spill] sm:$0xff] }
 0x4fb   : > { %3345 = vrot.lane.b32.xlu1 %v7169_v20, %s4505_s9  ;;  %3177 = vrot.lane.b32.xlu2 %v7155_v56, %s4504_s30 }
 0x4fc   : > { %v7754_v10 = vpop.permute.xlu0 %2321 }
 0x4fd   : > { %v7756_v53 = vpop.permute.xlu1 %2653  ;;  %v2341_v40 = vsel %vm527_vm3, %v10033_v37, %v7754_v10  ;;  %v7762_v15 = vpop.permute.xlu2 %2325 }
 0x4fe   : > { %10032 = vst [vmem:[#allocation204_spill] sm:$0xff] %v7756_v53  ;;  %v2673_v61 = vsel %vm702_vm4, %v10034_v58, %v7756_v53  ;;  %v7769_v52 = vmul.f32 %v7246_v11, %v2341_v40  ;;  %v2343_v33 = vsel %vm527_vm3, %v7079_v31, %v7762_v15 }
 0x4ff   : > { %v7772_v38 = vmul.f32 %v7217_v62, %v2673_v61  ;;  %v7779_v57 = vmul.f32 %v7246_v11, %v2343_v33 }
 0x500   : > { %10035 = vst [vmem:[#allocation80_spill] sm:$0xff] %v7769_v52 }
 0x501   : > { %10036 = vst [vmem:[#allocation205_spill] sm:$0xff] %v7772_v38  ;;  %v10040_v38 = vld [vmem:[#allocation82_spill] sm:$0xff] }
 0x502   : > { %10037 = vst [vmem:[#allocation206_spill] sm:$0xff] %v7779_v57  ;;  %3519 = vrot.lane.b32.xlu0 %v7379_v6, %s4506_s14  ;;  %v10042_v57 = vld [vmem:[#allocation94_spill] sm:$0xff] }
 0x503   : > { %3143 = vrot.lane.b32.xlu1 %v10038_v42, %s4504_s30  ;;  %3487 = vrot.lane.b32.xlu2 %v9985_v32, %s4506_s14 }
 0x504   : > { %v7787_v40 = vpop.permute.xlu0 %2819 }
 0x505   : > { %10039 = vst [vmem:[#allocation21_spill] sm:$0xff] %v7787_v40  ;;  %v7789_v61 = vpop.permute.xlu1 %2323  ;;  %v2839_v52 = vsel %vm790_vm2, %v10040_v38, %v7787_v40  ;;  %v7795_v33 = vpop.permute.xlu2 %2823 }
 0x506   : > { %10041 = vst [vmem:[#allocation207_spill] sm:$0xff] %v7795_v33  ;;  %v2342_v6 = vsel %vm527_vm3, %v10042_v57, %v7789_v61  ;;  %v7802_v53 = vmul.f32 %v7275_v54, %v2839_v52  ;;  %v2841_v58 = vsel %vm790_vm2, %v7093_v55, %v7795_v33 }
 0x507   : > { %v7805_v32 = vmul.f32 %v7246_v11, %v2342_v6  ;;  %v7812_v20 = vmul.f32 %v7275_v54, %v2841_v58  ;;  %v7826_v58 = vperm.slane %v7298_v18, 0 }
 0x508   : > { %10043 = vst [vmem:[#allocation94_spill] sm:$0xff] %v7802_v53  ;;  %v10047_v53 = vld [vmem:[#allocation86_spill] sm:$0xff] }
 0x509   : > { %10044 = vst [vmem:[#allocation208_spill] sm:$0xff] %v7805_v32 }
 0x50a   : > { %10045 = vst [vmem:[#allocation209_spill] sm:$0xff] %v7812_v20  ;;  %3311 = vrot.lane.b32.xlu0 %v10022_v14, %s4505_s9 }
 0x50b   : > { %3343 = vrot.lane.b32.xlu1 %v7155_v56, %s4505_s9  ;;  %3175 = vrot.lane.b32.xlu2 %v7125_v44, %s4504_s30 }
 0x50c   : > { %v2490_v52 = vpop.permute.xlu0 %2489 }
 0x50d   : > { %v7820_v6 = vpop.permute.xlu1 %2821  ;;  %v2508_v32 = vsel %vm614_vm1, %v10047_v53, %v2490_v52  ;;  %v2494_v40 = vpop.permute.xlu2 %2493 }
 0x50e   : > { %10046 = vst [vmem:[#allocation210_spill] sm:$0xff] %v7820_v6  ;;  %v2840_v20 = vsel %vm790_vm2, %v7077_v16, %v7820_v6  ;;  %v7833_v14 = vmul.f32 %v7309_v41, %v2508_v32  ;;  %v2510_v38 = vsel %vm614_vm1, %v7109_v35, %v2494_v40  ;;  %v2526_v18 = vsel %vm614_vm1, %v2494_v40, %v7109_v35  ;;  %v10054_v40 = vld [vmem:[#allocation99_spill] sm:$0xff] }
 0x50f   : > { %v7836_v56 = vmul.f32 %v7275_v54, %v2840_v20  ;;  %v2563_v33 = vmul.f32 %v7826_v58, %v2526_v18  ;;  %v7846_v55 = vmul.f32 %v7309_v41, %v2510_v38  ;;  %v10051_v20 = vld [vmem:[#allocation27_spill] sm:$0xff] }
 0x510   : > { %10048 = vst [vmem:[#allocation86_spill] sm:$0xff] %v7833_v14  ;;  %v10053_v14 = vld [vmem:[#allocation89_spill] sm:$0xff] }
 0x511   : > { %10049 = vst [vmem:[#allocation211_spill] sm:$0xff] %v7836_v56  ;;  %3948 = vmatpush.msrb.mxu1 %v2563_v33 }
 0x512   : > { %10050 = vst [vmem:[#allocation212_spill] sm:$0xff] %v7846_v55  ;;  %3517 = vrot.lane.b32.xlu0 %v7293_v26, %s4506_s14  ;;  %v2524_v26 = vsel %vm614_vm1, %v2490_v52, %v10047_v53  ;;  %v4451_v53 = vld [vmem:[%s9187_s0 + $0x6] ss:$8 sm:$0x3] }
 0x513   : > { %3141 = vrot.lane.b32.xlu1 %v10051_v20, %s4504_s30  ;;  %3485 = vrot.lane.b32.xlu2 %v6846_v29, %s4506_s14  ;;  %v2559_v52 = vmul.f32 %v7826_v58, %v2524_v26  ;;  %v7906_v26 = vperm.slane %v4451_v53, 0 }
 0x514   : > { %v7854_v32 = vpop.permute.xlu0 %3019 }
 0x515   : > { %10052 = vst [vmem:[#allocation27_spill] sm:$0xff] %v7854_v32  ;;  %v2492_v56 = vpop.permute.xlu1 %2491  ;;  %v3054_v35 = vsel %vm894_vm5, %v7854_v32, %v10053_v14  ;;  %v7860_v38 = vpop.permute.xlu2 %3023 }
 0x516   : > { %v2509_v33 = vsel %vm614_vm1, %v10054_v40, %v2492_v56  ;;  %v2525_v18 = vsel %vm614_vm1, %v2492_v56, %v10054_v40  ;;  %v7869_v55 = vmul.f32 %v7350_v24, %v3054_v35  ;;  %v3056_v32 = vsel %vm894_vm5, %v7860_v38, %v7121_v59  ;;  %v10057_v35 = vld [vmem:[#allocation92_spill] sm:$0xff] }
 0x517   : > { %v2561_v29 = vmul.f32 %v7826_v58, %v2525_v18  ;;  %v7876_v14 = vmul.f32 %v7309_v41, %v2509_v33  ;;  %v7883_v6 = vmul.f32 %v7350_v24, %v3056_v32  ;;  %v2523_v56 = vsel %vm614_vm1, %v7663_v28, %v7037_v5 }
 0x518   : > { %10055 = vst [vmem:[#allocation99_spill] sm:$0xff] %v7869_v55  ;;  %v2522_v32 = vsel %vm614_vm1, %v7690_v19, %v10018_v25  ;;  %v7908_v28 = vperm.slane %v4451_v53, 1  ;;  %v2521_v25 = vsel %vm614_vm1, %v7655_v21, %v10011_v43  ;;  %v2520_v43 = vsel %vm614_vm1, %v7498_v1, %v6965_v50  ;;  %v10061_v55 = vld [vmem:[#allocation107_spill] sm:$0xff] }
 0x519   : > { %10056 = vst [vmem:[#allocation213_spill] sm:$0xff] %v7883_v6  ;;  %3949 = vmatpush.msrb.mxu1 %v2561_v29  ;;  %v2557_v29 = vmul.f32 %v7826_v58, %v2523_v56  ;;  %v2555_v18 = vmul.f32 %v7826_v58, %v2522_v32  ;;  %v10058_v56 = vld [vmem:[#allocation102_spill] sm:$0xff]  ;;  %v2519_v50 = vsel %vm614_vm1, %v7525_v2, %v9981_v49 }
 0x51a   : > { %3309 = vrot.lane.b32.xlu0 %v10038_v42, %s4505_s9  ;;  %v2518_v1 = vsel %vm614_vm1, %v7490_v51, %v6878_v63  ;;  %v2517_v49 = vsel %vm614_vm1, %v7319_v12, %v6889_v22  ;;  %v2549_v63 = vmul.f32 %v7826_v58, %v2519_v50 }
 0x51b   : > { %3341 = vrot.lane.b32.xlu1 %v7125_v44, %s4505_s9  ;;  %3173 = vrot.lane.b32.xlu2 %v7097_v7, %s4504_s30  ;;  %v2547_v2 = vmul.f32 %v7826_v58, %v2518_v1 }
 0x51c   : > { %3950 = vmatpush.msrb.mxu1 %v2559_v52  ;;  %v7904_v5 = vpop.permute.xlu0 %2657 }
 0x51d   : > { %v7914_v19 = vpop.permute.xlu1 %3021  ;;  %v2675_v40 = vsel %vm702_vm4, %v10057_v35, %v7904_v5  ;;  %v3190_v33 = vpop.permute.xlu2 %3189 }
 0x51e   : > { %v3055_v53 = vsel %vm894_vm5, %v7914_v19, %v10058_v56  ;;  %v7926_v52 = vmul.f32 %v7217_v62, %v2675_v40  ;;  %3951 = vmatpush.msrb.mxu1 %v2557_v29  ;;  %v3206_v32 = vsel %vm982_vm7, %v10061_v55, %v3190_v33  ;;  %v3222_v6 = vsel %vm982_vm7, %v3190_v33, %v10061_v55 }
 0x51f   : > { %v7933_v21 = vmul.f32 %v7350_v24, %v3055_v53  ;;  %v2553_v40 = vmul.f32 %v7826_v58, %v2521_v25  ;;  %v3259_v29 = vmul.f32 %v7906_v26, %v3206_v32  ;;  %v7944_v41 = vmul.f32 %v7908_v28, %v3222_v6  ;;  %v10063_v25 = vld [vmem:[#allocation98_spill] sm:$0xff]  ;;  %v10085_v24 = vld [vmem:[#allocation207_spill] sm:$0xff] }
 0x520   : > { %10059 = vst [vmem:[#allocation92_spill] sm:$0xff] %v7926_v52  ;;  %3952 = vmatpush.msrb.mxu1 %v2555_v18  ;;  %v2551_v55 = vmul.f32 %v7826_v58, %v2520_v43  ;;  %v7960_v6 = vperm.slane %v7233_v3, 0  ;;  %v2359_v3 = vsel %vm527_vm3, %v7762_v15, %v7079_v31  ;;  %v10064_v18 = vld [vmem:[#allocation96_spill] sm:$0xff] }
 0x521   : > { %10060 = vst [vmem:[#allocation102_spill] sm:$0xff] %v7933_v21  ;;  %4048 = vmatpush.msrb.mxu2 %v3259_v29  ;;  %v10065_v43 = vld [vmem:[#allocation104_spill] sm:$0xff]  ;;  %v2516_v29 = vsel %vm614_vm1, %v7354_v47, %v6856_v27  ;;  %v2515_v27 = vsel %vm614_vm1, %v7311_v39, %v6777_v30  ;;  %v2356_v39 = vsel %vm527_vm3, %v7597_v17, %v7007_v46  ;;  %v10071_v17 = vld [vmem:[#allocation106_spill] sm:$0xff] }
 0x522   : > { %10062 = vst [vmem:[#allocation107_spill] sm:$0xff] %v7944_v41  ;;  %3953 = vmatpush.msrb.mxu1 %v2553_v40  ;;  %3515 = vrot.lane.b32.xlu0 %v7257_v13, %s4506_s14  ;;  %v2543_v47 = vmul.f32 %v7826_v58, %v2516_v29  ;;  %v2541_v30 = vmul.f32 %v7826_v58, %v2515_v27  ;;  %v10075_v27 = vld [vmem:[#allocation103_spill] sm:$0xff]  ;;  %v10151_v52 = vld [vmem:[#allocation180_spill] sm:$0xff] }
 0x523   : > { %3171 = vrot.lane.b32.xlu1 %v10063_v25, %s4504_s30  ;;  %3483 = vrot.lane.b32.xlu2 %v9994_v4, %s4506_s14  ;;  %v2389_v29 = vmul.f32 %v7960_v6, %v2356_v39  ;;  %v10090_v41 = vld [vmem:[#allocation31_spill] sm:$0xff] }
 0x524   : > { %3954 = vmatpush.msrb.mxu1 %v2551_v55  ;;  %v2328_v51 = vpop.permute.xlu0 %2327  ;;  %v2545_v55 = vmul.f32 %v7826_v58, %v2517_v49  ;;  %v2357_v49 = vsel %vm527_vm3, %v7754_v10, %v10033_v37  ;;  %v10068_v10 = vld [vmem:[#allocation51_spill] sm:$0xff] }
 0x525   : > { %v3188_v33 = vpop.permute.xlu1 %3187  ;;  %v2344_v53 = vsel %vm527_vm3, %v10064_v18, %v2328_v51  ;;  %v2360_v22 = vsel %vm527_vm3, %v2328_v51, %v10064_v18  ;;  %v7980_v12 = vpop.permute.xlu2 %3185  ;;  %v2395_v51 = vmul.f32 %v7960_v6, %v2359_v3  ;;  %v2391_v18 = vmul.f32 %v7960_v6, %v2357_v49  ;;  %v10076_v49 = vld [vmem:[#allocation47_spill] sm:$0xff] }
 0x526   : > { %v3205_v32 = vsel %vm982_vm7, %v10065_v43, %v3188_v33  ;;  %v3221_v40 = vsel %vm982_vm7, %v3188_v33, %v10065_v43  ;;  %v2397_v31 = vmul.f32 %v7960_v6, %v2360_v22  ;;  %v7990_v15 = vmul.f32 %v7246_v11, %v2344_v53  ;;  %3955 = vmatpush.msrb.mxu1 %v2549_v63  ;;  %v10067_v63 = vld [vmem:[#allocation56_spill] sm:$0xff]  ;;  %v10070_v22 = vld [vmem:[#allocation97_spill] sm:$0xff] }
 0x527   : > { %v3257_v50 = vmul.f32 %v7906_v26, %v3205_v32  ;;  %v7998_v1 = vmul.f32 %v7908_v28, %v3221_v40  ;;  %v2358_v33 = vsel %vm527_vm3, %v7789_v61, %v10042_v57  ;;  %v2514_v57 = vsel %vm614_vm1, %v7183_v9, %v10067_v63  ;;  %v10120_v63 = vld [vmem:[#allocation166_spill] sm:$0xff] }
 0x528   : > { %3956 = vmatpush.msrb.mxu1 %v2547_v2  ;;  %3928 = vmatpush.msrb.mxu0 %v2397_v31  ;;  %v2393_v61 = vmul.f32 %v7960_v6, %v2358_v33  ;;  %v10069_v2 = vld [vmem:[#allocation121_spill] sm:$0xff]  ;;  %v2539_v31 = vmul.f32 %v7826_v58, %v2514_v57  ;;  %v10148_v9 = vld [vmem:[#allocation182_spill] sm:$0xff] }
 0x529   : > { %10066 = vst [vmem:[#allocation98_spill] sm:$0xff] %v7998_v1  ;;  %4049 = vmatpush.msrb.mxu2 %v3257_v50  ;;  %v2513_v3 = vsel %vm614_vm1, %v10069_v2, %v10068_v10  ;;  %v2355_v50 = vsel %vm527_vm3, %v7624_v23, %v10005_v45  ;;  %v10074_v33 = vld [vmem:[#allocation45_spill] sm:$0xff]  ;;  %v2353_v23 = vsel %vm527_vm3, %v7430_v60, %v6935_v0  ;;  %v10079_v0 = vld [vmem:[#allocation18_spill] sm:$0xff] }
 0x52a   : > { %3957 = vmatpush.msrb.mxu1 %v2545_v55  ;;  %3929 = vmatpush.msrb.mxu0 %v2395_v51  ;;  %v4452_v51 = vld [vmem:[%s9187_s0 + $0x7] ss:$8 sm:$0x3]  ;;  %v2537_v45 = vmul.f32 %v7826_v58, %v2513_v3  ;;  %v2387_v39 = vmul.f32 %v7960_v6, %v2355_v50 }
 0x52b   : > { %3481 = vrot.lane.b32.xlu1 %v10001_v36, %s4506_s14  ;;  %3339 = vrot.lane.b32.xlu0 %v7097_v7, %s4505_s9  ;;  %v10077_v57 = vld [vmem:[#allocation117_spill] sm:$0xff]  ;;  %v8085_v3 = vperm.slane %v4452_v51, 1 }
 0x52c   : > { %3307 = vrot.lane.b32.xlu2 %v10051_v20, %s4505_s9  ;;  %3958 = vmatpush.msrb.mxu1 %v2543_v47  ;;  %v2826_v37 = vpop.permute.xlu0 %2825  ;;  %v2511_v47 = vsel %vm614_vm1, %v10075_v27, %v10074_v33  ;;  %v10111_v33 = vld [vmem:[#allocation62_spill] sm:$0xff] }
 0x52d   : > { %v8036_v53 = vpop.permute.xlu1 %2659  ;;  %v2842_v43 = vsel %vm790_vm2, %v10070_v22, %v2826_v37  ;;  %3930 = vmatpush.msrb.mxu0 %v2393_v61  ;;  %v8041_v46 = vpop.permute.xlu2 %3151  ;;  %v2512_v61 = vsel %vm614_vm1, %v10077_v57, %v10076_v49  ;;  %v10114_v27 = vld [vmem:[#allocation114_spill] sm:$0xff]  ;;  %v10118_v49 = vld [vmem:[#allocation172_spill] sm:$0xff] }
 0x52e   : > { %v2676_v32 = vsel %vm702_vm4, %v10071_v17, %v8036_v53  ;;  %v8048_v40 = vmul.f32 %v7275_v54, %v2842_v43  ;;  %3959 = vmatpush.msrb.mxu1 %v2541_v30  ;;  %v2354_v30 = vsel %vm527_vm3, %v7589_v34, %v9996_v48  ;;  %v8083_v43 = vperm.slane %v4452_v51, 0  ;;  %v10080_v34 = vld [vmem:[#allocation93_spill] sm:$0xff]  ;;  %v10084_v54 = vld [vmem:[#allocation100_spill] sm:$0xff] }
 0x52f   : > { %v8057_v55 = vmul.f32 %v7217_v62, %v2676_v32  ;;  %3931 = vmatpush.msrb.mxu0 %v2391_v18  ;;  %v2858_v18 = vsel %vm790_vm2, %v2826_v37, %v10070_v22  ;;  %v10078_v32 = vld [vmem:[#allocation133_spill] sm:$0xff]  ;;  %v2535_v60 = vmul.f32 %v7826_v58, %v2512_v61  ;;  %v2533_v48 = vmul.f32 %v7826_v58, %v2511_v47  ;;  %v10081_v22 = vld [vmem:[#allocation44_spill] sm:$0xff] }
 0x530   : > { %10072 = vst [vmem:[#allocation96_spill] sm:$0xff] %v8048_v40  ;;  %3960 = vmatpush.msrb.mxu1 %v2539_v31  ;;  %v8088_v31 = vperm.slane %v10078_v32, 0  ;;  %v2383_v37 = vmul.f32 %v7960_v6, %v2353_v23  ;;  %v2385_v51 = vmul.f32 %v7960_v6, %v2354_v30  ;;  %v2857_v61 = vsel %vm790_vm2, %v10085_v24, %v10084_v54  ;;  %v10086_v23 = vld [vmem:[#allocation101_spill] sm:$0xff]  ;;  %v10091_v40 = vld [vmem:[#allocation160_spill] sm:$0xff] }
 0x531   : > { %10073 = vst [vmem:[#allocation104_spill] sm:$0xff] %v8057_v55  ;;  %3932 = vmatpush.msrb.mxu0 %v2389_v29  ;;  %v10082_v29 = vld [vmem:[#allocation167_spill] sm:$0xff]  ;;  %v10153_v55 = vld [vmem:[#allocation22_spill] sm:$0xff] }
 0x532   : > { %3961 = vmatpush.msrb.mxu1 %v2537_v45  ;;  %v2352_v50 = vsel %vm527_vm3, %v10082_v29, %v10081_v22  ;;  %v10083_v45 = vld [vmem:[#allocation123_spill] sm:$0xff]  ;;  %v2895_v58 = vmul.f32 %v8088_v31, %v2858_v18 }
 0x533   : > { %3305 = vrot.lane.b32.xlu1 %v10079_v0, %s4505_s9  ;;  %3169 = vrot.lane.b32.xlu0 %v10080_v34, %s4504_s30 }
 0x534   : > { %3513 = vrot.lane.b32.xlu2 %v10083_v45, %s4506_s14  ;;  %3933 = vmatpush.msrb.mxu0 %v2387_v39  ;;  %v3356_v32 = vpop.permute.xlu0 %3355 }
 0x535   : > { %3962 = vmatpush.msrb.mxu1 %v2535_v60  ;;  %v3154_v47 = vpop.permute.xlu1 %3153  ;;  %v3372_v22 = vsel %vm1070_vm6, %v10086_v23, %v3356_v32  ;;  %v3388_v30 = vsel %vm1070_vm6, %v3356_v32, %v10086_v23  ;;  %v8115_v29 = vpop.permute.xlu2 %3351  ;;  %v10088_v60 = vld [vmem:[#allocation210_spill] sm:$0xff] }
 0x536   : > { %v3204_v39 = vsel %vm982_vm7, %v3154_v47, %v7980_v12  ;;  %v3220_v54 = vsel %vm982_vm7, %v7980_v12, %v3154_v47  ;;  %v3425_v24 = vmul.f32 %v8083_v43, %v3372_v22  ;;  %v8125_v18 = vmul.f32 %v8085_v3, %v3388_v30  ;;  %3934 = vmatpush.msrb.mxu0 %v2385_v51  ;;  %v10092_v22 = vld [vmem:[#allocation82_spill] sm:$0xff]  ;;  %v10093_v30 = vld [vmem:[#allocation21_spill] sm:$0xff] }
 0x537   : > { %v2856_v32 = vsel %vm790_vm2, %v10088_v60, %v7077_v16  ;;  %v3255_v23 = vmul.f32 %v7906_v26, %v3204_v39  ;;  %v8133_v1 = vmul.f32 %v7908_v28, %v3220_v54  ;;  %3963 = vmatpush.msrb.mxu1 %v2533_v48  ;;  %v2351_v12 = vsel %vm527_vm3, %v10091_v40, %v10090_v41  ;;  %v10094_v39 = vld [vmem:[#allocation7_spill] sm:$0xff]  ;;  %v3626_v40 = vld [vmem:[%s9193_s6 + $0x8] sm:$0xff] }
 0x538   : > { %10087 = vst [vmem:[#allocation97_spill] sm:$0xff] %v8125_v18  ;;  %v2381_v47 = vmul.f32 %v7960_v6, %v2352_v50  ;;  %v2893_v51 = vmul.f32 %v8088_v31, %v2857_v61  ;;  %3935 = vmatpush.msrb.mxu0 %v2383_v37  ;;  %v2855_v16 = vsel %vm790_vm2, %v10093_v30, %v10092_v22  ;;  %v10095_v48 = vld [vmem:[#allocation131_spill] sm:$0xff]  ;;  %v10096_v50 = vld [vmem:[#allocation85_spill] sm:$0xff]  ;;  %v10097_v61 = vld [vmem:[#allocation188_spill] sm:$0xff] }
 0x539   : > { %10089 = vst [vmem:[#allocation106_spill] sm:$0xff] %v8133_v1  ;;  %3988 = vmatpush.msra.mxu1 %v2895_v58  ;;  %4050 = vmatpush.msrb.mxu2 %v3255_v23  ;;  %v2350_v54 = vsel %vm527_vm3, %v10095_v48, %v10094_v39  ;;  %v2891_v41 = vmul.f32 %v8088_v31, %v2856_v32  ;;  %v10099_v60 = vld [vmem:[#allocation55_spill] sm:$0xff]  ;;  %v10100_v32 = vld [vmem:[#allocation12_spill] sm:$0xff]  ;;  %v10102_v30 = vld [vmem:[#allocation81_spill] sm:$0xff] }
 0x53a   : > { %4068 = vmatpush.msrb.mxu3 %v3425_v24  ;;  %3936 = vmatpush.msrb.mxu0 %v2381_v47  ;;  %v2379_v37 = vmul.f32 %v7960_v6, %v2351_v12  ;;  %v2854_v58 = vsel %vm790_vm2, %v10097_v61, %v10096_v50  ;;  %v10098_v24 = vld [vmem:[#allocation116_spill] sm:$0xff]  ;;  %v10101_v23 = vld [vmem:[#allocation135_spill] sm:$0xff]  ;;  %v2377_v22 = vmul.f32 %v7960_v6, %v2350_v54 }
 0x53b   : > { %3989 = vmatpush.msra.mxu1 %v2893_v51  ;;  %3511 = vrot.lane.b32.xlu1 %v10098_v24, %s4506_s14  ;;  %v2349_v47 = vsel %vm527_vm3, %v10101_v23, %v10100_v32  ;;  %v2889_v51 = vmul.f32 %v8088_v31, %v2855_v16  ;;  %v10103_v39 = vld [vmem:[#allocation191_spill] sm:$0xff]  ;;  %v10104_v32 = vld [vmem:[#allocation28_spill] sm:$0xff]  ;;  %v10105_v23 = vld [vmem:[#allocation129_spill] sm:$0xff] }
 0x53c   : > { %3479 = vrot.lane.b32.xlu0 %v10099_v60, %s4506_s14  ;;  %3337 = vrot.lane.b32.xlu2 %v10063_v25, %s4505_s9  ;;  %v3322_v12 = vpop.permute.xlu0 %3321  ;;  %v2853_v48 = vsel %vm790_vm2, %v10103_v39, %v10102_v30  ;;  %v2348_v16 = vsel %vm527_vm3, %v10105_v23, %v10104_v32  ;;  %v10106_v30 = vld [vmem:[#allocation59_spill] sm:$0xff]  ;;  %v10107_v39 = vld [vmem:[#allocation20_spill] sm:$0xff] }
 0x53d   : > { %3990 = vmatpush.msra.mxu1 %v2891_v41  ;;  %3937 = vmatpush.msrb.mxu0 %v2379_v37  ;;  %v3354_v50 = vpop.permute.xlu1 %3353  ;;  %v8174_v61 = vpop.permute.xlu2 %3317  ;;  %v2887_v41 = vmul.f32 %v8088_v31, %v2854_v58  ;;  %v2375_v37 = vmul.f32 %v7960_v6, %v2349_v47  ;;  %v10109_v58 = vld [vmem:[#allocation17_spill] sm:$0xff]  ;;  %v2373_v10 = vmul.f32 %v7960_v6, %v2348_v16 }
 0x53e   : > { %3964 = vmatmul.f32.vlgmr.msrb.gmra.mxu1 %v3626_v40  ;;  %v3371_v54 = vsel %vm1070_vm6, %v3322_v12, %v3354_v50  ;;  %v3387_v18 = vsel %vm1070_vm6, %v3354_v50, %v3322_v12  ;;  %v2852_v40 = vsel %vm790_vm2, %v10107_v39, %v10106_v30  ;;  %v10112_v12 = vld [vmem:[#allocation111_spill] sm:$0xff]  ;;  %v10113_v50 = vld [vmem:[#allocation52_spill] sm:$0xff] }
 0x53f   : > { %3991 = vmatpush.msra.mxu1 %v2889_v51  ;;  %v3423_v1 = vmul.f32 %v8083_v43, %v3371_v54  ;;  %v8192_v62 = vmul.f32 %v8085_v3, %v3387_v18  ;;  %3938 = vmatpush.msrb.mxu0 %v2377_v22  ;;  %v10110_v51 = vld [vmem:[#allocation109_spill] sm:$0xff]  ;;  %v2347_v47 = vsel %vm527_vm3, %v10112_v12, %v10111_v33  ;;  %v10116_v22 = vld [vmem:[#allocation168_spill] sm:$0xff] }
 0x540   : > { %v2345_v21 = vsel %vm527_vm3, %v10110_v51, %v10109_v58  ;;  %v2346_v30 = vsel %vm527_vm3, %v10114_v27, %v10113_v50  ;;  %v2885_v54 = vmul.f32 %v8088_v31, %v2853_v48  ;;  %v10115_v18 = vld [vmem:[#allocation69_spill] sm:$0xff]  ;;  %v2883_v2 = vmul.f32 %v8088_v31, %v2852_v40 }
 0x541   : > { %10108 = vst [vmem:[#allocation133_spill] sm:$0xff] %v8192_v62  ;;  %3992 = vmatpush.msra.mxu1 %v2887_v41  ;;  %v2851_v39 = vsel %vm790_vm2, %v10116_v22, %v10115_v18  ;;  %v10117_v62 = vld [vmem:[#allocation8_spill] sm:$0xff]  ;;  %3939 = vmatpush.msrb.mxu0 %v2375_v37  ;;  %v2371_v48 = vmul.f32 %v7960_v6, %v2347_v47  ;;  %v10119_v22 = vld [vmem:[#allocation63_spill] sm:$0xff]  ;;  %v10322_v8 = vld [vmem:[#allocation97_spill] sm:$0xff] }
 0x542   : > { %v2850_v57 = vsel %vm790_vm2, %v10118_v49, %v10117_v62  ;;  %4069 = vmatpush.msrb.mxu3 %v3423_v1  ;;  %v2369_v41 = vmul.f32 %v7960_v6, %v2346_v30  ;;  %v2367_v18 = vmul.f32 %v7960_v6, %v2345_v21  ;;  %v2849_v62 = vsel %vm790_vm2, %v10120_v63, %v10119_v22  ;;  %v10122_v37 = vld [vmem:[#allocation124_spill] sm:$0xff]  ;;  %v10123_v6 = vld [vmem:[#allocation87_spill] sm:$0xff] }
 0x543   : > { %3993 = vmatpush.msra.mxu1 %v2885_v54  ;;  %3940 = vmatpush.msrb.mxu0 %v2373_v10  ;;  %v2881_v1 = vmul.f32 %v8088_v31, %v2851_v39  ;;  %v2879_v49 = vmul.f32 %v8088_v31, %v2850_v57  ;;  %v10121_v10 = vld [vmem:[#allocation29_spill] sm:$0xff]  ;;  %v8231_v40 = vperm.slane %v10122_v37, 0  ;;  %v2692_v21 = vsel %vm702_vm4, %v8036_v53, %v10071_v17  ;;  %v10125_v39 = vld [vmem:[#allocation64_spill] sm:$0xff] }
 0x544   : > { %3335 = vrot.lane.b32.xlu1 %v10080_v34, %s4505_s9  ;;  %3303 = vrot.lane.b32.xlu0 %v10121_v10, %s4505_s9  ;;  %v3184_v16 = vpop.permute.xlu0 %3183  ;;  %v2691_v22 = vsel %vm702_vm4, %v7904_v5, %v10057_v35  ;;  %v10130_v35 = vld [vmem:[#allocation95_spill] sm:$0xff] }
 0x545   : > { %3994 = vmatpush.msra.mxu1 %v2883_v2  ;;  %3167 = vrot.lane.b32.xlu2 %v10123_v6, %s4504_s30  ;;  %v3320_v63 = vpop.permute.xlu1 %3319  ;;  %v3203_v2 = vsel %vm982_vm7, %v8041_v46, %v3184_v16  ;;  %v3219_v57 = vsel %vm982_vm7, %v3184_v16, %v8041_v46  ;;  %v8245_v47 = vpop.permute.xlu2 %3179  ;;  %v2729_v37 = vmul.f32 %v8231_v40, %v2692_v21 }
 0x546   : > { %3941 = vmatpush.msrb.mxu0 %v2371_v48  ;;  %v3370_v53 = vsel %vm1070_vm6, %v3320_v63, %v8115_v29  ;;  %v3386_v17 = vsel %vm1070_vm6, %v8115_v29, %v3320_v63  ;;  %v3253_v30 = vmul.f32 %v7906_v26, %v3203_v2  ;;  %v8255_v54 = vmul.f32 %v7908_v28, %v3219_v57  ;;  %v10126_v48 = vld [vmem:[#allocation137_spill] sm:$0xff]  ;;  %v8274_v63 = vld [vmem:[%s9193_s6] sm:$0xff]  ;;  %v10128_v2 = vld [vmem:[#allocation50_spill] sm:$0xff] }
 0x547   : > { %3995 = vmatpush.msra.mxu1 %v2881_v1  ;;  %v2848_v46 = vsel %vm790_vm2, %v10126_v48, %v10125_v39  ;;  %v3421_v1 = vmul.f32 %v8083_v43, %v3370_v53  ;;  %v8267_v16 = vmul.f32 %v8085_v3, %v3386_v17  ;;  %v2877_v29 = vmul.f32 %v8088_v31, %v2849_v62  ;;  %v10129_v57 = vld [vmem:[#allocation142_spill] sm:$0xff]  ;;  %v10131_v53 = vld [vmem:[#allocation200_spill] sm:$0xff]  ;;  %v10132_v62 = vld [vmem:[#allocation39_spill] sm:$0xff] }
 0x548   : > { %10124 = vst [vmem:[#allocation18_spill] sm:$0xff] %v8255_v54  ;;  %3942 = vmatpush.msrb.mxu0 %v2369_v41  ;;  %4051 = vmatpush.msrb.mxu2 %v3253_v30  ;;  %v2847_v5 = vsel %vm790_vm2, %v10129_v57, %v10128_v2  ;;  %v2690_v41 = vsel %vm702_vm4, %v10131_v53, %v10130_v35  ;;  %v10134_v39 = vld [vmem:[#allocation90_spill] sm:$0xff]  ;;  %v10135_v48 = vld [vmem:[#allocation204_spill] sm:$0xff]  ;;  %v10136_v57 = vld [vmem:[#allocation83_spill] sm:$0xff] }
 0x549   : > { %10127 = vst [vmem:[#allocation93_spill] sm:$0xff] %v8267_v16  ;;  %3996 = vmatpush.msra.mxu1 %v2879_v49  ;;  %4070 = vmatpush.msrb.mxu3 %v3421_v1  ;;  %v10133_v49 = vld [vmem:[#allocation134_spill] sm:$0xff]  ;;  %v2875_v17 = vmul.f32 %v8088_v31, %v2848_v46  ;;  %v2727_v30 = vmul.f32 %v8231_v40, %v2691_v22  ;;  %v10138_v1 = vld [vmem:[#allocation113_spill] sm:$0xff]  ;;  %v10140_v53 = vld [vmem:[#allocation115_spill] sm:$0xff] }
 0x54a   : > { %3943 = vmatpush.msrb.mxu0 %v2367_v18  ;;  %v2846_v21 = vsel %vm790_vm2, %v10133_v49, %v10132_v62  ;;  %v2689_v2 = vsel %vm702_vm4, %v10135_v48, %v10134_v39  ;;  %v10137_v18 = vld [vmem:[#allocation67_spill] sm:$0xff]  ;;  %v2873_v46 = vmul.f32 %v8088_v31, %v2847_v5  ;;  %v2725_v22 = vmul.f32 %v8231_v40, %v2690_v41  ;;  %v10141_v48 = vld [vmem:[#allocation76_spill] sm:$0xff]  ;;  %v10142_v16 = vld [vmem:[#allocation198_spill] sm:$0xff] }
 0x54b   : > { %3997 = vmatpush.msra.mxu1 %v2877_v29  ;;  %3944 = vmatmul.f32.vlgmr.msrb.gmra.mxu0 %v8274_v63  ;;  %v2843_v35 = vsel %vm790_vm2, %v10138_v1, %v10137_v18  ;;  %v2688_v62 = vsel %vm702_vm4, %v10142_v16, %v10141_v48  ;;  %v10143_v49 = vld [vmem:[#allocation112_spill] sm:$0xff]  ;;  %v10144_v5 = vld [vmem:[#allocation61_spill] sm:$0xff]  ;;  %v2723_v18 = vmul.f32 %v8231_v40, %v2689_v2  ;;  %v10147_v54 = vld [vmem:[#allocation79_spill] sm:$0xff] }
 0x54c   : > { %3968 = vmatpush.msra.mxu0 %v2729_v37  ;;  %3165 = vrot.lane.b32.xlu1 %v10136_v57, %s4504_s30  ;;  %v3150_v29 = vpop.permute.xlu0 %3149  ;;  %v10139_v37 = vld [vmem:[#allocation60_spill] sm:$0xff]  ;;  %v10145_v48 = vld [vmem:[#allocation33_spill] sm:$0xff] }
 0x54d   : > { %3998 = vmatpush.msra.mxu1 %v2875_v17  ;;  %v2845_v39 = vsel %vm790_vm2, %v10140_v53, %v10139_v37  ;;  %3509 = vrot.lane.b32.xlu0 %v10143_v49, %s4506_s14  ;;  %v3182_v41 = vpop.permute.xlu1 %3181  ;;  %v2871_v17 = vmul.f32 %v8088_v31, %v2846_v21  ;;  %v10146_v37 = vld [vmem:[#allocation118_spill] sm:$0xff]  ;;  %v2687_v21 = vsel %vm702_vm4, %v10148_v9, %v10147_v54 }
 0x54e   : > { %3969 = vmatpush.msra.mxu0 %v2727_v30  ;;  %3477 = vrot.lane.b32.xlu2 %v10144_v5, %s4506_s14  ;;  %v8315_v30 = vpop.permute.xlu2 %3489  ;;  %v3202_v1 = vsel %vm982_vm7, %v3150_v29, %v3182_v41  ;;  %v3218_v16 = vsel %vm982_vm7, %v3182_v41, %v3150_v29  ;;  %v2844_v53 = vsel %vm790_vm2, %v10146_v37, %v10145_v48  ;;  %v10152_v37 = vld [vmem:[#allocation74_spill] sm:$0xff] }
 0x54f   : > { %3999 = vmatpush.msra.mxu1 %v2873_v46  ;;  %v3251_v2 = vmul.f32 %v7906_v26, %v3202_v1  ;;  %v8333_v46 = vmul.f32 %v7908_v28, %v3218_v16  ;;  %v2721_v41 = vmul.f32 %v8231_v40, %v2688_v62  ;;  %v2869_v48 = vmul.f32 %v8088_v31, %v2845_v39  ;;  %v10154_v54 = vld [vmem:[#allocation146_spill] sm:$0xff]  ;;  %v10156_v39 = vld [vmem:[#allocation156_spill] sm:$0xff] }
 0x550   : > { %3970 = vmatpush.msra.mxu0 %v2725_v22  ;;  %v10150_v22 = vld [vmem:[#allocation23_spill] sm:$0xff]  ;;  %v2686_v9 = vsel %vm702_vm4, %v10153_v55, %v10152_v37  ;;  %v8346_v1 = vperm.slane %v10154_v54, 0  ;;  %v2719_v16 = vmul.f32 %v8231_v40, %v2687_v21  ;;  %v2867_v62 = vmul.f32 %v8088_v31, %v2844_v53  ;;  %v10157_v37 = vld [vmem:[#allocation13_spill] sm:$0xff] }
 0x551   : > { %10149 = vst [vmem:[#allocation44_spill] sm:$0xff] %v8333_v46  ;;  %v2685_v29 = vsel %vm702_vm4, %v10151_v52, %v10150_v22  ;;  %4000 = vmatpush.msra.mxu1 %v2871_v17  ;;  %4052 = vmatpush.msrb.mxu2 %v3251_v2  ;;  %v3040_v52 = vsel %vm894_vm5, %v7121_v59, %v7860_v38  ;;  %v10158_v17 = vld [vmem:[#allocation161_spill] sm:$0xff]  ;;  %v10159_v53 = vld [vmem:[#allocation27_spill] sm:$0xff] }
 0x552   : > { %3971 = vmatpush.msra.mxu0 %v2723_v18  ;;  %v10155_v18 = vld [vmem:[#allocation65_spill] sm:$0xff]  ;;  %v2683_v2 = vsel %vm702_vm4, %v10158_v17, %v10157_v37  ;;  %v2715_v21 = vmul.f32 %v8231_v40, %v2685_v29  ;;  %v2865_v59 = vmul.f32 %v8088_v31, %v2843_v35  ;;  %v2717_v38 = vmul.f32 %v8231_v40, %v2686_v9  ;;  %v3628_v17 = vld [vmem:[%s9193_s6 + $0x18] sm:$0xff] }
 0x553   : > { %4001 = vmatpush.msra.mxu1 %v2869_v48  ;;  %v2684_v55 = vsel %vm702_vm4, %v10156_v39, %v10155_v18  ;;  %v10160_v48 = vld [vmem:[#allocation89_spill] sm:$0xff]  ;;  %v3093_v54 = vmul.f32 %v8346_v1, %v3040_v52 }
 0x554   : > { %3972 = vmatpush.msra.mxu0 %v2721_v41  ;;  %3475 = vrot.lane.b32.xlu1 %v10038_v42, %s4506_s14  ;;  %v3038_v22 = vsel %vm894_vm5, %v10160_v48, %v10159_v53  ;;  %v3039_v41 = vsel %vm894_vm5, %v10058_v56, %v7914_v19  ;;  %v3350_v29 = vpop.permute.xlu0 %3349  ;;  %v10161_v31 = vld [vmem:[#allocation25_spill] sm:$0xff]  ;;  %v10166_v48 = vld [vmem:[#allocation195_spill] sm:$0xff] }
 0x555   : > { %4002 = vmatpush.msra.mxu1 %v2867_v62  ;;  %3333 = vrot.lane.b32.xlu0 %v10123_v6, %s4505_s9  ;;  %v3148_v35 = vpop.permute.xlu1 %3147  ;;  %v3369_v9 = vsel %vm1070_vm6, %v8174_v61, %v3350_v29  ;;  %v3385_v19 = vsel %vm1070_vm6, %v3350_v29, %v8174_v61  ;;  %v3091_v18 = vmul.f32 %v8346_v1, %v3039_v41  ;;  %v10167_v41 = vld [vmem:[#allocation91_spill] sm:$0xff] }
 0x556   : > { %3973 = vmatpush.msra.mxu0 %v2719_v16  ;;  %3301 = vrot.lane.b32.xlu2 %v10161_v31, %s4505_s9  ;;  %v8386_v56 = vpop.permute.xlu2 %3177  ;;  %v3201_v16 = vsel %vm982_vm7, %v3148_v35, %v8245_v47  ;;  %v3217_v52 = vsel %vm982_vm7, %v8245_v47, %v3148_v35  ;;  %v3419_v62 = vmul.f32 %v8083_v43, %v3369_v9  ;;  %v10164_v47 = vld [vmem:[#allocation34_spill] sm:$0xff]  ;;  %v10169_v9 = vld [vmem:[#allocation128_spill] sm:$0xff] }
 0x557   : > { %4003 = vmatpush.msra.mxu1 %v2865_v59  ;;  %v3249_v39 = vmul.f32 %v7906_v26, %v3201_v16  ;;  %v8398_v61 = vmul.f32 %v7908_v28, %v3217_v52  ;;  %v8401_v37 = vmul.f32 %v8085_v3, %v3385_v19  ;;  %v2713_v59 = vmul.f32 %v8231_v40, %v2684_v55  ;;  %v10168_v35 = vld [vmem:[#allocation66_spill] sm:$0xff]  ;;  %v10170_v19 = vld [vmem:[#allocation199_spill] sm:$0xff]  ;;  %v10171_v16 = vld [vmem:[#allocation88_spill] sm:$0xff] }
 0x558   : > { %3974 = vmatpush.msra.mxu0 %v2717_v38  ;;  %4071 = vmatpush.msrb.mxu3 %v3419_v62  ;;  %v10165_v38 = vld [vmem:[#allocation154_spill] sm:$0xff]  ;;  %v3037_v29 = vsel %vm894_vm5, %v10167_v41, %v10166_v48  ;;  %v2681_v55 = vsel %vm702_vm4, %v10169_v9, %v10168_v35  ;;  %v3036_v52 = vsel %vm894_vm5, %v10171_v16, %v10170_v19  ;;  %v10172_v62 = vld [vmem:[#allocation37_spill] sm:$0xff] }
 0x559   : > { %10162 = vst [vmem:[#allocation167_spill] sm:$0xff] %v8398_v61  ;;  %4028 = vmatpush.msrb.mxu1 %v3093_v54  ;;  %v2682_v53 = vsel %vm702_vm4, %v10165_v38, %v10164_v47  ;;  %v3089_v54 = vmul.f32 %v8346_v1, %v3038_v22  ;;  %4053 = vmatpush.msrb.mxu2 %v3249_v39  ;;  %v10175_v38 = vld [vmem:[#allocation194_spill] sm:$0xff]  ;;  %v10176_v48 = vld [vmem:[#allocation73_spill] sm:$0xff]  ;;  %v10184_v61 = vld [vmem:[#allocation108_spill] sm:$0xff] }
 0x55a   : > { %10163 = vst [vmem:[#allocation123_spill] sm:$0xff] %v8401_v37  ;;  %3975 = vmatpush.msra.mxu0 %v2715_v21  ;;  %v2711_v21 = vmul.f32 %v8231_v40, %v2683_v2  ;;  %4004 = vmatmul.f32.vlgmr.msra.gmra.mxu1 %v3628_v17  ;;  %v2709_v22 = vmul.f32 %v8231_v40, %v2682_v53  ;;  %v10173_v2 = vld [vmem:[#allocation6_spill] sm:$0xff]  ;;  %v10179_v19 = vld [vmem:[#allocation125_spill] sm:$0xff] }
 0x55b   : > { %4029 = vmatpush.msrb.mxu1 %v3091_v18  ;;  %v3087_v18 = vmul.f32 %v8346_v1, %v3037_v29  ;;  %v2707_v47 = vmul.f32 %v8231_v40, %v2681_v55  ;;  %v3035_v41 = vsel %vm894_vm5, %v10176_v48, %v10175_v38  ;;  %v3085_v35 = vmul.f32 %v8346_v1, %v3036_v52  ;;  %v10180_v38 = vld [vmem:[#allocation177_spill] sm:$0xff]  ;;  %v10181_v48 = vld [vmem:[#allocation75_spill] sm:$0xff] }
 0x55c   : > { %3976 = vmatpush.msra.mxu0 %v2713_v59  ;;  %3299 = vrot.lane.b32.xlu1 %v10172_v62, %s4505_s9  ;;  %v3316_v39 = vpop.permute.xlu0 %3315  ;;  %v10174_v59 = vld [vmem:[#allocation130_spill] sm:$0xff]  ;;  %v3034_v37 = vsel %vm894_vm5, %v10181_v48, %v10180_v38 }
 0x55d   : > { %4030 = vmatpush.msrb.mxu1 %v3089_v54  ;;  %v2680_v17 = vsel %vm702_vm4, %v10174_v59, %v10173_v2  ;;  %v10177_v54 = vld [vmem:[#allocation77_spill] sm:$0xff]  ;;  %v3348_v53 = vpop.permute.xlu1 %3347  ;;  %v10190_v48 = vld [vmem:[#allocation26_spill] sm:$0xff] }
 0x55e   : > { %3977 = vmatpush.msra.mxu0 %v2711_v21  ;;  %3163 = vrot.lane.b32.xlu0 %v10177_v54, %s4504_s30  ;;  %v8442_v29 = vpop.permute.xlu2 %3487  ;;  %v3368_v9 = vsel %vm1070_vm6, %v3316_v39, %v3348_v53  ;;  %v3384_v55 = vsel %vm1070_vm6, %v3348_v53, %v3316_v39  ;;  %v10178_v21 = vld [vmem:[#allocation40_spill] sm:$0xff]  ;;  %v2705_v39 = vmul.f32 %v8231_v40, %v2680_v17 }
 0x55f   : > { %3507 = vrot.lane.b32.xlu2 %v7125_v44, %s4506_s14  ;;  %4031 = vmatpush.msrb.mxu1 %v3087_v18  ;;  %v2679_v16 = vsel %vm702_vm4, %v10179_v19, %v10178_v21  ;;  %v3417_v52 = vmul.f32 %v8083_v43, %v3368_v9  ;;  %v3083_v18 = vmul.f32 %v8346_v1, %v3035_v41  ;;  %v10183_v53 = vld [vmem:[#allocation24_spill] sm:$0xff]  ;;  %v10185_v21 = vld [vmem:[#allocation181_spill] sm:$0xff]  ;;  %v10187_v9 = vld [vmem:[#allocation10_spill] sm:$0xff] }
 0x560   : > { %3978 = vmatpush.msra.mxu0 %v2709_v22  ;;  %v8459_v22 = vmul.f32 %v8085_v3, %v3384_v55  ;;  %v2678_v46 = vsel %vm702_vm4, %v10184_v61, %v10183_v53  ;;  %v10186_v19 = vld [vmem:[#allocation72_spill] sm:$0xff]  ;;  %v10188_v55 = vld [vmem:[#allocation110_spill] sm:$0xff]  ;;  %v2703_v17 = vmul.f32 %v8231_v40, %v2679_v16  ;;  %v10211_v61 = vld [vmem:[#allocation57_spill] sm:$0xff] }
 0x561   : > { %4032 = vmatpush.msrb.mxu1 %v3085_v35  ;;  %v3033_v38 = vsel %vm894_vm5, %v10186_v19, %v10185_v21  ;;  %4072 = vmatpush.msrb.mxu3 %v3417_v52  ;;  %v2677_v41 = vsel %vm702_vm4, %v10188_v55, %v10187_v9  ;;  %v10189_v35 = vld [vmem:[#allocation176_spill] sm:$0xff]  ;;  %v2701_v19 = vmul.f32 %v8231_v40, %v2678_v46 }
 0x562   : > { %10182 = vst [vmem:[#allocation100_spill] sm:$0xff] %v8459_v22  ;;  %3979 = vmatpush.msra.mxu0 %v2707_v47  ;;  %v3081_v47 = vmul.f32 %v8346_v1, %v3034_v37  ;;  %v3032_v22 = vsel %vm894_vm5, %v10190_v48, %v10189_v35  ;;  %v3079_v21 = vmul.f32 %v8346_v1, %v3033_v38  ;;  %v10191_v37 = vld [vmem:[#allocation149_spill] sm:$0xff] }
 0x563   : > { %4033 = vmatpush.msrb.mxu1 %v3083_v18  ;;  %v10192_v18 = vld [vmem:[#allocation11_spill] sm:$0xff] }
 0x564   : > { %3980 = vmatpush.msra.mxu0 %v2705_v39  ;;  %3505 = vrot.lane.b32.xlu1 %v7097_v7, %s4506_s14  ;;  %v8485_v52 = vpop.permute.xlu0 %3521  ;;  %v3031_v16 = vsel %vm894_vm5, %v10192_v18, %v10191_v37  ;;  %v10193_v37 = vld [vmem:[#allocation155_spill] sm:$0xff]  ;;  %v10194_v18 = vld [vmem:[#allocation36_spill] sm:$0xff] }
 0x565   : > { %4034 = vmatpush.msrb.mxu1 %v3081_v47  ;;  %v3146_v39 = vpop.permute.xlu1 %3145  ;;  %v8499_v38 = vsel %vm1158_vm8, %v8485_v52, %v8315_v30  ;;  %v2699_v47 = vmul.f32 %v8231_v40, %v2677_v41  ;;  %v3030_v9 = vsel %vm894_vm5, %v10194_v18, %v10193_v37  ;;  %v8521_v41 = vld [vmem:[%s9193_s6 + $0x10] sm:$0xff] }
 0x566   : > { %3981 = vmatpush.msra.mxu0 %v2703_v17  ;;  %3473 = vrot.lane.b32.xlu0 %v10051_v20, %s4506_s14  ;;  %v3176_v46 = vpop.permute.xlu2 %3175  ;;  %v3077_v17 = vmul.f32 %v8346_v1, %v3032_v22  ;;  %v3200_v35 = vsel %vm982_vm7, %v3146_v39, %v8386_v56  ;;  %v3216_v48 = vsel %vm982_vm7, %v8386_v56, %v3146_v39  ;;  %v10197_v56 = vld [vmem:[#allocation148_spill] sm:$0xff]  ;;  %v10199_v39 = vld [vmem:[#allocation30_spill] sm:$0xff] }
 0x567   : > { %3331 = vrot.lane.b32.xlu2 %v10136_v57, %s4505_s9  ;;  %4035 = vmatpush.msrb.mxu1 %v3079_v21  ;;  %v3247_v55 = vmul.f32 %v7906_v26, %v3200_v35  ;;  %v8515_v40 = vmul.f32 %v7908_v28, %v3216_v48  ;;  %v3075_v22 = vmul.f32 %v8346_v1, %v3031_v16  ;;  %v10198_v21 = vld [vmem:[#allocation4_spill] sm:$0xff]  ;;  %v10200_v16 = vld [vmem:[#allocation122_spill] sm:$0xff]  ;;  %v10202_v48 = vld [vmem:[#allocation15_spill] sm:$0xff] }
 0x568   : > { %3982 = vmatpush.msra.mxu0 %v2701_v19  ;;  %10196 = vst [vmem:[#allocation101_spill] sm:$0xff] %v8521_v41  ;;  %v3029_v19 = vsel %vm894_vm5, %v10198_v21, %v10197_v56  ;;  %v3073_v35 = vmul.f32 %v8346_v1, %v3030_v9  ;;  %v10204_v56 = vld [vmem:[#allocation32_spill] sm:$0xff]  ;;  %v10206_v21 = vld [vmem:[#allocation71_spill] sm:$0xff] }
 0x569   : > { %10195 = vst [vmem:[#allocation207_spill] sm:$0xff] %v8515_v40  ;;  %4036 = vmatpush.msrb.mxu1 %v3077_v17  ;;  %4054 = vmatpush.msrb.mxu2 %v3247_v55  ;;  %v3071_v37 = vmul.f32 %v8346_v1, %v3029_v19  ;;  %v10203_v55 = vld [vmem:[#allocation126_spill] sm:$0xff] }
 0x56a   : > { %3983 = vmatpush.msra.mxu0 %v2699_v47  ;;  %v10201_v47 = vld [vmem:[#allocation41_spill] sm:$0xff]  ;;  %v3027_v9 = vsel %vm894_vm5, %v10204_v56, %v10203_v55  ;;  %v10207_v40 = vld [vmem:[#allocation38_spill] sm:$0xff]  ;;  %v10208_v56 = vld [vmem:[#allocation120_spill] sm:$0xff] }
 0x56b   : > { %4037 = vmatpush.msrb.mxu1 %v3075_v22  ;;  %3984 = vmatmul.f32.vlgmr.msra.gmra.mxu0 %v8521_v41  ;;  %v3028_v17 = vsel %vm894_vm5, %v10201_v47, %v10200_v16  ;;  %v10205_v22 = vld [vmem:[#allocation35_spill] sm:$0xff]  ;;  %v10209_v16 = vld [vmem:[#allocation49_spill] sm:$0xff] }
 0x56c   : > { %4008 = vmatpush.msrb.mxu0 %v10199_v39  ;;  %3329 = vrot.lane.b32.xlu1 %v10177_v54, %s4505_s9  ;;  %v3314_v18 = vpop.permute.xlu0 %3313  ;;  %v3069_v55 = vmul.f32 %v8346_v1, %v3028_v17  ;;  %v3026_v47 = vsel %vm894_vm5, %v10209_v16, %v10208_v56 }
 0x56d   : > { %4038 = vmatpush.msrb.mxu1 %v3073_v35  ;;  %v3346_v39 = vpop.permute.xlu1 %3345 }
 0x56e   : > { %4009 = vmatpush.msrb.mxu0 %v10202_v48  ;;  %3297 = vrot.lane.b32.xlu0 %v10205_v22, %s4505_s9  ;;  %v8546_v48 = vpop.permute.xlu2 %3485  ;;  %v3367_v19 = vsel %vm1070_vm6, %v3314_v18, %v3346_v39  ;;  %v3383_v35 = vsel %vm1070_vm6, %v3346_v39, %v3314_v18  ;;  %v3065_v18 = vmul.f32 %v8346_v1, %v3026_v47  ;;  %v10212_v39 = vld [vmem:[#allocation5_spill] sm:$0xff] }
 0x56f   : > { %3161 = vrot.lane.b32.xlu2 %v10206_v21, %s4504_s30  ;;  %4039 = vmatpush.msrb.mxu1 %v3071_v37  ;;  %v3415_v41 = vmul.f32 %v8083_v43, %v3367_v19  ;;  %v8560_v53 = vmul.f32 %v8085_v3, %v3383_v35  ;;  %v10210_v37 = vld [vmem:[#allocation105_spill] sm:$0xff]  ;;  %v10213_v35 = vld [vmem:[#allocation206_spill] sm:$0xff] }
 0x570   : > { %4010 = vmatpush.msrb.mxu0 %v10207_v40  ;;  %v3067_v40 = vmul.f32 %v8346_v1, %v3027_v9  ;;  %v3025_v17 = vsel %vm894_vm5, %v10211_v61, %v10210_v37  ;;  %v8583_v47 = vld [vmem:[%s9193_s6 + $0x28] sm:$0xff] }
 0x571   : > { %4040 = vmatpush.msrb.mxu1 %v3069_v55  ;;  %4073 = vmatpush.msrb.mxu3 %v3415_v41 }
 0x572   : > { %4011 = vmatpush.msrb.mxu0 %v9994_v4  ;;  %v3063_v4 = vmul.f32 %v8346_v1, %v3025_v17 }
 0x573   : > { %4041 = vmatpush.msrb.mxu1 %v3067_v40  ;;  %v10216_v40 = vld [vmem:[#allocation14_spill] sm:$0xff] }
 0x574   : > { %4012 = vmatpush.msrb.mxu0 %v10001_v36  ;;  %3159 = vrot.lane.b32.xlu1 %v10212_v39, %s4504_s30  ;;  %v8574_v55 = vpop.permute.xlu0 %3519 }
 0x575   : > { %4042 = vmatpush.msrb.mxu1 %v3065_v18  ;;  %v3144_v36 = vpop.permute.xlu1 %3143 }
 0x576   : > { %4013 = vmatpush.msrb.mxu0 %v10099_v60  ;;  %3503 = vrot.lane.b32.xlu0 %v10063_v25, %s4506_s14  ;;  %v3174_v41 = vpop.permute.xlu2 %3173  ;;  %v3199_v60 = vsel %vm982_vm7, %v3144_v36, %v3176_v46  ;;  %v3215_v1 = vsel %vm982_vm7, %v3176_v46, %v3144_v36  ;;  %v10215_v46 = vld [vmem:[#allocation80_spill] sm:$0xff] }
 0x577   : > { %3471 = vrot.lane.b32.xlu2 %v10079_v0, %s4506_s14  ;;  %4043 = vmatpush.msrb.mxu1 %v3063_v4  ;;  %v3245_v9 = vmul.f32 %v7906_v26, %v3199_v60  ;;  %v8593_v19 = vmul.f32 %v7908_v28, %v3215_v1  ;;  %v8623_v60 = vld [vmem:[%s9187_s0 + $0x10] ss:$8 sm:$0x3] }
 0x578   : > { %4014 = vmatpush.msrb.mxu0 %v10144_v5  ;;  %4044 = vmatmul.f32.vlgmr.msrb.gmra.mxu1 %v8583_v47  ;;  %v10214_v5 = vld [vmem:[#allocation208_spill] sm:$0xff]  ;;  %v8629_v1 = vperm.slane %v8623_v60, 0 }
 0x579   : > { %4108 = vmatpush.msra.mxu1 %v7990_v15  ;;  %4055 = vmatpush.msrb.mxu2 %v3245_v9  ;;  %v10220_v9 = vld [vmem:[#allocation16_spill] sm:$0xff] }
 0x57a   : > { %4015 = vmatpush.msrb.mxu0 %v10038_v42 }
 0x57b   : > { %4109 = vmatpush.msra.mxu1 %v10213_v35  ;;  %v3538_v35 = vsel %vm1158_vm8, %v8315_v30, %v8485_v52 }
 0x57c   : > { %4016 = vmatpush.msrb.mxu0 %v10051_v20  ;;  %3469 = vrot.lane.b32.xlu1 %v10121_v10, %s4506_s14  ;;  %v3312_v15 = vpop.permute.xlu0 %3311 }
 0x57d   : > { %4110 = vmatpush.msra.mxu1 %v10214_v5  ;;  %v3344_v42 = vpop.permute.xlu1 %3343 }
 0x57e   : > { %4017 = vmatpush.msrb.mxu0 %v10079_v0  ;;  %3327 = vrot.lane.b32.xlu0 %v10206_v21, %s4505_s9  ;;  %v3366_v20 = vsel %vm1070_vm6, %v3312_v15, %v3344_v42  ;;  %v3382_v17 = vsel %vm1070_vm6, %v3344_v42, %v3312_v15  ;;  %v8613_v18 = vpop.permute.xlu2 %3483  ;;  %v10217_v0 = vld [vmem:[#allocation187_spill] sm:$0xff]  ;;  %v3537_v15 = vsel %vm1158_vm8, %v8442_v29, %v8574_v55  ;;  %v10222_v42 = vld [vmem:[#allocation42_spill] sm:$0xff] }
 0x57f   : > { %4111 = vmatpush.msra.mxu1 %v10215_v46  ;;  %3295 = vrot.lane.b32.xlu2 %v10216_v40, %s4505_s9  ;;  %v3413_v4 = vmul.f32 %v8083_v43, %v3366_v20  ;;  %v8618_v36 = vmul.f32 %v8085_v3, %v3382_v17  ;;  %v10221_v46 = vld [vmem:[#allocation165_spill] sm:$0xff] }
 0x580   : > { %4018 = vmatpush.msrb.mxu0 %v10121_v10  ;;  %v10219_v10 = vld [vmem:[#allocation189_spill] sm:$0xff] }
 0x581   : > { %4112 = vmatpush.msra.mxu1 %v10217_v0  ;;  %10218 = vst [vmem:[#allocation210_spill] sm:$0xff] %v8618_v36  ;;  %4074 = vmatpush.msrb.mxu3 %v3413_v4  ;;  %v3591_v4 = vmul.f32 %v8629_v1, %v3538_v35  ;;  %v10224_v35 = vld [vmem:[#allocation162_spill] sm:$0xff] }
 0x582   : > { %4019 = vmatpush.msrb.mxu0 %v10161_v31 }
 0x583   : > { %4113 = vmatpush.msra.mxu1 %v10219_v10  ;;  %v10223_v10 = vld [vmem:[#allocation170_spill] sm:$0xff] }
 0x584   : > { %4020 = vmatpush.msrb.mxu0 %v10172_v62  ;;  %3325 = vrot.lane.b32.xlu1 %v10212_v39, %s4505_s9  ;;  %v8639_v5 = vpop.permute.xlu0 %3517 }
 0x585   : > { %4114 = vmatpush.msra.mxu1 %v10220_v9  ;;  %v3142_v20 = vpop.permute.xlu1 %3141  ;;  %v3536_v17 = vsel %vm1158_vm8, %v8546_v48, %v8639_v5 }
 0x586   : > { %4021 = vmatpush.msrb.mxu0 %v10205_v22  ;;  %3293 = vrot.lane.b32.xlu0 %v10222_v42, %s4505_s9  ;;  %v3198_v30 = vsel %vm982_vm7, %v3142_v20, %v3174_v41  ;;  %v3214_v52 = vsel %vm982_vm7, %v3174_v41, %v3142_v20  ;;  %v8659_v0 = vpop.permute.xlu2 %3307  ;;  %v8670_v41 = vld [vmem:[%s9193_s6 + $0x20] sm:$0xff]  ;;  %v3589_v20 = vmul.f32 %v8629_v1, %v3537_v15 }
 0x587   : > { %4115 = vmatpush.msra.mxu1 %v10221_v46  ;;  %3501 = vrot.lane.b32.xlu2 %v10080_v34, %s4506_s14  ;;  %v3243_v9 = vmul.f32 %v7906_v26, %v3198_v30  ;;  %v8665_v46 = vmul.f32 %v7908_v28, %v3214_v52  ;;  %v3587_v36 = vmul.f32 %v8629_v1, %v3536_v17  ;;  %v10225_v52 = vld [vmem:[#allocation132_spill] sm:$0xff] }
 0x588   : > { %4022 = vmatpush.msrb.mxu0 %v10216_v40  ;;  %v2332_v30 = vsel %vm527_vm3, %v10104_v32, %v10105_v23  ;;  %v2331_v15 = vsel %vm527_vm3, %v10111_v33, %v10112_v12 }
 0x589   : > { %4116 = vmatpush.msra.mxu1 %v10223_v10  ;;  %4056 = vmatpush.msrb.mxu2 %v3243_v9  ;;  %v2374_v32 = vmul.f32 %v7246_v11, %v2332_v30  ;;  %v2330_v10 = vsel %vm527_vm3, %v10113_v50, %v10114_v27  ;;  %v2372_v27 = vmul.f32 %v7246_v11, %v2331_v15 }
 0x58a   : > { %4023 = vmatpush.msrb.mxu0 %v10222_v42  ;;  %v2329_v50 = vsel %vm527_vm3, %v10109_v58, %v10110_v51  ;;  %v10227_v58 = vld [vmem:[#allocation19_spill] sm:$0xff] }
 0x58b   : > { %4117 = vmatpush.msra.mxu1 %v10224_v35  ;;  %4024 = vmatmul.f32.vlgmr.msrb.gmra.mxu0 %v8670_v41 }
 0x58c   : > { %4088 = vmatpush.msra.mxu0 %v3591_v4  ;;  %3465 = vrot.lane.b32.xlu1 %v10172_v62, %s4506_s14  ;;  %v3310_v17 = vpop.permute.xlu0 %3309  ;;  %v10226_v4 = vld [vmem:[#allocation138_spill] sm:$0xff] }
 0x58d   : > { %4118 = vmatpush.msra.mxu1 %v10225_v52  ;;  %v3342_v23 = vpop.permute.xlu1 %3341 }
 0x58e   : > { %4089 = vmatpush.msra.mxu0 %v3589_v20  ;;  %3499 = vrot.lane.b32.xlu0 %v10123_v6, %s4506_s14  ;;  %v3365_v33 = vsel %vm1070_vm6, %v3310_v17, %v3342_v23  ;;  %v3381_v12 = vsel %vm1070_vm6, %v3342_v23, %v3310_v17  ;;  %v8702_v62 = vpop.permute.xlu2 %3513  ;;  %v2368_v20 = vmul.f32 %v7246_v11, %v2329_v50  ;;  %v10228_v17 = vld [vmem:[#allocation164_spill] sm:$0xff]  ;;  %v10229_v23 = vld [vmem:[#allocation153_spill] sm:$0xff] }
 0x58f   : > { %4119 = vmatpush.msra.mxu1 %v10226_v4  ;;  %3467 = vrot.lane.b32.xlu2 %v10161_v31, %s4506_s14  ;;  %v8706_v9 = vmul.f32 %v8085_v3, %v3381_v12  ;;  %v2370_v31 = vmul.f32 %v7246_v11, %v2330_v10  ;;  %v10230_v10 = vld [vmem:[#allocation140_spill] sm:$0xff] }
 0x590   : > { %4090 = vmatpush.msra.mxu0 %v3587_v36  ;;  %v3411_v36 = vmul.f32 %v8083_v43, %v3365_v33 }
 0x591   : > { %4120 = vmatpush.msra.mxu1 %v2374_v32 }
 0x592   : > { %4075 = vmatpush.msrb.mxu3 %v3411_v36 }
 0x593   : > { %4121 = vmatpush.msra.mxu1 %v2372_v27 }
 0x594   : > { %3495 = vrot.lane.b32.xlu1 %v10177_v54, %s4506_s14  ;;  %v8717_v30 = vpop.permute.xlu0 %3515 }
 0x595   : > { %4122 = vmatpush.msra.mxu1 %v2370_v31  ;;  %v3172_v35 = vpop.permute.xlu1 %3171  ;;  %v3535_v52 = vsel %vm1158_vm8, %v8613_v18, %v8717_v30  ;;  %v10231_v31 = vld [vmem:[#allocation9_spill] sm:$0xff] }
 0x596   : > { %3463 = vrot.lane.b32.xlu0 %v10205_v22, %s4506_s14  ;;  %v3197_v51 = vsel %vm982_vm7, %v10227_v58, %v3172_v35  ;;  %v3213_v11 = vsel %vm982_vm7, %v3172_v35, %v10227_v58  ;;  %v3338_v15 = vpop.permute.xlu2 %3337  ;;  %v3585_v32 = vmul.f32 %v8629_v1, %v3535_v52 }
 0x597   : > { %4123 = vmatpush.msra.mxu1 %v2368_v20  ;;  %3497 = vrot.lane.b32.xlu2 %v10136_v57, %s4506_s14  ;;  %v3241_v22 = vmul.f32 %v7906_v26, %v3197_v51  ;;  %v8736_v4 = vmul.f32 %v7908_v28, %v3213_v11  ;;  %v10232_v11 = vld [vmem:[#allocation46_spill] sm:$0xff] }
 0x598   : > { %4124 = vmatmul.f32.vlgmr.msra.gmra.mxu1 %v8274_v63  ;;  %4091 = vmatpush.msra.mxu0 %v3585_v32 }
 0x599   : > { %4188 = vmatpush.msrb.mxu1 %v10228_v17  ;;  %4057 = vmatpush.msrb.mxu2 %v3241_v22 }
 0x59b   : > { %4189 = vmatpush.msrb.mxu1 %v10229_v23 }
 0x59c   : > { %3459 = vrot.lane.b32.xlu1 %v10222_v42, %s4506_s14 }
 0x59d   : > { %4190 = vmatpush.msrb.mxu1 %v10230_v10  ;;  %v8745_v33 = vpop.permute.xlu1 %3481  ;;  %v3340_v12 = vpop.permute.xlu0 %3339 }
 0x59e   : > { %3493 = vrot.lane.b32.xlu0 %v10206_v21, %s4506_s14  ;;  %v3534_v63 = vsel %vm1158_vm8, %v8745_v33, %v8702_v62  ;;  %v3364_v42 = vsel %vm1070_vm6, %v8659_v0, %v3340_v12  ;;  %v3380_v36 = vsel %vm1070_vm6, %v3340_v12, %v8659_v0  ;;  %v3922_v0 = vld [vmem:[%s9194_s7] sm:$0xff] }
 0x59f   : > { %4191 = vmatpush.msrb.mxu1 %v7257_v13  ;;  %3461 = vrot.lane.b32.xlu2 %v10216_v40, %s4506_s14  ;;  %v3583_v13 = vmul.f32 %v8629_v1, %v3534_v63  ;;  %v3409_v27 = vmul.f32 %v8083_v43, %v3364_v42  ;;  %v3168_v40 = vpop.permute.xlu2 %3167  ;;  %v8765_v50 = vmul.f32 %v8085_v3, %v3380_v36  ;;  %v8812_v36 = vperm.slane %v8623_v60, 1 }
 0x5a0   : > { %v3211_v20 = vsel %vm982_vm7, %v3168_v40, %v10231_v31  ;;  %v3195_v35 = vsel %vm982_vm7, %v10231_v31, %v3168_v40 }
 0x5a1   : > { %4192 = vmatpush.msrb.mxu1 %v10083_v45  ;;  %v8772_v45 = vmul.f32 %v7908_v28, %v3211_v20  ;;  %4076 = vmatpush.msrb.mxu3 %v3409_v27  ;;  %v3237_v10 = vmul.f32 %v7906_v26, %v3195_v35  ;;  %v10233_v20 = vld [vmem:[#allocation54_spill] sm:$0xff] }
 0x5a2   : > { %4092 = vmatpush.msra.mxu0 %v3583_v13 }
 0x5a3   : > { %4193 = vmatpush.msrb.mxu1 %v10098_v24 }
 0x5a5   : > { %4194 = vmatpush.msrb.mxu1 %v10143_v49  ;;  %v3306_v58 = vpop.permute.xlu1 %3305  ;;  %v3170_v51 = vpop.permute.xlu0 %3169 }
 0x5a6   : > { %3925 = vperm.xlu0 %4477, %v3922_v0   ;;  %v3363_v24 = vsel %vm1070_vm6, %v3306_v58, %v3338_v15  ;;  %v3379_v49 = vsel %vm1070_vm6, %v3338_v15, %v3306_v58  ;;  %v3196_v52 = vsel %vm982_vm7, %v10232_v11, %v3170_v51  ;;  %v3212_v22 = vsel %vm982_vm7, %v3170_v51, %v10232_v11 }
 0x5a7   : > { %4195 = vmatpush.msrb.mxu1 %v7125_v44  ;;  %3491 = vrot.lane.b32.xlu2 %v10212_v39, %s4506_s14  ;;  %v3407_v44 = vmul.f32 %v8083_v43, %v3363_v24  ;;  %v8794_v17 = vmul.f32 %v8085_v3, %v3379_v49  ;;  %v3239_v32 = vmul.f32 %v7906_v26, %v3196_v52 }
 0x5a8   : > { %v3478_v23 = vpop.permute.xlu2 %3477  ;;  %v8801_v15 = vmul.f32 %v7908_v28, %v3212_v22 }
 0x5a9   : > { %4196 = vmatpush.msrb.mxu1 %v7097_v7  ;;  %4058 = vmatpush.msrb.mxu2 %v3239_v32 }
 0x5aa   : > { %4077 = vmatpush.msrb.mxu3 %v3407_v44 }
 0x5ab   : > { %4197 = vmatpush.msrb.mxu1 %v10063_v25  ;;  %4059 = vmatpush.msrb.mxu2 %v3237_v10  ;;  %v3553_v25 = vsel %vm1158_vm8, %v8574_v55, %v8442_v29  ;;  %v3551_v29 = vsel %vm1158_vm8, %v8717_v30, %v8613_v18  ;;  %v3550_v18 = vsel %vm1158_vm8, %v8702_v62, %v8745_v33 }
 0x5ac   : > { %v3586_v30 = vmul.f32 %v8812_v36, %v3551_v29  ;;  %v3584_v27 = vmul.f32 %v8812_v36, %v3550_v18 }
 0x5ad   : > { %4198 = vmatpush.msrb.mxu1 %v10080_v34  ;;  %v3512_v7 = vpop.permute.xlu1 %3511  ;;  %v3592_v34 = vmul.f32 %v8812_v36, %v8499_v38 }
 0x5ae   : > { %v3480_v12 = vpop.permute.xlu0 %3479 }
 0x5af   : > { %4199 = vmatpush.msrb.mxu1 %v10123_v6  ;;  %v3533_v63 = vsel %vm1158_vm8, %v3480_v12, %v3512_v7  ;;  %v3552_v6 = vsel %vm1158_vm8, %v8639_v5, %v8546_v48 }
 0x5b0   : > { %v3581_v42 = vmul.f32 %v8629_v1, %v3533_v63  ;;  %v3302_v13 = vpop.permute.xlu2 %3301  ;;  %v3588_v48 = vmul.f32 %v8812_v36, %v3552_v6 }
 0x5b1   : > { %4200 = vmatpush.msrb.mxu1 %v10136_v57 }
 0x5b2   : > { %4093 = vmatpush.msra.mxu0 %v3581_v42 }
 0x5b3   : > { %4201 = vmatpush.msrb.mxu1 %v10177_v54  ;;  %v3590_v54 = vmul.f32 %v8812_v36, %v3553_v25  ;;  %v10234_v25 = vld [vmem:[#allocation53_spill] sm:$0xff] }
 0x5b5   : > { %4202 = vmatpush.msrb.mxu1 %v10206_v21 }
 0x5b6   : > { %v3336_v57 = vpop.permute.xlu1 %3335  ;;  %v3304_v60 = vpop.permute.xlu0 %3303 }
 0x5b7   : > { %4203 = vmatpush.msrb.mxu1 %v10212_v39  ;;  %v3362_v38 = vsel %vm1070_vm6, %v3304_v60, %v3336_v57  ;;  %v3378_v21 = vsel %vm1070_vm6, %v3336_v57, %v3304_v60 }
 0x5b8   : > { %4204 = vmatmul.f32.vlgmr.msrb.gmra.mxu1 %v8670_v41  ;;  %v3405_v39 = vmul.f32 %v8083_v43, %v3362_v38  ;;  %v8840_v5 = vmul.f32 %v8085_v3, %v3378_v21  ;;  %v3549_v41 = vsel %vm1158_vm8, %v3512_v7, %v3480_v12 }
 0x5b9   : > { %4268 = vmatpush.msra.mxu1 %v3592_v34  ;;  %v3508_v55 = vpop.permute.xlu2 %3507  ;;  %v3582_v31 = vmul.f32 %v8812_v36, %v3549_v41 }
 0x5ba   : > { %4078 = vmatpush.msrb.mxu3 %v3405_v39  ;;  %v10235_v39 = vld [vmem:[#allocation48_spill] sm:$0xff] }
 0x5bb   : > { %4269 = vmatpush.msra.mxu1 %v3590_v54 }
 0x5bd   : > { %4270 = vmatpush.msra.mxu1 %v3588_v48 }
 0x5be   : > { %v3166_v40 = vpop.permute.xlu1 %3165 }
 0x5bf   : > { %4271 = vmatpush.msra.mxu1 %v3586_v30  ;;  %v3194_v0 = vsel %vm982_vm7, %v10233_v20, %v3166_v40  ;;  %v3210_v62 = vsel %vm982_vm7, %v3166_v40, %v10233_v20  ;;  %v3510_v58 = vpop.permute.xlu0 %3509 }
 0x5c0   : > { %v3235_v33 = vmul.f32 %v7906_v26, %v3194_v0  ;;  %v8859_v35 = vmul.f32 %v7908_v28, %v3210_v62  ;;  %v3532_v24 = vsel %vm1158_vm8, %v3478_v23, %v3510_v58  ;;  %v3548_v49 = vsel %vm1158_vm8, %v3510_v58, %v3478_v23 }
 0x5c1   : > { %4272 = vmatpush.msra.mxu1 %v3584_v27  ;;  %v3332_v51 = vpop.permute.xlu2 %3331  ;;  %v3579_v11 = vmul.f32 %v8629_v1, %v3532_v24  ;;  %v3580_v52 = vmul.f32 %v8812_v36, %v3548_v49 }
 0x5c2   : > { %4060 = vmatpush.msrb.mxu2 %v3235_v33 }
 0x5c3   : > { %4273 = vmatpush.msra.mxu1 %v3582_v31  ;;  %4094 = vmatpush.msra.mxu0 %v3579_v11 }
 0x5c5   : > { %4274 = vmatpush.msra.mxu1 %v3580_v52 }
 0x5c6   : > { %v3476_v44 = vpop.permute.xlu1 %3475 }
 0x5c7   : > { %v3531_v22 = vsel %vm1158_vm8, %v3476_v44, %v3508_v55  ;;  %v3547_v32 = vsel %vm1158_vm8, %v3508_v55, %v3476_v44  ;;  %v3334_v12 = vpop.permute.xlu0 %3333 }
 0x5c8   : > { %v3577_v10 = vmul.f32 %v8629_v1, %v3531_v22  ;;  %v3578_v7 = vmul.f32 %v8812_v36, %v3547_v32  ;;  %v3361_v63 = vsel %vm1070_vm6, %v3302_v13, %v3334_v12  ;;  %v3377_v42 = vsel %vm1070_vm6, %v3334_v12, %v3302_v13 }
 0x5c9   : > { %v3162_v23 = vpop.permute.xlu2 %3161  ;;  %v3403_v6 = vmul.f32 %v8083_v43, %v3361_v63  ;;  %v8882_v57 = vmul.f32 %v8085_v3, %v3377_v42 }
 0x5ca   : > { %v3208_v34 = vsel %vm982_vm7, %v3162_v23, %v10234_v25  ;;  %4095 = vmatpush.msra.mxu0 %v3577_v10  ;;  %4275 = vmatpush.msra.mxu1 %v3578_v7  ;;  %v3192_v48 = vsel %vm982_vm7, %v10234_v25, %v3162_v23  ;;  %v10236_v7 = vld [vmem:[#allocation43_spill] sm:$0xff] }
 0x5cb   : > { %v8885_v54 = vmul.f32 %v7908_v28, %v3208_v34  ;;  %4079 = vmatpush.msrb.mxu3 %v3403_v6  ;;  %v3231_v40 = vmul.f32 %v7906_v26, %v3192_v48  ;;  %v8936_v34 = vld [vmem:[%s9193_s6 + $0x30] sm:$0xff] }
 0x5ce   : > { %v3300_v60 = vpop.permute.xlu1 %3299 }
 0x5cf   : > { %v3360_v29 = vsel %vm1070_vm6, %v3300_v60, %v3332_v51  ;;  %v3376_v13 = vsel %vm1070_vm6, %v3332_v51, %v3300_v60 }
 0x5d0   : > { %v3401_v38 = vmul.f32 %v8083_v43, %v3360_v29  ;;  %v8893_v21 = vmul.f32 %v8085_v3, %v3376_v13  ;;  %v3164_v55 = vpop.permute.xlu0 %3163 }
 0x5d1   : > { %v3193_v18 = vsel %vm982_vm7, %v10235_v39, %v3164_v55  ;;  %v3209_v30 = vsel %vm982_vm7, %v3164_v55, %v10235_v39  ;;  %v3472_v31 = vpop.permute.xlu2 %3471 }
 0x5d2   : > { %v3233_v41 = vmul.f32 %v7906_v26, %v3193_v18  ;;  %v8906_v27 = vmul.f32 %v7908_v28, %v3209_v30  ;;  %4080 = vmatpush.msrb.mxu3 %v3401_v38 }
 0x5d4   : > { %4061 = vmatpush.msrb.mxu2 %v3233_v41 }
 0x5d6   : > { %4062 = vmatpush.msrb.mxu2 %v3231_v40  ;;  %v3506_v20 = vpop.permute.xlu1 %3505 }
 0x5d8   : > { %v3474_v0 = vpop.permute.xlu0 %3473 }
 0x5d9   : > { %v3530_v62 = vsel %vm1158_vm8, %v3474_v0, %v3506_v20  ;;  %v3546_v33 = vsel %vm1158_vm8, %v3506_v20, %v3474_v0  ;;  %v3296_v49 = vpop.permute.xlu2 %3295 }
 0x5da   : > { %v3575_v58 = vmul.f32 %v8629_v1, %v3530_v62  ;;  %v3576_v51 = vmul.f32 %v8812_v36, %v3546_v33  ;;  %v10239_v62 = vld [vmem:[#allocation193_spill] sm:$0xff]  ;;  %v10240_v33 = vld [vmem:[#allocation196_spill] sm:$0xff] }
 0x5dc   : > { %4096 = vmatpush.msra.mxu0 %v3575_v58  ;;  %4276 = vmatpush.msra.mxu1 %v3576_v51  ;;  %v10241_v51 = vld [vmem:[#allocation70_spill] sm:$0xff] }
 0x5de   : > { %v3330_v24 = vpop.permute.xlu1 %3329 }
 0x5e0   : > { %v3298_v11 = vpop.permute.xlu0 %3297 }
 0x5e1   : > { %v3359_v52 = vsel %vm1070_vm6, %v3298_v11, %v3330_v24  ;;  %v3375_v44 = vsel %vm1070_vm6, %v3330_v24, %v3298_v11  ;;  %v3502_v6 = vpop.permute.xlu2 %3501 }
 0x5e2   : > { %v3399_v22 = vmul.f32 %v8083_v43, %v3359_v52  ;;  %v8921_v32 = vmul.f32 %v8085_v3, %v3375_v44  ;;  %v10242_v52 = vld [vmem:[#allocation175_spill] sm:$0xff] }
 0x5e4   : > { %4081 = vmatpush.msrb.mxu3 %v3399_v22 }
 0x5e6   : > { %v3160_v10 = vpop.permute.xlu1 %3159 }
 0x5e7   : > { %v3191_v12 = vsel %vm982_vm7, %v10236_v7, %v3160_v10  ;;  %v3207_v23 = vsel %vm982_vm7, %v3160_v10, %v10236_v7  ;;  %v8977_v10 = vld [vmem:[%s9193_s6 + $0x38] sm:$0xff]  ;;  %v10243_v7 = vld [vmem:[#allocation178_spill] sm:$0xff] }
 0x5e8   : > { %v3229_v63 = vmul.f32 %v7906_v26, %v3191_v12  ;;  %v8931_v42 = vmul.f32 %v7908_v28, %v3207_v23  ;;  %v3504_v25 = vpop.permute.xlu0 %3503  ;;  %v10237_v28 = vld [vmem:[#allocation212_spill] sm:$0xff]  ;;  %v10244_v23 = vld [vmem:[#allocation173_spill] sm:$0xff] }
 0x5e9   : > { %v3529_v60 = vsel %vm1158_vm8, %v3472_v31, %v3504_v25  ;;  %v3545_v29 = vsel %vm1158_vm8, %v3504_v25, %v3472_v31  ;;  %v10238_v31 = vld [vmem:[#allocation86_spill] sm:$0xff]  ;;  %v3468_v0 = vpop.permute.xlu2 %3467  ;;  %v10246_v25 = vld [vmem:[#allocation145_spill] sm:$0xff] }
 0x5ea   : > { %v3573_v13 = vmul.f32 %v8629_v1, %v3529_v60  ;;  %v3574_v26 = vmul.f32 %v8812_v36, %v3545_v29  ;;  %4063 = vmatpush.msrb.mxu2 %v3229_v63  ;;  %v10245_v63 = vld [vmem:[#allocation104_spill] sm:$0xff] }
 0x5eb   : > { %4064 = vmatmul.f32.vlgmr.msrb.gmra.mxu2 %v8936_v34  ;;  %v10249_v60 = vld [vmem:[#allocation56_spill] sm:$0xff] }
 0x5ec   : > { %4097 = vmatpush.msra.mxu0 %v3573_v13  ;;  %4277 = vmatpush.msra.mxu1 %v3574_v26  ;;  %v10250_v26 = vld [vmem:[#allocation151_spill] sm:$0xff] }
 0x5ed   : > { %4128 = vmatpush.msra.mxu2 %v10237_v28 }
 0x5ee   : > { %v3470_v38 = vpop.permute.xlu1 %3469 }
 0x5ef   : > { %4129 = vmatpush.msra.mxu2 %v7876_v14  ;;  %v3528_v55 = vsel %vm1158_vm8, %v3470_v38, %v3502_v6  ;;  %v3544_v48 = vsel %vm1158_vm8, %v3502_v6, %v3470_v38  ;;  %v10248_v6 = vld [vmem:[#allocation119_spill] sm:$0xff] }
 0x5f0   : > { %v3571_v39 = vmul.f32 %v8629_v1, %v3528_v55  ;;  %v3572_v18 = vmul.f32 %v8812_v36, %v3544_v48  ;;  %v3328_v30 = vpop.permute.xlu0 %3327  ;;  %v2498_v29 = vsel %vm614_vm1, %v10249_v60, %v10248_v6 }
 0x5f1   : > { %v3358_v41 = vsel %vm1070_vm6, %v3296_v49, %v3328_v30  ;;  %v3374_v40 = vsel %vm1070_vm6, %v3328_v30, %v3296_v49  ;;  %4130 = vmatpush.msra.mxu2 %v10238_v31  ;;  %v3498_v12 = vpop.permute.xlu2 %3497  ;;  %v10253_v30 = vld [vmem:[#allocation51_spill] sm:$0xff] }
 0x5f2   : > { %v3397_v14 = vmul.f32 %v8083_v43, %v3358_v41  ;;  %v8960_v20 = vmul.f32 %v8085_v3, %v3374_v40  ;;  %4098 = vmatpush.msra.mxu0 %v3571_v39  ;;  %4278 = vmatpush.msra.mxu1 %v3572_v18  ;;  %v10251_v39 = vld [vmem:[#allocation203_spill] sm:$0xff]  ;;  %v10252_v18 = vld [vmem:[#allocation121_spill] sm:$0xff] }
 0x5f3   : > { %4131 = vmatpush.msra.mxu2 %v10239_v62  ;;  %v2497_v41 = vsel %vm614_vm1, %v10253_v30, %v10252_v18  ;;  %v10255_v62 = vld [vmem:[#allocation205_spill] sm:$0xff]  ;;  %v10266_v18 = vld [vmem:[#allocation159_spill] sm:$0xff] }
 0x5f4   : > { %4082 = vmatpush.msrb.mxu3 %v3397_v14  ;;  %v10254_v14 = vld [vmem:[#allocation143_spill] sm:$0xff] }
 0x5f5   : > { %4132 = vmatpush.msra.mxu2 %v10240_v33  ;;  %v10256_v33 = vld [vmem:[#allocation141_spill] sm:$0xff] }
 0x5f6   : > { %v3326_v58 = vpop.permute.xlu1 %3325 }
 0x5f7   : > { %4133 = vmatpush.msra.mxu2 %v10241_v51  ;;  %v10257_v51 = vld [vmem:[#allocation117_spill] sm:$0xff] }
 0x5f8   : > { %v3294_v24 = vpop.permute.xlu0 %3293 }
 0x5f9   : > { %v3357_v49 = vsel %vm1070_vm6, %v3294_v24, %v3326_v58  ;;  %v3373_v11 = vsel %vm1070_vm6, %v3326_v58, %v3294_v24  ;;  %4134 = vmatpush.msra.mxu2 %v10242_v52  ;;  %v2540_v58 = vmul.f32 %v10256_v33, %v2498_v29  ;;  %v10258_v24 = vld [vmem:[#allocation47_spill] sm:$0xff]  ;;  %v10259_v52 = vld [vmem:[#allocation201_spill] sm:$0xff] }
 0x5fa   : > { %v3395_v44 = vmul.f32 %v8083_v43, %v3357_v49  ;;  %v8972_v22 = vmul.f32 %v8085_v3, %v3373_v11  ;;  %v10247_v3 = vld [vmem:[#allocation92_spill] sm:$0xff] }
 0x5fb   : > { %4135 = vmatpush.msra.mxu2 %v10243_v7  ;;  %v10260_v7 = vld [vmem:[#allocation103_spill] sm:$0xff] }
 0x5fc   : > { %4083 = vmatpush.msrb.mxu3 %v3395_v44  ;;  %v2538_v44 = vmul.f32 %v10256_v33, %v2497_v41  ;;  %v10267_v41 = vld [vmem:[#allocation102_spill] sm:$0xff] }
 0x5fd   : > { %4084 = vmatmul.f32.vlgmr.msrb.gmra.mxu3 %v8977_v10  ;;  %4136 = vmatpush.msra.mxu2 %v10244_v23 }
 0x5fe   : > { %4148 = vmatpush.msra.mxu3 %v10245_v63  ;;  %v3466_v43 = vpop.permute.xlu1 %3465  ;;  %v3462_v63 = vpop.permute.xlu2 %3461 }
 0x5ff   : > { %4137 = vmatpush.msra.mxu2 %v10246_v25  ;;  %v3526_v28 = vsel %vm1158_vm8, %v3466_v43, %v3498_v12  ;;  %v3542_v38 = vsel %vm1158_vm8, %v3498_v12, %v3466_v43  ;;  %v10261_v12 = vld [vmem:[#allocation45_spill] sm:$0xff] }
 0x600   : > { %4149 = vmatpush.msra.mxu3 %v10247_v3  ;;  %v3500_v13 = vpop.permute.xlu0 %3499  ;;  %v3567_v49 = vmul.f32 %v8629_v1, %v3526_v28  ;;  %v3568_v11 = vmul.f32 %v8812_v36, %v3542_v38  ;;  %v2495_v23 = vsel %vm614_vm1, %v10261_v12, %v10260_v7  ;;  %v10262_v43 = vld [vmem:[#allocation185_spill] sm:$0xff] }
 0x601   : > { %4138 = vmatpush.msra.mxu2 %v10250_v26  ;;  %v3527_v55 = vsel %vm1158_vm8, %v3468_v0, %v3500_v13  ;;  %v3543_v48 = vsel %vm1158_vm8, %v3500_v13, %v3468_v0  ;;  %v2496_v0 = vsel %vm614_vm1, %v10258_v24, %v10257_v51  ;;  %v10263_v13 = vld [vmem:[#allocation186_spill] sm:$0xff]  ;;  %v2534_v26 = vmul.f32 %v10256_v33, %v2495_v23  ;;  %v10269_v24 = vld [vmem:[#allocation99_spill] sm:$0xff]  ;;  %v10273_v7 = vld [vmem:[#allocation197_spill] sm:$0xff] }
 0x602   : > { %4150 = vmatpush.msra.mxu3 %v10251_v39  ;;  %v3569_v40 = vmul.f32 %v8629_v1, %v3527_v55  ;;  %v3570_v31 = vmul.f32 %v8812_v36, %v3543_v48  ;;  %v2536_v3 = vmul.f32 %v10256_v33, %v2496_v0  ;;  %v10264_v55 = vld [vmem:[#allocation183_spill] sm:$0xff]  ;;  %v4488_v48 = vld [vmem:[%s9193_s6 + $0x8] sm:$0xff]  ;;  %v10274_v23 = vld [vmem:[#allocation58_spill] sm:$0xff] }
 0x603   : > { %4139 = vmatpush.msra.mxu2 %v10254_v14  ;;  %v10265_v39 = vld [vmem:[#allocation213_spill] sm:$0xff] }
 0x604   : > { %4151 = vmatpush.msra.mxu3 %v10255_v62  ;;  %4099 = vmatpush.msra.mxu0 %v3569_v40  ;;  %v2664_v62 = vsel %vm702_vm4, %v10173_v2, %v10174_v59  ;;  %v10271_v2 = vld [vmem:[#allocation125_spill] sm:$0xff]  ;;  %v10272_v59 = vld [vmem:[#allocation40_spill] sm:$0xff] }
 0x605   : > { %4279 = vmatpush.msra.mxu1 %v3570_v31  ;;  %4140 = vmatpush.msra.mxu2 %v2540_v58  ;;  %v10268_v31 = vld [vmem:[#allocation163_spill] sm:$0xff] }
 0x606   : > { %4152 = vmatpush.msra.mxu3 %v10259_v52  ;;  %4100 = vmatpush.msra.mxu0 %v3567_v49  ;;  %v3496_v25 = vpop.permute.xlu1 %3495  ;;  %v3492_v40 = vpop.permute.xlu2 %3491  ;;  %v10270_v52 = vld [vmem:[#allocation157_spill] sm:$0xff] }
 0x607   : > { %4280 = vmatpush.msra.mxu1 %v3568_v11  ;;  %4141 = vmatpush.msra.mxu2 %v2538_v44  ;;  %v2663_v44 = vsel %vm702_vm4, %v10272_v59, %v10271_v2  ;;  %v10297_v2 = vld [vmem:[#allocation106_spill] sm:$0xff]  ;;  %v10298_v59 = vld [vmem:[#allocation32_spill] sm:$0xff] }
 0x608   : > { %4153 = vmatpush.msra.mxu3 %v10262_v43  ;;  %v3464_v6 = vpop.permute.xlu0 %3463  ;;  %v10276_v43 = vld [vmem:[#allocation108_spill] sm:$0xff] }
 0x609   : > { %v3525_v60 = vsel %vm1158_vm8, %v3464_v6, %v3496_v25  ;;  %v3541_v29 = vsel %vm1158_vm8, %v3496_v25, %v3464_v6  ;;  %4142 = vmatpush.msra.mxu2 %v2536_v3  ;;  %v10277_v3 = vld [vmem:[#allocation24_spill] sm:$0xff] }
 0x60a   : > { %4154 = vmatpush.msra.mxu3 %v10263_v13  ;;  %v3565_v28 = vmul.f32 %v8629_v1, %v3525_v60  ;;  %v3566_v38 = vmul.f32 %v8812_v36, %v3541_v29  ;;  %v2662_v6 = vsel %vm702_vm4, %v10277_v3, %v10276_v43  ;;  %v10278_v29 = vld [vmem:[#allocation202_spill] sm:$0xff]  ;;  %v3633_v13 = vld [vmem:[%s9193_s6 + $0x40] sm:$0xff]  ;;  %v3042_v3 = vsel %vm894_vm5, %v10208_v56, %v10209_v16  ;;  %v10309_v56 = vld [vmem:[#allocation207_spill] sm:$0xff] }
 0x60b   : > { %4143 = vmatpush.msra.mxu2 %v2534_v26  ;;  %v10279_v26 = vld [vmem:[#allocation110_spill] sm:$0xff] }
 0x60c   : > { %4155 = vmatpush.msra.mxu3 %v10264_v55  ;;  %4101 = vmatpush.msra.mxu0 %v3565_v28  ;;  %v10280_v28 = vld [vmem:[#allocation10_spill] sm:$0xff]  ;;  %v10281_v55 = vld [vmem:[#allocation84_spill] sm:$0xff] }
 0x60d   : > { %4144 = vmatmul.f32.vlgmr.msra.gmra.mxu2 %v4488_v48  ;;  %4281 = vmatpush.msra.mxu1 %v3566_v38  ;;  %v2661_v38 = vsel %vm702_vm4, %v10280_v28, %v10279_v26  ;;  %v10282_v48 = vld [vmem:[#allocation96_spill] sm:$0xff]  ;;  %v10307_v26 = vld [vmem:[#allocation167_spill] sm:$0xff]  ;;  %v10308_v16 = vld [vmem:[#allocation174_spill] sm:$0xff] }
 0x60e   : > { %4208 = vmatpush.msrb.mxu2 %v10265_v39  ;;  %4156 = vmatpush.msra.mxu3 %v10266_v18  ;;  %v3460_v30 = vpop.permute.xlu1 %3459  ;;  %v10283_v39 = vld [vmem:[#allocation179_spill] sm:$0xff] }
 0x60f   : > { %v3523_v33 = vsel %vm1158_vm8, %v3460_v30, %v3492_v40  ;;  %v3539_v0 = vsel %vm1158_vm8, %v3492_v40, %v3460_v30  ;;  %v10284_v30 = vld [vmem:[#allocation209_spill] sm:$0xff]  ;;  %v10286_v40 = vld [vmem:[#allocation211_spill] sm:$0xff] }
 0x610   : > { %4209 = vmatpush.msrb.mxu2 %v10267_v41  ;;  %4157 = vmatpush.msra.mxu3 %v10268_v31  ;;  %v3494_v14 = vpop.permute.xlu0 %3493  ;;  %v3561_v12 = vmul.f32 %v8629_v1, %v3523_v33  ;;  %v3562_v60 = vmul.f32 %v8812_v36, %v3539_v0  ;;  %v10285_v41 = vld [vmem:[#allocation184_spill] sm:$0xff]  ;;  %v10287_v31 = vld [vmem:[#allocation101_spill] sm:$0xff]  ;;  %v10290_v33 = vld [vmem:[#allocation94_spill] sm:$0xff] }
 0x611   : > { %v3524_v58 = vsel %vm1158_vm8, %v3462_v63, %v3494_v14  ;;  %v3540_v51 = vsel %vm1158_vm8, %v3494_v14, %v3462_v63  ;;  %v10275_v63 = vld [vmem:[#allocation127_spill] sm:$0xff]  ;;  %v10288_v14 = vld [vmem:[#allocation68_spill] sm:$0xff]  ;;  %v10294_v0 = vld [vmem:[#allocation122_spill] sm:$0xff] }
 0x612   : > { %4210 = vmatpush.msrb.mxu2 %v10269_v24  ;;  %v3563_v49 = vmul.f32 %v8629_v1, %v3524_v58  ;;  %v3564_v11 = vmul.f32 %v8812_v36, %v3540_v51  ;;  %4158 = vmatpush.msra.mxu3 %v10270_v52  ;;  %v2706_v25 = vmul.f32 %v10275_v63, %v2664_v62  ;;  %v10289_v62 = vld [vmem:[#allocation107_spill] sm:$0xff]  ;;  %v10291_v58 = vld [vmem:[#allocation152_spill] sm:$0xff]  ;;  %v10292_v51 = vld [vmem:[#allocation98_spill] sm:$0xff] }
 0x613   : > { %v2704_v1 = vmul.f32 %v10275_v63, %v2663_v44  ;;  %v2702_v36 = vmul.f32 %v10275_v63, %v2662_v6  ;;  %v2700_v18 = vmul.f32 %v10275_v63, %v2661_v38  ;;  %v10293_v24 = vld [vmem:[#allocation41_spill] sm:$0xff]  ;;  %v10296_v52 = vld [vmem:[#allocation158_spill] sm:$0xff] }
 0x614   : > { %4211 = vmatpush.msrb.mxu2 %v10273_v7  ;;  %4159 = vmatpush.msra.mxu3 %v10274_v23  ;;  %v10299_v44 = vld [vmem:[#allocation126_spill] sm:$0xff] }
 0x615   : > { %4102 = vmatpush.msra.mxu0 %v3563_v49  ;;  %4282 = vmatpush.msra.mxu1 %v3564_v11  ;;  %v3044_v49 = vsel %vm894_vm5, %v10294_v0, %v10293_v24  ;;  %v10295_v11 = vld [vmem:[#allocation190_spill] sm:$0xff]  ;;  %v3043_v7 = vsel %vm894_vm5, %v10299_v44, %v10298_v59  ;;  %v10326_v0 = vld [vmem:[#allocation100_spill] sm:$0xff] }
 0x616   : > { %4212 = vmatpush.msrb.mxu2 %v10278_v29  ;;  %4160 = vmatpush.msra.mxu3 %v2706_v25  ;;  %v10301_v23 = vld [vmem:[#allocation150_spill] sm:$0xff]  ;;  %v10303_v25 = vld [vmem:[#allocation147_spill] sm:$0xff] }
 0x617   : > { %4103 = vmatpush.msra.mxu0 %v3561_v12  ;;  %4283 = vmatpush.msra.mxu1 %v3562_v60  ;;  %v10300_v12 = vld [vmem:[#allocation192_spill] sm:$0xff]  ;;  %v10302_v63 = vld [vmem:[#allocation18_spill] sm:$0xff]  ;;  %v3070_v43 = vmul.f32 %v10303_v25, %v3044_v49  ;;  %v3068_v29 = vmul.f32 %v10303_v25, %v3043_v7  ;;  %v3066_v28 = vmul.f32 %v10303_v25, %v3042_v3 }
 0x618   : > { %4213 = vmatpush.msrb.mxu2 %v10281_v55  ;;  %4104 = vmatmul.f32.vlgmr.msra.gmra.mxu0 %v3633_v13  ;;  %v10304_v6 = vld [vmem:[#allocation78_spill] sm:$0xff]  ;;  %v10305_v60 = vld [vmem:[#allocation44_spill] sm:$0xff]  ;;  %v10310_v55 = vld [vmem:[#allocation169_spill] sm:$0xff] }
 0x619   : > { %4161 = vmatpush.msra.mxu3 %v2704_v1  ;;  %4168 = vmatpush.msrb.mxu0 %v10282_v48  ;;  %v10306_v1 = vld [vmem:[#allocation171_spill] sm:$0xff]  ;;  %v10327_v49 = vld [vmem:[#allocation210_spill] sm:$0xff] }
 0x61a   : > { %4214 = vmatpush.msrb.mxu2 %v10283_v39  ;;  %4284 = vmatmul.f32.vlgmr.msra.gmra.mxu1 %v3633_v13  ;;  %v3041_v13 = vsel %vm894_vm5, %v10210_v37, %v10211_v61  ;;  %v10312_v48 = vld [vmem:[#allocation39_spill] sm:$0xff] }
 0x61b   : > { %4162 = vmatpush.msra.mxu3 %v2702_v36  ;;  %4169 = vmatpush.msrb.mxu0 %v10284_v30  ;;  %v3064_v38 = vmul.f32 %v10303_v25, %v3041_v13  ;;  %v10311_v36 = vld [vmem:[#allocation134_spill] sm:$0xff]  ;;  %v10313_v37 = vld [vmem:[#allocation139_spill] sm:$0xff] }
 0x61c   : > { %4215 = vmatpush.msrb.mxu2 %v10285_v41  ;;  %v2830_v61 = vsel %vm790_vm2, %v10312_v48, %v10311_v36  ;;  %v10314_v39 = vld [vmem:[#allocation115_spill] sm:$0xff]  ;;  %v10316_v41 = vld [vmem:[#allocation144_spill] sm:$0xff] }
 0x61d   : > { %4163 = vmatpush.msra.mxu3 %v2700_v18  ;;  %4170 = vmatpush.msrb.mxu0 %v10286_v40  ;;  %v10315_v18 = vld [vmem:[#allocation60_spill] sm:$0xff] }
 0x61e   : > { %4164 = vmatmul.f32.vlgmr.msra.gmra.mxu3 %v10287_v31  ;;  %4216 = vmatpush.msrb.mxu2 %v10288_v14  ;;  %v2829_v30 = vsel %vm790_vm2, %v10315_v18, %v10314_v39  ;;  %v10317_v40 = vld [vmem:[#allocation136_spill] sm:$0xff]  ;;  %v10318_v14 = vld [vmem:[#allocation118_spill] sm:$0xff] }
 0x61f   : > { %4228 = vmatpush.msrb.mxu3 %v10289_v62  ;;  %4171 = vmatpush.msrb.mxu0 %v10290_v33  ;;  %v2872_v31 = vmul.f32 %v10317_v40, %v2830_v61  ;;  %v10319_v62 = vld [vmem:[#allocation33_spill] sm:$0xff] }
 0x620   : > { %4217 = vmatpush.msrb.mxu2 %v10291_v58  ;;  %v10320_v33 = vld [vmem:[#allocation113_spill] sm:$0xff]  ;;  %v10321_v58 = vld [vmem:[#allocation67_spill] sm:$0xff] }
 0x621   : > { %4229 = vmatpush.msrb.mxu3 %v10292_v51  ;;  %4172 = vmatpush.msrb.mxu0 %v10295_v11  ;;  %v2827_v51 = vsel %vm790_vm2, %v10321_v58, %v10320_v33 }
 0x622   : > { %4218 = vmatpush.msrb.mxu2 %v10296_v52  ;;  %v2866_v24 = vmul.f32 %v10317_v40, %v2827_v51 }
 0x623   : > { %4230 = vmatpush.msrb.mxu3 %v10297_v2  ;;  %4173 = vmatpush.msrb.mxu0 %v10300_v12 }
 0x624   : > { %4219 = vmatpush.msrb.mxu2 %v10301_v23 }
 0x625   : > { %4231 = vmatpush.msrb.mxu3 %v10302_v63  ;;  %4174 = vmatpush.msrb.mxu0 %v10304_v6 }
 0x626   : > { %4220 = vmatpush.msrb.mxu2 %v3070_v43 }
 0x627   : > { %4232 = vmatpush.msrb.mxu3 %v10305_v60  ;;  %4175 = vmatpush.msrb.mxu0 %v10306_v1 }
 0x628   : > { %4221 = vmatpush.msrb.mxu2 %v3068_v29 }
 0x629   : > { %4233 = vmatpush.msrb.mxu3 %v10307_v26  ;;  %4176 = vmatpush.msrb.mxu0 %v10308_v16 }
 0x62a   : > { %4222 = vmatpush.msrb.mxu2 %v3066_v28 }
 0x62b   : > { %4234 = vmatpush.msrb.mxu3 %v10309_v56  ;;  %4177 = vmatpush.msrb.mxu0 %v10310_v55 }
 0x62c   : > { %4223 = vmatpush.msrb.mxu2 %v3064_v38 }
 0x62d   : > { %4235 = vmatpush.msrb.mxu3 %v8593_v19  ;;  %4178 = vmatpush.msrb.mxu0 %v10313_v37  ;;  %v2828_v19 = vsel %vm790_vm2, %v10319_v62, %v10318_v14 }
 0x62e   : > { %4224 = vmatmul.f32.vlgmr.msrb.gmra.mxu2 %v8583_v47  ;;  %v2870_v47 = vmul.f32 %v10317_v40, %v2829_v30 }
 0x62f   : > { %4236 = vmatpush.msrb.mxu3 %v8665_v46  ;;  %4179 = vmatpush.msrb.mxu0 %v10316_v41  ;;  %v2868_v46 = vmul.f32 %v10317_v40, %v2828_v19 }
 0x631   : > { %4237 = vmatpush.msrb.mxu3 %v8736_v4  ;;  %4180 = vmatpush.msrb.mxu0 %v2872_v31  ;;  %v4489_v4 = vld [vmem:[%s9193_s6 + $0x18] sm:$0xff] }
 0x633   : > { %4238 = vmatpush.msrb.mxu3 %v8801_v15  ;;  %4181 = vmatpush.msrb.mxu0 %v2870_v47  ;;  %v10323_v15 = vld [vmem:[#allocation133_spill] sm:$0xff] }
 0x635   : > { %4239 = vmatpush.msrb.mxu3 %v8772_v45  ;;  %4182 = vmatpush.msrb.mxu0 %v2868_v46  ;;  %v10324_v45 = vld [vmem:[#allocation93_spill] sm:$0xff] }
 0x637   : > { %4240 = vmatpush.msrb.mxu3 %v8859_v35  ;;  %4183 = vmatpush.msrb.mxu0 %v2866_v24  ;;  %v10325_v35 = vld [vmem:[#allocation123_spill] sm:$0xff] }
 0x638   : > { %4184 = vmatmul.f32.vlgmr.msrb.gmra.mxu0 %v4489_v4 }
 0x639   : > { %4241 = vmatpush.msrb.mxu3 %v8906_v27  ;;  %4248 = vmatpush.msra.mxu0 %v10322_v8 }
 0x63b   : > { %4242 = vmatpush.msrb.mxu3 %v8885_v54  ;;  %4249 = vmatpush.msra.mxu0 %v10323_v15  ;;  %v3965_v54 = vpop.f32.mrf.mxu1 }
 0x63d   : > { %4243 = vmatpush.msrb.mxu3 %v8931_v42  ;;  %4250 = vmatpush.msra.mxu0 %v10324_v45 }
 0x63e   : > { %4244 = vmatmul.f32.vlgmr.msrb.gmra.mxu3 %v8936_v34 }
 0x63f   : > { %4251 = vmatpush.msra.mxu0 %v10325_v35 }
 0x641   : > { %4252 = vmatpush.msra.mxu0 %v10326_v0 }
 0x643   : > { %4253 = vmatpush.msra.mxu0 %v8560_v53  ;;  %v3945_v53 = vpop.f32.mrf.mxu0 }
 0x645   : > { %4254 = vmatpush.msra.mxu0 %v10327_v49 }
 0x647   : > { %4255 = vmatpush.msra.mxu0 %v8706_v9  ;;  %v3926_v9 = vpop.permute.xlu0 %3925 }
 0x649   : > { %4256 = vmatpush.msra.mxu0 %v8765_v50  ;;  %v3946_v50 = vadd.f32 %v3945_v53, %v3926_v9 }
 0x64b   : > { %4257 = vmatpush.msra.mxu0 %v8794_v17  ;;  %v3985_v27 = vpop.f32.mrf.mxu0  ;;  %v3966_v17 = vadd.f32 %v3965_v54, %v3946_v50 }
 0x64d   : > { %4258 = vmatpush.msra.mxu0 %v8840_v5  ;;  %v3986_v42 = vadd.f32 %v3985_v27, %v3966_v17  ;;  %v4005_v5 = vpop.f32.mrf.mxu1 }
 0x64f   : > { %4259 = vmatpush.msra.mxu0 %v8882_v57  ;;  %v4006_v34 = vadd.f32 %v4005_v5, %v3986_v42 }
 0x651   : > { %4260 = vmatpush.msra.mxu0 %v8893_v21 }
 0x653   : > { %4261 = vmatpush.msra.mxu0 %v8921_v32  ;;  %v4025_v57 = vpop.f32.mrf.mxu0 }
 0x654   : > { %v4026_v11 = vadd.f32 %v4025_v57, %v4006_v34 }
 0x655   : > { %4262 = vmatpush.msra.mxu0 %v8960_v20  ;;  %v4045_v21 = vpop.f32.mrf.mxu1 }
 0x656   : > { %v4046_v32 = vadd.f32 %v4045_v21, %v4026_v11 }
 0x657   : > { %4263 = vmatpush.msra.mxu0 %v8972_v22 }
 0x658   : > { %4264 = vmatmul.f32.vlgmr.msra.gmra.mxu0 %v8977_v10 }
 0x65d   : > { %v4125_v26 = vpop.f32.mrf.mxu1 }
 0x65e   : > { %v4126_v16 = vadd.f32 %v4125_v26, %v3926_v9 }
 0x665   : > { %v4205_v61 = vpop.f32.mrf.mxu1 }
 0x66e   : > { %v4065_v52 = vpop.f32.mrf.mxu2 }
 0x66f   : > { %v4066_v2 = vadd.f32 %v4065_v52, %v4046_v32 }
 0x680   : > { %v4085_v20 = vpop.f32.mrf.mxu3 }
 0x681   : > { %v4086_v22 = vadd.f32 %v4085_v20, %v4066_v2 }
 0x690   : > { %v4145_v28 = vpop.f32.mrf.mxu2 }
 0x691   : > { %v4146_v38 = vadd.f32 %v4145_v28, %v4126_v16 }
 0x695   : > { %v4105_v59 = vpop.f32.mrf.mxu0 }
 0x696   : > { %v4106_v10 = vadd.f32 %v4105_v59, %v4086_v22 }
 0x697   : > { %v4285_v31 = vpop.f32.mrf.mxu1 }
 0x698   : > { %v4454_v44 = vmul.f32 -1.442695, %v4106_v10 }
 0x69a   : > { %4480 = vpow2.f32 %v4454_v44 }
 0x6a0   : > { %v4481_v7 = vpop.eup %4480 }
 0x6a1   : > { %v4294_v12 = vadd.f32 1.0, %v4481_v7  ;;  %v4165_v56 = vpop.f32.mrf.mxu3 }
 0x6a2   : > { %v4166_v36 = vadd.f32 %v4165_v56, %v4146_v38 }
 0x6a3   : > { %4482 = vrcp.f32 %v4294_v12  ;;  %v4307_v43 = vand.u32 2147483648, %v4294_v12  ;;  %v4305_v6 = vand.u32 2147483647, %v4294_v12  ;;  %vm4301_vm11 = vweird.f32 %v4294_v12 }
 0x6a5   : > { %v4308_v29 = vor.u32 1.1754944e-38, %v4307_v43  ;;  %vm4306_vm13 = vcmp.eq.f32.partialorder %v4305_v6, 8.507059e+37 }
 0x6a9   : > { %v4483_v23 = vpop.eup %4482 }
 0x6aa   : > { %v4297_v63 = vmul.f32 %v4483_v23, %v4294_v12  ;;  %vm4302_vm10 = vweird.f32 %v4483_v23 }
 0x6ab   : > { %vm4303_vm12 = vmor %vm4301_vm11, %vm4302_vm10 }
 0x6ac   : > { %v4298_v25 = vsub.f32 1.0, %v4297_v63 }
 0x6ae   : > { %v4299_v3 = vmul.f32 %v4483_v23, %v4298_v25 }
 0x6b0   : > { %v4300_v60 = vadd.f32 %v4483_v23, %v4299_v3 }
 0x6b1   : > { %v4225_v39 = vpop.f32.mrf.mxu2 }
 0x6b2   : > { %v4304_v13 = vsel %vm4303_vm12, %v4483_v23, %v4300_v60 }
 0x6b3   : > { %v4309_v1 = vsel %vm4306_vm13, %v4308_v29, %v4304_v13 }
 0x6b4   : > { %4326 = vst [vmem:[%s9180_s21] sm:$0xff] %v4309_v1 }
 0x6b5   : > { %v4185_v55 = vpop.f32.mrf.mxu0 }
 0x6b6   : > { %v4186_v48 = vadd.f32 %v4185_v55, %v4166_v36 }
 0x6b8   : > { %v4206_v37 = vadd.f32 %v4205_v61, %v4186_v48 }
 0x6ba   : > { %v4226_v30 = vadd.f32 %v4225_v39, %v4206_v37 }
 0x6c1   : > { %v4245_v18 = vpop.f32.mrf.mxu3 }
 0x6c2   : > { %v4246_v41 = vadd.f32 %v4245_v18, %v4226_v30 }
 0x6d5   : > { %v4265_v40 = vpop.f32.mrf.mxu0 }
 0x6d6   : > { %v4266_v14 = vadd.f32 %v4265_v40, %v4246_v41 }
 0x6d8   : > { %v4286_v62 = vadd.f32 %v4285_v31, %v4266_v14 }
 0x6da   : > { %v4455_v19 = vmul.f32 -1.442695, %v4286_v62 }
 0x6dc   : > { %4484 = vpow2.f32 %v4455_v19 }
 0x6e2   : > { %v4485_v47 = vpop.eup %4484 }
 0x6e3   : > { %v4295_v33 = vadd.f32 1.0, %v4485_v47 }
 0x6e5   : > { %4486 = vrcp.f32 %v4295_v33  ;;  %v4322_v24 = vand.u32 2147483648, %v4295_v33  ;;  %v4320_v8 = vand.u32 2147483647, %v4295_v33  ;;  %vm4316_vm15 = vweird.f32 %v4295_v33 }
 0x6e7   : > { %v4323_v45 = vor.u32 1.1754944e-38, %v4322_v24  ;;  %vm4321_vm1 = vcmp.eq.f32.partialorder %v4320_v8, 8.507059e+37 }
 0x6eb   : > { %v4487_v58 = vpop.eup %4486 }
 0x6ec   : > { %v4312_v51 = vmul.f32 %v4487_v58, %v4295_v33  ;;  %vm4317_vm14 = vweird.f32 %v4487_v58 }
 0x6ed   : > { %vm4318_vm0 = vmor %vm4316_vm15, %vm4317_vm14 }
 0x6ee   : > { %v4313_v46 = vsub.f32 1.0, %v4312_v51 }
 0x6f0   : > { %v4314_v4 = vmul.f32 %v4487_v58, %v4313_v46 }
 0x6f2   : > { %v4315_v15 = vadd.f32 %v4487_v58, %v4314_v4 }
 0x6f4   : > { %v4319_v35 = vsel %vm4318_vm0, %v4487_v58, %v4315_v15 }
 0x6f5   : > { %v4324_v0 = vsel %vm4321_vm1, %v4323_v45, %v4319_v35 }
 0x6f6   : > { %4327 = vst [vmem:[%s9180_s21 + $0x8] sm:$0xff] %v4324_v0 }
 0x6f7 PF: > { %s18_s27 = sadd.s32 1, %s4496_s27  }
 0x6f8   : > { %p15_p4 = scmp.ge.s32.totalorder %s18_s27, 4  }
 0x6fa   :  { %17 = sbr.rel (!%p15_p4) target bundleno = 1 (0x1), region = 89 }

</bundles_post_ra>
